<compile_context>
chip_gen: v6e
topology: v6e:2x2x1
jax: 0.10.0
libtpu: 0.0.40
codegen_flags: <defaults>
</compile_context>

<pallas_src>
import functools

import jax
import jax.numpy as jnp
from jax.experimental import pallas as pl
from jax.experimental.pallas import tpu as pltpu


# ---------------------------------------------------------------------------
# Generation-aware VMEM budgeting.
# ---------------------------------------------------------------------------
@functools.lru_cache(maxsize=None)
def _vmem_config():
    try:
        cap = int(pltpu.get_tpu_info().vmem_capacity_bytes)
    except Exception:                         # CPU/interpret/older runtime
        cap = 64 << 20
    cap = max(cap, 16 << 20)
    limit = int(min(cap * 3 // 4, 64 << 20))  # raised scoped-VMEM limit
    budget = int(min(cap // 4, limit // 2))   # planner working-set budget
    return limit, budget


def _divisors_desc(n):
    return [t for t in range(n, 0, -1) if n % t == 0]


def _largest_divisor_at_most(n, cap):
    for t in _divisors_desc(n):
        if t <= cap:
            return t
    return 1


# ---------------------------------------------------------------------------
# conv_first kernel: one (TH*W, 9*in_nc) x (9*in_nc, nf) bf16 matmul + bias +
# LeakyReLU(0.1).  The im2col packing of the 9 taps is done in the wrapper.
# ---------------------------------------------------------------------------
def _conv_first_kernel(x_ref, w_ref, b_ref, o_ref):
    _, TH, W, K = x_ref.shape
    C = w_ref.shape[1]
    x = x_ref[0].reshape(TH * W, K)
    acc = jnp.dot(x, w_ref[...], preferred_element_type=jnp.float32)
    acc = acc + b_ref[...]
    acc = jnp.maximum(acc, 0.1 * acc)         # LeakyReLU(0.1)
    o_ref[...] = acc.reshape(1, TH, W, C).astype(o_ref.dtype)


def _conv_first_call(x_i2c, w, b, *, vmem_limit, budget):
    N, H, W, K = x_i2c.shape
    C = w.shape[1]
    # rough per-row working set (DMA blocks + lane-padded in-kernel copies)
    per_row = W * (4 * K + 12 * C + 768)
    TH = _largest_divisor_at_most(H, max(1, budget // max(per_row, 1)))
    R = H // TH
    return pl.pallas_call(
        _conv_first_kernel,
        out_shape=jax.ShapeDtypeStruct((N, H, W, C), jnp.float32),
        grid=(N, R),
        in_specs=[pl.BlockSpec((1, TH, W, K), lambda n, r: (n, r, 0, 0)),
                  pl.BlockSpec((K, C), lambda n, r: (0, 0)),
                  pl.BlockSpec((1, C), lambda n, r: (0, 0))],
        out_specs=pl.BlockSpec((1, TH, W, C), lambda n, r: (n, r, 0, 0)),
        compiler_params=pltpu.CompilerParams(
            dimension_semantics=("parallel", "parallel"),
            vmem_limit_bytes=vmem_limit),
    )(x_i2c, w, b)


# ---------------------------------------------------------------------------
# Fused residual-chain kernel: k x ResidualBlockNoBN on one row tile.
#   feat = feat + conv2(relu(conv1(feat)))      (per block, all in VMEM)
# The kx taps are folded into one K=3C im2col slab; each ky tap is one matmul
# accumulated in f32.  A 2*k-row halo (when row-tiled) is recomputed in-kernel.
# ---------------------------------------------------------------------------
def _conv3x3(x, w3, EXT, W, C):
    """3x3 'same' conv over an (EXT, W, C) tile with zero padding on all tile
    edges.  x: matmul dtype, w3: (3, 3C, C) = (ky, kx*cin, cout).  Returns f32."""
    zc = jnp.zeros((EXT, 1, C), x.dtype)
    xpad = jnp.concatenate([zc, x, zc], axis=1)                       # (EXT, W+2, C)
    xcat = jnp.concatenate(
        [xpad[:, 0:W], xpad[:, 1:W + 1], xpad[:, 2:W + 2]], axis=-1)  # (EXT, W, 3C)
    zr = jnp.zeros((1, W, 3 * C), x.dtype)
    xcat = jnp.concatenate([zr, xcat, zr], axis=0)                    # (EXT+2, W, 3C)
    acc = jnp.zeros((EXT * W, C), jnp.float32)
    for ky in range(3):
        slab = xcat[ky:ky + EXT].reshape(EXT * W, 3 * C)
        acc = acc + jnp.dot(slab, w3[ky], preferred_element_type=jnp.float32)
    return acc.reshape(EXT, W, C)


def _res_chain_kernel(*refs, k, TH, W, C, H, HALO):
    if HALO > 0:
        main_ref, top_ref, bot_ref, w1_ref, b1_ref, w2_ref, b2_ref, o_ref = refs
    else:
        main_ref, w1_ref, b1_ref, w2_ref, b2_ref, o_ref = refs

    r = pl.program_id(1)
    R = pl.num_programs(1)
    EXT = TH + 2 * HALO
    mm_dtype = w1_ref.dtype

    feat = main_ref[0]                                                # (TH, W, C) f32
    if HALO > 0:
        top = top_ref[0]
        bot = bot_ref[0]
        top = jnp.where(r > 0, top, jnp.zeros_like(top))              # above image -> 0
        bot = jnp.where(r < R - 1, bot, jnp.zeros_like(bot))          # below image -> 0
        feat = jnp.concatenate([top, feat, bot], axis=0)              # (EXT, W, C)
        row = jax.lax.broadcasted_iota(jnp.int32, (EXT, 1, 1), 0) + (r * TH - HALO)
        inside = (row >= 0) & (row < H)
    else:
        inside = None

    for i in range(k):
        x_in = feat.astype(mm_dtype)
        if inside is not None:                       # keep out-of-image rows zero
            x_in = jnp.where(inside, x_in, jnp.zeros_like(x_in))
        h = _conv3x3(x_in, w1_ref[i], EXT, W, C) + b1_ref[i]
        h = jnp.maximum(h, 0.0)
        if inside is not None:                       # conv2 zero-pads at image border
            h = jnp.where(inside, h, 0.0)
        y = _conv3x3(h.astype(mm_dtype), w2_ref[i], EXT, W, C) + b2_ref[i]
        feat = feat + y                              # residual add, f32

    out = feat if HALO == 0 else feat[HALO:HALO + TH]
    o_ref[...] = out.reshape(1, TH, W, C).astype(o_ref.dtype)


def _res_chain_call(feat, w1s, b1s, w2s, b2s, *, TH, HALO, vmem_limit):
    N, H, W, C = feat.shape
    k = w1s.shape[0]
    R = H // TH
    kernel = functools.partial(_res_chain_kernel, k=k, TH=TH, W=W, C=C, H=H,
                               HALO=HALO)

    main_spec = pl.BlockSpec((1, TH, W, C), lambda n, r: (n, r, 0, 0))
    out_spec = pl.BlockSpec((1, TH, W, C), lambda n, r: (n, r, 0, 0))
    w_spec = pl.BlockSpec((k, 3, 3 * C, C), lambda n, r: (0, 0, 0, 0))
    b_spec = pl.BlockSpec((k, C), lambda n, r: (0, 0))

    in_specs = [main_spec]
    args = [feat]
    if HALO > 0:
        tb = TH // HALO                     # main-tile height in halo-block units
        hb_last = H // HALO - 1
        top_spec = pl.BlockSpec(
            (1, HALO, W, C), lambda n, r: (n, jnp.maximum(r * tb - 1, 0), 0, 0))
        bot_spec = pl.BlockSpec(
            (1, HALO, W, C), lambda n, r: (n, jnp.minimum(r * tb + tb, hb_last), 0, 0))
        in_specs += [top_spec, bot_spec]
        args += [feat, feat]
    in_specs += [w_spec, b_spec, w_spec, b_spec]
    args += [w1s, b1s, w2s, b2s]

    return pl.pallas_call(
        kernel,
        out_shape=jax.ShapeDtypeStruct((N, H, W, C), feat.dtype),
        grid=(N, R),
        in_specs=in_specs,
        out_specs=out_spec,
        compiler_params=pltpu.CompilerParams(
            dimension_semantics=("parallel", "parallel"),
            vmem_limit_bytes=vmem_limit),
    )(*args)


# ---------------------------------------------------------------------------
# Tiling / fusion planner for the residual chain.
# ---------------------------------------------------------------------------
def _chain_plan(N, H, W, C, n_blocks, budget, *, tile_rows=None,
                blocks_per_call=None):
    kmax = max(1, min(n_blocks, blocks_per_call if blocks_per_call else 8))

    def est_bytes(TH, k, halo):
        ext = TH + 2 * halo
        work = ext * W * C * 56                        # in/out blocks + f32 feat + slabs + accs
        wts = 2 * (k * 2 * (9 * C * C * 2 + 4 * C))    # double-buffered weights + biases
        return work + wts

    if tile_rows is not None:                          # explicit override (testing/tuning)
        TH = int(tile_rows)
        assert H % TH == 0, "tile_rows must divide H"
        k = kmax
        halo = 0 if TH == H else 2 * k
        assert halo == 0 or TH % halo == 0, \
            "tile_rows must be a multiple of 2*blocks_per_call when it tiles H"
        return TH, halo, k

    # Whole image per grid step (no halo recompute); prefer it only if the
    # grid still has >= 2 steps so both v7x TensorCores get work.
    if N >= 2 and est_bytes(H, kmax, 0) <= budget:
        return H, 0, kmax

    # Row tiles with a 2*k-row recomputed halo.  Prefer big tiles; keep the
    # halo small relative to the tile so recompute overhead stays modest.
    for TH in _divisors_desc(H):
        if TH >= H:
            continue
        if TH < 2:
            break
        k_hi = min(kmax, max(TH // 8, 1))
        for k in range(k_hi, 0, -1):
            if TH % (2 * k):
                continue
            if est_bytes(TH, k, 2 * k) <= budget:
                return TH, 2 * k, k

    # Fallback: whole image in one step.
    if est_bytes(H, kmax, 0) <= 2 * budget:
        return H, 0, kmax
    return H, 0, 1


# ---------------------------------------------------------------------------
# ContentExtractor forward.
# ---------------------------------------------------------------------------
def content_extractor_forward(x_nchw, params, *, compute_dtype=jnp.bfloat16,
                              blocks_per_call=None, tile_rows=None):
    """x_nchw: (N, in_nc, H, W) f32.  Returns (N, nf, H, W) f32."""
    w_cf = params["conv_first_w"]                   # (3, 3, in_nc, nf)
    b_cf = params["conv_first_b"]                   # (nf,)
    nf = b_cf.shape[0]
    in_nc = w_cf.shape[2]
    N, _, H, W = x_nchw.shape
    vmem_limit, budget = _vmem_config()

    x = jnp.transpose(x_nchw, (0, 2, 3, 1))         # NHWC f32

    # conv_first: pack the 9 taps into lanes (im2col) outside Pallas, then one
    # fused matmul + bias + LeakyReLU kernel.
    xp = jnp.pad(x, ((0, 0), (1, 1), (1, 1), (0, 0)))
    cols = [xp[:, dy:dy + H, dx:dx + W, :] for dy in range(3) for dx in range(3)]
    x_i2c = jnp.concatenate(cols, axis=-1).astype(compute_dtype)    # (N,H,W,9*in_nc)
    w0 = w_cf.reshape(9 * in_nc, nf).astype(compute_dtype)
    b0 = b_cf.reshape(1, nf).astype(jnp.float32)
    feat = _conv_first_call(x_i2c, w0, b0, vmem_limit=vmem_limit, budget=budget)

    # Fused residual chain: k blocks per pallas_call, feat stays in VMEM (f32)
    # across the fused blocks; inter-chunk feat lives in HBM as f32.
    blocks = params["blocks"]
    n_blocks = len(blocks)
    if n_blocks:
        TH, HALO, k = _chain_plan(N, H, W, nf, n_blocks, budget,
                                  tile_rows=tile_rows,
                                  blocks_per_call=blocks_per_call)
        for s in range(0, n_blocks, k):
            chunk = blocks[s:s + k]
            w1s = jnp.stack([w1.reshape(3, 3 * nf, nf) for (w1, _, _, _) in chunk]
                            ).astype(compute_dtype)
            b1s = jnp.stack([b1 for (_, b1, _, _) in chunk]).astype(jnp.float32)
            w2s = jnp.stack([w2.reshape(3, 3 * nf, nf) for (_, _, w2, _) in chunk]
                            ).astype(compute_dtype)
            b2s = jnp.stack([b2 for (_, _, _, b2) in chunk]).astype(jnp.float32)
            feat = _res_chain_call(feat, w1s, b1s, w2s, b2s,
                                   TH=TH, HALO=HALO, vmem_limit=vmem_limit)

    return jnp.transpose(feat, (0, 3, 1, 2))        # NCHW f32


# ---------------------------------------------------------------------------
# Deterministic init (kaiming-style normal scaled by 0.1, as in
# arch_util.default_init_weights / ResidualBlockNoBN).
# ---------------------------------------------------------------------------
def init_params(key, in_nc, nf, n_blocks):
    def conv_init(k, cin, cout, scale):
        kw, _ = jax.random.split(k)
        std = (2.0 / (cin * 9)) ** 0.5
        w = jax.random.normal(kw, (3, 3, cin, cout), jnp.float32) * std * scale
        return w, jnp.zeros((cout,), jnp.float32)

    keys = jax.random.split(key, 1 + 2 * n_blocks)
    cf_w, cf_b = conv_init(keys[0], in_nc, nf, 0.1)
    blocks = []
    for i in range(n_blocks):
        w1, b1 = conv_init(keys[1 + 2 * i], nf, nf, 0.1)
        w2, b2 = conv_init(keys[2 + 2 * i], nf, nf, 0.1)
        blocks.append((w1, b1, w2, b2))
    return {"conv_first_w": cf_w, "conv_first_b": cf_b, "blocks": blocks}


# ---------------------------------------------------------------------------
# Pure-JAX f32 reference (lax conv) for the correctness check.
# ---------------------------------------------------------------------------
def reference_forward(x_nchw, params):
    def conv(x, w, b):
        y = jax.lax.conv_general_dilated(
            x, w, window_strides=(1, 1), padding="SAME",
            dimension_numbers=("NHWC", "HWIO", "NHWC"))
        return y + b[None, None, None, :]

    x = jnp.transpose(x_nchw, (0, 2, 3, 1)).astype(jnp.float32)
    feat = conv(x, params["conv_first_w"], params["conv_first_b"])
    feat = jnp.where(feat >= 0, feat, 0.1 * feat)
    for (w1, b1, w2, b2) in params["blocks"]:
        h = jnp.maximum(conv(feat, w1, b1), 0.0)
        feat = feat + conv(h, w2, b2)
    return jnp.transpose(feat, (0, 3, 1, 2))


if __name__ == "__main__":
    # Small config consistent with ContentExtractor(in_nc=3, nf=..., n_blocks=...)
    N, in_nc, H, W = 2, 3, 16, 16
    nf, n_blocks = 16, 2

    key = jax.random.PRNGKey(0)
    k_x, k_p = jax.random.split(key)
    x = jax.random.normal(k_x, (N, in_nc, H, W), jnp.float32)   # NCHW input
    params = init_params(k_p, in_nc, nf, n_blocks)

    ref = jax.block_until_ready(reference_forward(x, params))

    # Path A: whole-image row tile, both residual blocks fused into one call.
    out = jax.block_until_ready(jax.jit(content_extractor_forward)(x, params))
    assert out.shape == (N, nf, H, W)
    err = float(jnp.max(jnp.abs(out - ref)))
    assert err < 2e-2, f"fused-chain path mismatch vs reference: max abs err {err}"

    # Path B: forced row tiling (exercises the halo-recompute code path).
    fwd_tiled = jax.jit(functools.partial(content_extractor_forward, tile_rows=8))
    out_t = jax.block_until_ready(fwd_tiled(x, params))
    err_t = float(jnp.max(jnp.abs(out_t - ref)))
    assert err_t < 2e-2, f"row-tiled path mismatch vs reference: max abs err {err_t}"

    print("KERNEL_OK")
</pallas_src>

<mosaic_0001>
module attributes {stable_mosaic.version = 11 : i64} {
  func.func @_conv_first_kernel(%arg0: i32, %arg1: i32, %arg2: memref<1x16x16x27xbf16, #tpu.memory_space<vmem>>, %arg3: memref<27x16xbf16, #tpu.memory_space<vmem>>, %arg4: memref<1x16xf32, #tpu.memory_space<vmem>>, %arg5: memref<1x16x16x16xf32, #tpu.memory_space<vmem>>) attributes {dimension_semantics = [#tpu.dimension_semantics<parallel>, #tpu.dimension_semantics<parallel>], iteration_bounds = array<i64: 2, 1>, scalar_prefetch = 0 : i64, scratch_operands = 0 : i64, tpu.core_type = #tpu.core_type<tc>, window_params = [{transform_indices = @transform_0, window_bounds = array<i64: 1, 16, 16, 27>}, {pipeline_mode = #tpu.pipeline_mode<synchronous>, transform_indices = @transform_1, window_bounds = array<i64: 27, 16>}, {pipeline_mode = #tpu.pipeline_mode<synchronous>, transform_indices = @transform_2, window_bounds = array<i64: 1, 16>}, {transform_indices = @transform_3, window_bounds = array<i64: 1, 16, 16, 16>}]} {
    %c0 = arith.constant 0 : index
    %c0_0 = arith.constant 0 : index
    %c0_1 = arith.constant 0 : index
    %c0_2 = arith.constant 0 : index
    %0 = vector.load %arg2[%c0, %c0_0, %c0_1, %c0_2] : memref<1x16x16x27xbf16, #tpu.memory_space<vmem>>, vector<1x16x16x27xbf16>
    %1 = vector.shape_cast %0 : vector<1x16x16x27xbf16> to vector<16x16x27xbf16>
    %2 = vector.shape_cast %1 : vector<16x16x27xbf16> to vector<256x27xbf16>
    %c0_3 = arith.constant 0 : index
    %c0_4 = arith.constant 0 : index
    %3 = vector.load %arg3[%c0_3, %c0_4] : memref<27x16xbf16, #tpu.memory_space<vmem>>, vector<27x16xbf16>
    %cst = arith.constant dense<0.000000e+00> : vector<256x16xf32>
    %4 = tpu.matmul %2, %3, %cst {dimension_numbers = #tpu.dot_dimension_numbers<[1], [0], [0], [1], [0, 0, 1, 1], [], []>} : vector<256x27xbf16>, vector<27x16xbf16>, vector<256x16xf32> -> vector<256x16xf32>
    %c0_5 = arith.constant 0 : index
    %c0_6 = arith.constant 0 : index
    %5 = vector.load %arg4[%c0_5, %c0_6] : memref<1x16xf32, #tpu.memory_space<vmem>>, vector<1x16xf32>
    %6 = vector.broadcast %5 : vector<1x16xf32> to vector<256x16xf32>
    %7 = arith.addf %4, %6 : vector<256x16xf32>
    %cst_7 = arith.constant 1.000000e-01 : f32
    %8 = vector.broadcast %cst_7 : f32 to vector<256x16xf32>
    %9 = arith.mulf %8, %7 : vector<256x16xf32>
    %10 = arith.maximumf %7, %9 : vector<256x16xf32>
    %11 = vector.shape_cast %10 : vector<256x16xf32> to vector<1x16x16x16xf32>
    %c0_8 = arith.constant 0 : index
    %c0_9 = arith.constant 0 : index
    %c0_10 = arith.constant 0 : index
    %c0_11 = arith.constant 0 : index
    %12 = vector.load %arg5[%c0_8, %c0_9, %c0_10, %c0_11] : memref<1x16x16x16xf32, #tpu.memory_space<vmem>>, vector<1x16x16x16xf32>
    tpu.vector_store %arg5[%c0_8, %c0_9, %c0_10, %c0_11], %11 {strides = array<i32>} : memref<1x16x16x16xf32, #tpu.memory_space<vmem>>, vector<1x16x16x16xf32>,
    return
  }
  func.func @transform_0(%arg0: i32, %arg1: i32) -> (i32, i32, i32, i32) {
    %c0_i32 = arith.constant 0 : i32
    %c0_i32_0 = arith.constant 0 : i32
    %c0_i32_1 = arith.constant 0 : i32
    return %arg0, %arg1, %c0_i32, %c0_i32_0 : i32, i32, i32, i32
  }
  func.func @transform_1(%arg0: i32, %arg1: i32) -> (i32, i32) {
    %c0_i32 = arith.constant 0 : i32
    %c0_i32_0 = arith.constant 0 : i32
    %c0_i32_1 = arith.constant 0 : i32
    return %c0_i32, %c0_i32_0 : i32, i32
  }
  func.func @transform_2(%arg0: i32, %arg1: i32) -> (i32, i32) {
    %c0_i32 = arith.constant 0 : i32
    %c0_i32_0 = arith.constant 0 : i32
    %c0_i32_1 = arith.constant 0 : i32
    return %c0_i32, %c0_i32_0 : i32, i32
  }
  func.func @transform_3(%arg0: i32, %arg1: i32) -> (i32, i32, i32, i32) {
    %c0_i32 = arith.constant 0 : i32
    %c0_i32_0 = arith.constant 0 : i32
    %c0_i32_1 = arith.constant 0 : i32
    return %arg0, %arg1, %c0_i32, %c0_i32_0 : i32, i32, i32, i32
  }
}

module attributes {stable_mosaic.version = 11 : i64} {
  func.func @_res_chain_kernel(%arg0: i32, %arg1: i32, %arg2: memref<1x16x16x16xf32, #tpu.memory_space<vmem>>, %arg3: memref<2x3x48x16xbf16, #tpu.memory_space<vmem>>, %arg4: memref<2x16xf32, #tpu.memory_space<vmem>>, %arg5: memref<2x3x48x16xbf16, #tpu.memory_space<vmem>>, %arg6: memref<2x16xf32, #tpu.memory_space<vmem>>, %arg7: memref<1x16x16x16xf32, #tpu.memory_space<vmem>>) attributes {dimension_semantics = [#tpu.dimension_semantics<parallel>, #tpu.dimension_semantics<parallel>], iteration_bounds = array<i64: 2, 1>, scalar_prefetch = 0 : i64, scratch_operands = 0 : i64, tpu.core_type = #tpu.core_type<tc>, window_params = [{transform_indices = @transform_0, window_bounds = array<i64: 1, 16, 16, 16>}, {pipeline_mode = #tpu.pipeline_mode<synchronous>, transform_indices = @transform_1, window_bounds = array<i64: 2, 3, 48, 16>}, {pipeline_mode = #tpu.pipeline_mode<synchronous>, transform_indices = @transform_2, window_bounds = array<i64: 2, 16>}, {pipeline_mode = #tpu.pipeline_mode<synchronous>, transform_indices = @transform_3, window_bounds = array<i64: 2, 3, 48, 16>}, {pipeline_mode = #tpu.pipeline_mode<synchronous>, transform_indices = @transform_4, window_bounds = array<i64: 2, 16>}, {transform_indices = @transform_5, window_bounds = array<i64: 1, 16, 16, 16>}]} {
    %c0 = arith.constant 0 : index
    %c0_0 = arith.constant 0 : index
    %c0_1 = arith.constant 0 : index
    %c0_2 = arith.constant 0 : index
    %0 = vector.load %arg2[%c0, %c0_0, %c0_1, %c0_2] : memref<1x16x16x16xf32, #tpu.memory_space<vmem>>, vector<1x16x16x16xf32>
    %1 = vector.shape_cast %0 : vector<1x16x16x16xf32> to vector<16x16x16xf32>
    %2 = arith.truncf %1 : vector<16x16x16xf32> to vector<16x16x16xbf16>
    %c0_3 = arith.constant 0 : index
    %c0_4 = arith.constant 0 : index
    %c0_5 = arith.constant 0 : index
    %c0_6 = arith.constant 0 : index
    %3 = vector.load %arg3[%c0_3, %c0_4, %c0_5, %c0_6] : memref<2x3x48x16xbf16, #tpu.memory_space<vmem>>, vector<1x3x48x16xbf16>
    %4 = vector.shape_cast %3 : vector<1x3x48x16xbf16> to vector<3x48x16xbf16>
    %cst = arith.constant 0.000000e+00 : bf16
    %5 = vector.broadcast %cst : bf16 to vector<16x1x16xbf16>
    %6 = tpu.concatenate %5, %2, %5 in 1 : vector<16x1x16xbf16>, vector<16x16x16xbf16>, vector<16x1x16xbf16> -> vector<16x18x16xbf16>
    %7 = vector.extract_strided_slice %6 {offsets = [0, 0, 0], sizes = [16, 16, 16], strides = [1, 1, 1]} : vector<16x18x16xbf16> to vector<16x16x16xbf16>
    %8 = vector.extract_strided_slice %6 {offsets = [0, 1, 0], sizes = [16, 16, 16], strides = [1, 1, 1]} : vector<16x18x16xbf16> to vector<16x16x16xbf16>
    %9 = vector.extract_strided_slice %6 {offsets = [0, 2, 0], sizes = [16, 16, 16], strides = [1, 1, 1]} : vector<16x18x16xbf16> to vector<16x16x16xbf16>
    %10 = tpu.concatenate %7, %8, %9 in 2 : vector<16x16x16xbf16>, vector<16x16x16xbf16>, vector<16x16x16xbf16> -> vector<16x16x48xbf16>
    %cst_7 = arith.constant 0.000000e+00 : bf16
    %11 = vector.broadcast %cst_7 : bf16 to vector<1x16x48xbf16>
    %12 = tpu.concatenate %11, %10, %11 in 0 : vector<1x16x48xbf16>, vector<16x16x48xbf16>, vector<1x16x48xbf16> -> vector<18x16x48xbf16>
    %cst_8 = arith.constant 0.000000e+00 : f32
    %13 = vector.broadcast %cst_8 : f32 to vector<256x16xf32>
    %14 = vector.extract_strided_slice %12 {offsets = [0, 0, 0], sizes = [16, 16, 48], strides = [1, 1, 1]} : vector<18x16x48xbf16> to vector<16x16x48xbf16>
    %15 = vector.shape_cast %14 : vector<16x16x48xbf16> to vector<256x48xbf16>
    %16 = vector.extract_strided_slice %4 {offsets = [0, 0, 0], sizes = [1, 48, 16], strides = [1, 1, 1]} : vector<3x48x16xbf16> to vector<1x48x16xbf16>
    %17 = vector.shape_cast %16 : vector<1x48x16xbf16> to vector<48x16xbf16>
    %cst_9 = arith.constant dense<0.000000e+00> : vector<256x16xf32>
    %18 = tpu.matmul %15, %17, %cst_9 {dimension_numbers = #tpu.dot_dimension_numbers<[1], [0], [0], [1], [0, 0, 1, 1], [], []>} : vector<256x48xbf16>, vector<48x16xbf16>, vector<256x16xf32> -> vector<256x16xf32>
    %19 = arith.addf %13, %18 : vector<256x16xf32>
    %20 = vector.extract_strided_slice %12 {offsets = [1, 0, 0], sizes = [16, 16, 48], strides = [1, 1, 1]} : vector<18x16x48xbf16> to vector<16x16x48xbf16>
    %21 = vector.shape_cast %20 : vector<16x16x48xbf16> to vector<256x48xbf16>
    %22 = vector.extract_strided_slice %4 {offsets = [1, 0, 0], sizes = [1, 48, 16], strides = [1, 1, 1]} : vector<3x48x16xbf16> to vector<1x48x16xbf16>
    %23 = vector.shape_cast %22 : vector<1x48x16xbf16> to vector<48x16xbf16>
    %cst_10 = arith.constant dense<0.000000e+00> : vector<256x16xf32>
    %24 = tpu.matmul %21, %23, %cst_10 {dimension_numbers = #tpu.dot_dimension_numbers<[1], [0], [0], [1], [0, 0, 1, 1], [], []>} : vector<256x48xbf16>, vector<48x16xbf16>, vector<256x16xf32> -> vector<256x16xf32>
    %25 = arith.addf %19, %24 : vector<256x16xf32>
    %26 = vector.extract_strided_slice %12 {offsets = [2, 0, 0], sizes = [16, 16, 48], strides = [1, 1, 1]} : vector<18x16x48xbf16> to vector<16x16x48xbf16>
    %27 = vector.shape_cast %26 : vector<16x16x48xbf16> to vector<256x48xbf16>
    %28 = vector.extract_strided_slice %4 {offsets = [2, 0, 0], sizes = [1, 48, 16], strides = [1, 1, 1]} : vector<3x48x16xbf16> to vector<1x48x16xbf16>
    %29 = vector.shape_cast %28 : vector<1x48x16xbf16> to vector<48x16xbf16>
    %cst_11 = arith.constant dense<0.000000e+00> : vector<256x16xf32>
    %30 = tpu.matmul %27, %29, %cst_11 {dimension_numbers = #tpu.dot_dimension_numbers<[1], [0], [0], [1], [0, 0, 1, 1], [], []>} : vector<256x48xbf16>, vector<48x16xbf16>, vector<256x16xf32> -> vector<256x16xf32>
    %31 = arith.addf %25, %30 : vector<256x16xf32>
    %32 = vector.shape_cast %31 : vector<256x16xf32> to vector<16x16x16xf32>
    %c0_12 = arith.constant 0 : index
    %c0_13 = arith.constant 0 : index
    %33 = vector.load %arg4[%c0_12, %c0_13] : memref<2x16xf32, #tpu.memory_space<vmem>>, vector<1x16xf32>
    %34 = vector.shape_cast %33 : vector<1x16xf32> to vector<16xf32>
    %35 = vector.shape_cast %34 : vector<16xf32> to vector<1x1x16xf32>
    %36 = vector.broadcast %35 : vector<1x1x16xf32> to vector<16x16x16xf32>
    %37 = arith.addf %32, %36 : vector<16x16x16xf32>
    %cst_14 = arith.constant 0.000000e+00 : f32
    %38 = vector.broadcast %cst_14 : f32 to vector<16x16x16xf32>
    %39 = arith.maximumf %37, %38 : vector<16x16x16xf32>
    %40 = arith.truncf %39 : vector<16x16x16xf32> to vector<16x16x16xbf16>
    %c0_15 = arith.constant 0 : index
    %c0_16 = arith.constant 0 : index
    %c0_17 = arith.constant 0 : index
    %c0_18 = arith.constant 0 : index
    %41 = vector.load %arg5[%c0_15, %c0_16, %c0_17, %c0_18] : memref<2x3x48x16xbf16, #tpu.memory_space<vmem>>, vector<1x3x48x16xbf16>
    %42 = vector.shape_cast %41 : vector<1x3x48x16xbf16> to vector<3x48x16xbf16>
    %cst_19 = arith.constant 0.000000e+00 : bf16
    %43 = vector.broadcast %cst_19 : bf16 to vector<16x1x16xbf16>
    %44 = tpu.concatenate %43, %40, %43 in 1 : vector<16x1x16xbf16>, vector<16x16x16xbf16>, vector<16x1x16xbf16> -> vector<16x18x16xbf16>
    %45 = vector.extract_strided_slice %44 {offsets = [0, 0, 0], sizes = [16, 16, 16], strides = [1, 1, 1]} : vector<16x18x16xbf16> to vector<16x16x16xbf16>
    %46 = vector.extract_strided_slice %44 {offsets = [0, 1, 0], sizes = [16, 16, 16], strides = [1, 1, 1]} : vector<16x18x16xbf16> to vector<16x16x16xbf16>
    %47 = vector.extract_strided_slice %44 {offsets = [0, 2, 0], sizes = [16, 16, 16], strides = [1, 1, 1]} : vector<16x18x16xbf16> to vector<16x16x16xbf16>
    %48 = tpu.concatenate %45, %46, %47 in 2 : vector<16x16x16xbf16>, vector<16x16x16xbf16>, vector<16x16x16xbf16> -> vector<16x16x48xbf16>
    %cst_20 = arith.constant 0.000000e+00 : bf16
    %49 = vector.broadcast %cst_20 : bf16 to vector<1x16x48xbf16>
    %50 = tpu.concatenate %49, %48, %49 in 0 : vector<1x16x48xbf16>, vector<16x16x48xbf16>, vector<1x16x48xbf16> -> vector<18x16x48xbf16>
    %cst_21 = arith.constant 0.000000e+00 : f32
    %51 = vector.broadcast %cst_21 : f32 to vector<256x16xf32>
    %52 = vector.extract_strided_slice %50 {offsets = [0, 0, 0], sizes = [16, 16, 48], strides = [1, 1, 1]} : vector<18x16x48xbf16> to vector<16x16x48xbf16>
    %53 = vector.shape_cast %52 : vector<16x16x48xbf16> to vector<256x48xbf16>
    %54 = vector.extract_strided_slice %42 {offsets = [0, 0, 0], sizes = [1, 48, 16], strides = [1, 1, 1]} : vector<3x48x16xbf16> to vector<1x48x16xbf16>
    %55 = vector.shape_cast %54 : vector<1x48x16xbf16> to vector<48x16xbf16>
    %cst_22 = arith.constant dense<0.000000e+00> : vector<256x16xf32>
    %56 = tpu.matmul %53, %55, %cst_22 {dimension_numbers = #tpu.dot_dimension_numbers<[1], [0], [0], [1], [0, 0, 1, 1], [], []>} : vector<256x48xbf16>, vector<48x16xbf16>, vector<256x16xf32> -> vector<256x16xf32>
    %57 = arith.addf %51, %56 : vector<256x16xf32>
    %58 = vector.extract_strided_slice %50 {offsets = [1, 0, 0], sizes = [16, 16, 48], strides = [1, 1, 1]} : vector<18x16x48xbf16> to vector<16x16x48xbf16>
    %59 = vector.shape_cast %58 : vector<16x16x48xbf16> to vector<256x48xbf16>
    %60 = vector.extract_strided_slice %42 {offsets = [1, 0, 0], sizes = [1, 48, 16], strides = [1, 1, 1]} : vector<3x48x16xbf16> to vector<1x48x16xbf16>
    %61 = vector.shape_cast %60 : vector<1x48x16xbf16> to vector<48x16xbf16>
    %cst_23 = arith.constant dense<0.000000e+00> : vector<256x16xf32>
    %62 = tpu.matmul %59, %61, %cst_23 {dimension_numbers = #tpu.dot_dimension_numbers<[1], [0], [0], [1], [0, 0, 1, 1], [], []>} : vector<256x48xbf16>, vector<48x16xbf16>, vector<256x16xf32> -> vector<256x16xf32>
    %63 = arith.addf %57, %62 : vector<256x16xf32>
    %64 = vector.extract_strided_slice %50 {offsets = [2, 0, 0], sizes = [16, 16, 48], strides = [1, 1, 1]} : vector<18x16x48xbf16> to vector<16x16x48xbf16>
    %65 = vector.shape_cast %64 : vector<16x16x48xbf16> to vector<256x48xbf16>
    %66 = vector.extract_strided_slice %42 {offsets = [2, 0, 0], sizes = [1, 48, 16], strides = [1, 1, 1]} : vector<3x48x16xbf16> to vector<1x48x16xbf16>
    %67 = vector.shape_cast %66 : vector<1x48x16xbf16> to vector<48x16xbf16>
    %cst_24 = arith.constant dense<0.000000e+00> : vector<256x16xf32>
    %68 = tpu.matmul %65, %67, %cst_24 {dimension_numbers = #tpu.dot_dimension_numbers<[1], [0], [0], [1], [0, 0, 1, 1], [], []>} : vector<256x48xbf16>, vector<48x16xbf16>, vector<256x16xf32> -> vector<256x16xf32>
    %69 = arith.addf %63, %68 : vector<256x16xf32>
    %70 = vector.shape_cast %69 : vector<256x16xf32> to vector<16x16x16xf32>
    %c0_25 = arith.constant 0 : index
    %c0_26 = arith.constant 0 : index
    %71 = vector.load %arg6[%c0_25, %c0_26] : memref<2x16xf32, #tpu.memory_space<vmem>>, vector<1x16xf32>
    %72 = vector.shape_cast %71 : vector<1x16xf32> to vector<16xf32>
    %73 = vector.shape_cast %72 : vector<16xf32> to vector<1x1x16xf32>
    %74 = vector.broadcast %73 : vector<1x1x16xf32> to vector<16x16x16xf32>
    %75 = arith.addf %70, %74 : vector<16x16x16xf32>
    %76 = arith.addf %1, %75 : vector<16x16x16xf32>
    %77 = arith.truncf %76 : vector<16x16x16xf32> to vector<16x16x16xbf16>
    %c1 = arith.constant 1 : index
    %c0_27 = arith.constant 0 : index
    %c0_28 = arith.constant 0 : index
    %c0_29 = arith.constant 0 : index
    %78 = vector.load %arg3[%c1, %c0_27, %c0_28, %c0_29] : memref<2x3x48x16xbf16, #tpu.memory_space<vmem>>, vector<1x3x48x16xbf16>
    %79 = vector.shape_cast %78 : vector<1x3x48x16xbf16> to vector<3x48x16xbf16>
    %cst_30 = arith.constant 0.000000e+00 : bf16
    %80 = vector.broadcast %cst_30 : bf16 to vector<16x1x16xbf16>
    %81 = tpu.concatenate %80, %77, %80 in 1 : vector<16x1x16xbf16>, vector<16x16x16xbf16>, vector<16x1x16xbf16> -> vector<16x18x16xbf16>
    %82 = vector.extract_strided_slice %81 {offsets = [0, 0, 0], sizes = [16, 16, 16], strides = [1, 1, 1]} : vector<16x18x16xbf16> to vector<16x16x16xbf16>
    %83 = vector.extract_strided_slice %81 {offsets = [0, 1, 0], sizes = [16, 16, 16], strides = [1, 1, 1]} : vector<16x18x16xbf16> to vector<16x16x16xbf16>
    %84 = vector.extract_strided_slice %81 {offsets = [0, 2, 0], sizes = [16, 16, 16], strides = [1, 1, 1]} : vector<16x18x16xbf16> to vector<16x16x16xbf16>
    %85 = tpu.concatenate %82, %83, %84 in 2 : vector<16x16x16xbf16>, vector<16x16x16xbf16>, vector<16x16x16xbf16> -> vector<16x16x48xbf16>
    %cst_31 = arith.constant 0.000000e+00 : bf16
    %86 = vector.broadcast %cst_31 : bf16 to vector<1x16x48xbf16>
    %87 = tpu.concatenate %86, %85, %86 in 0 : vector<1x16x48xbf16>, vector<16x16x48xbf16>, vector<1x16x48xbf16> -> vector<18x16x48xbf16>
    %cst_32 = arith.constant 0.000000e+00 : f32
    %88 = vector.broadcast %cst_32 : f32 to vector<256x16xf32>
    %89 = vector.extract_strided_slice %87 {offsets = [0, 0, 0], sizes = [16, 16, 48], strides = [1, 1, 1]} : vector<18x16x48xbf16> to vector<16x16x48xbf16>
    %90 = vector.shape_cast %89 : vector<16x16x48xbf16> to vector<256x48xbf16>
    %91 = vector.extract_strided_slice %79 {offsets = [0, 0, 0], sizes = [1, 48, 16], strides = [1, 1, 1]} : vector<3x48x16xbf16> to vector<1x48x16xbf16>
    %92 = vector.shape_cast %91 : vector<1x48x16xbf16> to vector<48x16xbf16>
    %cst_33 = arith.constant dense<0.000000e+00> : vector<256x16xf32>
    %93 = tpu.matmul %90, %92, %cst_33 {dimension_numbers = #tpu.dot_dimension_numbers<[1], [0], [0], [1], [0, 0, 1, 1], [], []>} : vector<256x48xbf16>, vector<48x16xbf16>, vector<256x16xf32> -> vector<256x16xf32>
    %94 = arith.addf %88, %93 : vector<256x16xf32>
    %95 = vector.extract_strided_slice %87 {offsets = [1, 0, 0], sizes = [16, 16, 48], strides = [1, 1, 1]} : vector<18x16x48xbf16> to vector<16x16x48xbf16>
    %96 = vector.shape_cast %95 : vector<16x16x48xbf16> to vector<256x48xbf16>
    %97 = vector.extract_strided_slice %79 {offsets = [1, 0, 0], sizes = [1, 48, 16], strides = [1, 1, 1]} : vector<3x48x16xbf16> to vector<1x48x16xbf16>
    %98 = vector.shape_cast %97 : vector<1x48x16xbf16> to vector<48x16xbf16>
    %cst_34 = arith.constant dense<0.000000e+00> : vector<256x16xf32>
    %99 = tpu.matmul %96, %98, %cst_34 {dimension_numbers = #tpu.dot_dimension_numbers<[1], [0], [0], [1], [0, 0, 1, 1], [], []>} : vector<256x48xbf16>, vector<48x16xbf16>, vector<256x16xf32> -> vector<256x16xf32>
    %100 = arith.addf %94, %99 : vector<256x16xf32>
    %101 = vector.extract_strided_slice %87 {offsets = [2, 0, 0], sizes = [16, 16, 48], strides = [1, 1, 1]} : vector<18x16x48xbf16> to vector<16x16x48xbf16>
    %102 = vector.shape_cast %101 : vector<16x16x48xbf16> to vector<256x48xbf16>
    %103 = vector.extract_strided_slice %79 {offsets = [2, 0, 0], sizes = [1, 48, 16], strides = [1, 1, 1]} : vector<3x48x16xbf16> to vector<1x48x16xbf16>
    %104 = vector.shape_cast %103 : vector<1x48x16xbf16> to vector<48x16xbf16>
    %cst_35 = arith.constant dense<0.000000e+00> : vector<256x16xf32>
    %105 = tpu.matmul %102, %104, %cst_35 {dimension_numbers = #tpu.dot_dimension_numbers<[1], [0], [0], [1], [0, 0, 1, 1], [], []>} : vector<256x48xbf16>, vector<48x16xbf16>, vector<256x16xf32> -> vector<256x16xf32>
    %106 = arith.addf %100, %105 : vector<256x16xf32>
    %107 = vector.shape_cast %106 : vector<256x16xf32> to vector<16x16x16xf32>
    %c1_36 = arith.constant 1 : index
    %c0_37 = arith.constant 0 : index
    %108 = vector.load %arg4[%c1_36, %c0_37] : memref<2x16xf32, #tpu.memory_space<vmem>>, vector<1x16xf32>
    %109 = vector.shape_cast %108 : vector<1x16xf32> to vector<16xf32>
    %110 = vector.shape_cast %109 : vector<16xf32> to vector<1x1x16xf32>
    %111 = vector.broadcast %110 : vector<1x1x16xf32> to vector<16x16x16xf32>
    %112 = arith.addf %107, %111 : vector<16x16x16xf32>
    %cst_38 = arith.constant 0.000000e+00 : f32
    %113 = vector.broadcast %cst_38 : f32 to vector<16x16x16xf32>
    %114 = arith.maximumf %112, %113 : vector<16x16x16xf32>
    %115 = arith.truncf %114 : vector<16x16x16xf32> to vector<16x16x16xbf16>
    %c1_39 = arith.constant 1 : index
    %c0_40 = arith.constant 0 : index
    %c0_41 = arith.constant 0 : index
    %c0_42 = arith.constant 0 : index
    %116 = vector.load %arg5[%c1_39, %c0_40, %c0_41, %c0_42] : memref<2x3x48x16xbf16, #tpu.memory_space<vmem>>, vector<1x3x48x16xbf16>
    %117 = vector.shape_cast %116 : vector<1x3x48x16xbf16> to vector<3x48x16xbf16>
    %cst_43 = arith.constant 0.000000e+00 : bf16
    %118 = vector.broadcast %cst_43 : bf16 to vector<16x1x16xbf16>
    %119 = tpu.concatenate %118, %115, %118 in 1 : vector<16x1x16xbf16>, vector<16x16x16xbf16>, vector<16x1x16xbf16> -> vector<16x18x16xbf16>
    %120 = vector.extract_strided_slice %119 {offsets = [0, 0, 0], sizes = [16, 16, 16], strides = [1, 1, 1]} : vector<16x18x16xbf16> to vector<16x16x16xbf16>
    %121 = vector.extract_strided_slice %119 {offsets = [0, 1, 0], sizes = [16, 16, 16], strides = [1, 1, 1]} : vector<16x18x16xbf16> to vector<16x16x16xbf16>
    %122 = vector.extract_strided_slice %119 {offsets = [0, 2, 0], sizes = [16, 16, 16], strides = [1, 1, 1]} : vector<16x18x16xbf16> to vector<16x16x16xbf16>
    %123 = tpu.concatenate %120, %121, %122 in 2 : vector<16x16x16xbf16>, vector<16x16x16xbf16>, vector<16x16x16xbf16> -> vector<16x16x48xbf16>
    %cst_44 = arith.constant 0.000000e+00 : bf16
    %124 = vector.broadcast %cst_44 : bf16 to vector<1x16x48xbf16>
    %125 = tpu.concatenate %124, %123, %124 in 0 : vector<1x16x48xbf16>, vector<16x16x48xbf16>, vector<1x16x48xbf16> -> vector<18x16x48xbf16>
    %cst_45 = arith.constant 0.000000e+00 : f32
    %126 = vector.broadcast %cst_45 : f32 to vector<256x16xf32>
    %127 = vector.extract_strided_slice %125 {offsets = [0, 0, 0], sizes = [16, 16, 48], strides = [1, 1, 1]} : vector<18x16x48xbf16> to vector<16x16x48xbf16>
    %128 = vector.shape_cast %127 : vector<16x16x48xbf16> to vector<256x48xbf16>
    %129 = vector.extract_strided_slice %117 {offsets = [0, 0, 0], sizes = [1, 48, 16], strides = [1, 1, 1]} : vector<3x48x16xbf16> to vector<1x48x16xbf16>
    %130 = vector.shape_cast %129 : vector<1x48x16xbf16> to vector<48x16xbf16>
    %cst_46 = arith.constant dense<0.000000e+00> : vector<256x16xf32>
    %131 = tpu.matmul %128, %130, %cst_46 {dimension_numbers = #tpu.dot_dimension_numbers<[1], [0], [0], [1], [0, 0, 1, 1], [], []>} : vector<256x48xbf16>, vector<48x16xbf16>, vector<256x16xf32> -> vector<256x16xf32>
    %132 = arith.addf %126, %131 : vector<256x16xf32>
    %133 = vector.extract_strided_slice %125 {offsets = [1, 0, 0], sizes = [16, 16, 48], strides = [1, 1, 1]} : vector<18x16x48xbf16> to vector<16x16x48xbf16>
    %134 = vector.shape_cast %133 : vector<16x16x48xbf16> to vector<256x48xbf16>
    %135 = vector.extract_strided_slice %117 {offsets = [1, 0, 0], sizes = [1, 48, 16], strides = [1, 1, 1]} : vector<3x48x16xbf16> to vector<1x48x16xbf16>
    %136 = vector.shape_cast %135 : vector<1x48x16xbf16> to vector<48x16xbf16>
    %cst_47 = arith.constant dense<0.000000e+00> : vector<256x16xf32>
    %137 = tpu.matmul %134, %136, %cst_47 {dimension_numbers = #tpu.dot_dimension_numbers<[1], [0], [0], [1], [0, 0, 1, 1], [], []>} : vector<256x48xbf16>, vector<48x16xbf16>, vector<256x16xf32> -> vector<256x16xf32>
    %138 = arith.addf %132, %137 : vector<256x16xf32>
    %139 = vector.extract_strided_slice %125 {offsets = [2, 0, 0], sizes = [16, 16, 48], strides = [1, 1, 1]} : vector<18x16x48xbf16> to vector<16x16x48xbf16>
    %140 = vector.shape_cast %139 : vector<16x16x48xbf16> to vector<256x48xbf16>
    %141 = vector.extract_strided_slice %117 {offsets = [2, 0, 0], sizes = [1, 48, 16], strides = [1, 1, 1]} : vector<3x48x16xbf16> to vector<1x48x16xbf16>
    %142 = vector.shape_cast %141 : vector<1x48x16xbf16> to vector<48x16xbf16>
    %cst_48 = arith.constant dense<0.000000e+00> : vector<256x16xf32>
    %143 = tpu.matmul %140, %142, %cst_48 {dimension_numbers = #tpu.dot_dimension_numbers<[1], [0], [0], [1], [0, 0, 1, 1], [], []>} : vector<256x48xbf16>, vector<48x16xbf16>, vector<256x16xf32> -> vector<256x16xf32>
    %144 = arith.addf %138, %143 : vector<256x16xf32>
    %145 = vector.shape_cast %144 : vector<256x16xf32> to vector<16x16x16xf32>
    %c1_49 = arith.constant 1 : index
    %c0_50 = arith.constant 0 : index
    %146 = vector.load %arg6[%c1_49, %c0_50] : memref<2x16xf32, #tpu.memory_space<vmem>>, vector<1x16xf32>
    %147 = vector.shape_cast %146 : vector<1x16xf32> to vector<16xf32>
    %148 = vector.shape_cast %147 : vector<16xf32> to vector<1x1x16xf32>
    %149 = vector.broadcast %148 : vector<1x1x16xf32> to vector<16x16x16xf32>
    %150 = arith.addf %145, %149 : vector<16x16x16xf32>
    %151 = arith.addf %76, %150 : vector<16x16x16xf32>
    %152 = vector.shape_cast %151 : vector<16x16x16xf32> to vector<1x16x16x16xf32>
    %c0_51 = arith.constant 0 : index
    %c0_52 = arith.constant 0 : index
    %c0_53 = arith.constant 0 : index
    %c0_54 = arith.constant 0 : index
    %153 = vector.load %arg7[%c0_51, %c0_52, %c0_53, %c0_54] : memref<1x16x16x16xf32, #tpu.memory_space<vmem>>, vector<1x16x16x16xf32>
    tpu.vector_store %arg7[%c0_51, %c0_52, %c0_53, %c0_54], %152 {strides = array<i32>} : memref<1x16x16x16xf32, #tpu.memory_space<vmem>>, vector<1x16x16x16xf32>,
    return
  }
  func.func @transform_0(%arg0: i32, %arg1: i32) -> (i32, i32, i32, i32) {
    %c0_i32 = arith.constant 0 : i32
    %c0_i32_0 = arith.constant 0 : i32
    %c0_i32_1 = arith.constant 0 : i32
    return %arg0, %arg1, %c0_i32, %c0_i32_0 : i32, i32, i32, i32
  }
  func.func @transform_1(%arg0: i32, %arg1: i32) -> (i32, i32, i32, i32) {
    %c0_i32 = arith.constant 0 : i32
    %c0_i32_0 = arith.constant 0 : i32
    %c0_i32_1 = arith.constant 0 : i32
    %c0_i32_2 = arith.constant 0 : i32
    %c0_i32_3 = arith.constant 0 : i32
    return %c0_i32, %c0_i32_0, %c0_i32_1, %c0_i32_2 : i32, i32, i32, i32
  }
  func.func @transform_2(%arg0: i32, %arg1: i32) -> (i32, i32) {
    %c0_i32 = arith.constant 0 : i32
    %c0_i32_0 = arith.constant 0 : i32
    %c0_i32_1 = arith.constant 0 : i32
    return %c0_i32, %c0_i32_0 : i32, i32
  }
  func.func @transform_3(%arg0: i32, %arg1: i32) -> (i32, i32, i32, i32) {
    %c0_i32 = arith.constant 0 : i32
    %c0_i32_0 = arith.constant 0 : i32
    %c0_i32_1 = arith.constant 0 : i32
    %c0_i32_2 = arith.constant 0 : i32
    %c0_i32_3 = arith.constant 0 : i32
    return %c0_i32, %c0_i32_0, %c0_i32_1, %c0_i32_2 : i32, i32, i32, i32
  }
  func.func @transform_4(%arg0: i32, %arg1: i32) -> (i32, i32) {
    %c0_i32 = arith.constant 0 : i32
    %c0_i32_0 = arith.constant 0 : i32
    %c0_i32_1 = arith.constant 0 : i32
    return %c0_i32, %c0_i32_0 : i32, i32
  }
  func.func @transform_5(%arg0: i32, %arg1: i32) -> (i32, i32, i32, i32) {
    %c0_i32 = arith.constant 0 : i32
    %c0_i32_0 = arith.constant 0 : i32
    %c0_i32_1 = arith.constant 0 : i32
    return %arg0, %arg1, %c0_i32, %c0_i32_0 : i32, i32, i32, i32
  }
}

</mosaic_0001>

<bundles_post_ra>
// kernel: content_extractor_forward.2
= control target key start
LH: loop header
LB: loop body
LE: loop exit
PB: predicated region body
PF: predicated region fallthrough
CT: control target
= control target key end

     0   :  { %s954_s12 = smov 0   ;;  %s956_s13 = smov 0   ;;  %s1134_s0 = inlined_call_operand.vmem [shape: bf16[2,16,16,27], index: 0, kind: input, shape index: {}]   ;;  %s1135_s1 = inlined_call_operand.vmem [shape: bf16[27,16], index: 1, kind: input, shape index: {}]   ;;  %s1136_s2 = inlined_call_operand.vmem [shape: f32[1,16], index: 2, kind: input, shape index: {}]   ;;  %s1137_s3 = inlined_call_operand.vmem [shape: f32[2,16,16,16], index: 3, kind: output, shape index: {}]  }
   0x1   :  { %s958_s14 = smov 0  }
   0x2 LB: > { %s25_s15 = sadd.s32 1, %s927_s13  ;;  %p764_p0 = scmp.ge.s32.totalorder %s931_s14, 1  ;;  %s931_s14 = sphi %s958_s14, %s13_s14   ;;  %s927_s13 = sphi %s956_s13, %s1139_s13   ;;  %s923_s12 = sphi %s954_s12, %s1138_s12  }
   0x3   : > { %p27_p1 = scmp.ge.s32.totalorder %s25_s15, 2  ;;  %p159_p2 = scmp.lt.s32.totalorder %s931_s14, 3 }
   0x5   : > { %s1141_s15 = smov (%p27_p1, %s25_s15), 0  ;;  %p160_p3 = pnand %p764_p0, %p159_p2 }
   0x6   : > { %p194_p4 = scmp.lt.s32.totalorder (!%p160_p3), %s923_s12, 1 }
   0x7   : > { %163 = sbr.rel (%p160_p3) target bundleno = 256 (0x100), region = 32 }
   0xc   : > { %v891_v0 = vld [vmem:[%s1135_s1 + $0x8] sm:$0x3f]   ;;  %vm399_vm0 = vcmask 1044480   ;;  %vm400_vm1 = vcmask 1045504   ;;  %v933_v1 = vmov 65535   ;;  %v892_v5 = vld [vmem:[%s1135_s1] sm:$0xff]  }
   0xd   : > { %v401_v2 = vsel %vm399_vm0, 4294967295, %v933_v1  ;;  %s1143_s12 = smov (!%p194_p4, %s923_s12), 1  ;;  %vm350_vm2 = vcmask 220160   ;;  %v1021_v22 = vld [vmem:[%s1136_s2] ss:$0 sm:$0xff]  ;;  %vm631_vm3 = vcmask 130048  }
   0xe   : > { %v402_v3 = vsel %vm400_vm1, %v401_v2, 0  ;;  %s806_s20 = sshll.u32 %s1143_s12, 7  ;;  %s807_s26 = sshll.u32 %s1143_s12, 8 }
   0xf   : > { %v404_v4 = vand.u32 %v891_v0, %v402_v3  ;;  %s984_s23 = scalar_lea.vmem %s1134_s0, %s806_s20  ;;  %s1031_s29 = scalar_lea.vmem %s1137_s3, %s807_s26 }
  0x10   : > { %v893_v6 = vld [vmem:[%s984_s23] sm:$0xff]   ;;  %v895_v8 = vld [vmem:[%s984_s23 + $0x8] sm:$0xff]   ;;  %v897_v10 = vld [vmem:[%s984_s23 + $0x10] sm:$0xff]  }
  0x11   : > { %826 = vmatprep.subr.bf16.mxu0 %v404_v4  ;;  %862 = vmatprep.subr.bf16.mxu1 %v404_v4  ;;  %v894_v7 = vld [vmem:[%s984_s23 + $0x40] sm:$0xff]   ;;  %v896_v9 = vld [vmem:[%s984_s23 + $0x48] sm:$0xff]   ;;  %v898_v11 = vld [vmem:[%s984_s23 + $0x50] sm:$0xff]  }
  0x12   : > { %827 = vmatpush3.bf16.msra.mxu0 %v404_v4  ;;  %864 = vmatpush3.bf16.msra.mxu1 %v404_v4  ;;  %v899_v12 = vld [vmem:[%s984_s23 + $0x18] sm:$0xff]   ;;  %v901_v14 = vld [vmem:[%s984_s23 + $0x20] sm:$0xff]   ;;  %v903_v16 = vld [vmem:[%s984_s23 + $0x28] sm:$0xff]  }
  0x13   : > { %828 = vmatprep.subr.bf16.mxu0 %v892_v5  ;;  %863 = vmatprep.subr.bf16.mxu1 %v892_v5  ;;  %v900_v13 = vld [vmem:[%s984_s23 + $0x58] sm:$0xff]   ;;  %v902_v15 = vld [vmem:[%s984_s23 + $0x60] sm:$0xff]   ;;  %v904_v17 = vld [vmem:[%s984_s23 + $0x68] sm:$0xff]  }
  0x14   : > { %830 = vmatprep.mubr.msk.bf16.mxu0 %vm350_vm2, %v893_v6  ;;  %846 = vmatprep.mubr.msk.bf16.mxu1 %vm350_vm2, %v894_v7  ;;  %v905_v18 = vld [vmem:[%s984_s23 + $0x30] sm:$0xff]   ;;  %v907_v20 = vld [vmem:[%s984_s23 + $0x38] sm:$0xff]  }
  0x15   : > { %v906_v19 = vld [vmem:[%s984_s23 + $0x70] sm:$0xff]   ;;  %v908_v21 = vld [vmem:[%s984_s23 + $0x78] sm:$0xff]  }
  0x16   : > { %829 = vmatpush3.bf16.msra.mxu0 %v892_v5  ;;  %865 = vmatpush3.bf16.msra.mxu1 %v892_v5 }
  0x19   : > { %831 = vmatmul.mubr.msk.bf16.vlgmr.msra.gmra.mxu0 %vm350_vm2, %v895_v8  ;;  %847 = vmatmul.mubr.msk.bf16.vlgmr.msra.gmra.mxu1 %vm350_vm2, %v896_v9 }
  0x1a   : > { %834 = vmatprep.mubr.msk.bf16.mxu0 %vm350_vm2, %v897_v10  ;;  %850 = vmatprep.mubr.msk.bf16.mxu1 %vm350_vm2, %v898_v11 }
  0x21   : > { %835 = vmatmul.mubr.msk.bf16.gmra.mxu0 %vm350_vm2, %v899_v12  ;;  %851 = vmatmul.mubr.msk.bf16.gmra.mxu1 %vm350_vm2, %v900_v13 }
  0x22   : > { %838 = vmatprep.mubr.msk.bf16.mxu0 %vm350_vm2, %v901_v14  ;;  %854 = vmatprep.mubr.msk.bf16.mxu1 %vm350_vm2, %v902_v15 }
  0x29   : > { %839 = vmatmul.mubr.msk.bf16.gmra.mxu0 %vm350_vm2, %v903_v16  ;;  %855 = vmatmul.mubr.msk.bf16.gmra.mxu1 %vm350_vm2, %v904_v17 }
  0x2a   : > { %842 = vmatprep.mubr.msk.bf16.mxu0 %vm350_vm2, %v905_v18  ;;  %858 = vmatprep.mubr.msk.bf16.mxu1 %vm350_vm2, %v906_v19 }
  0x31   : > { %843 = vmatmul.mubr.msk.bf16.gmra.mxu0 %vm350_vm2, %v907_v20  ;;  %859 = vmatmul.mubr.msk.bf16.gmra.mxu1 %vm350_vm2, %v908_v21 }
  0xd9   : > { %v832_v23 = vpop.f32.mrf.mxu0  ;;  %v848_v24 = vpop.f32.mrf.mxu1 }
  0xda   : > { %v449_v25 = vadd.f32 %v832_v23, %v1021_v22  ;;  %v513_v26 = vadd.f32 %v848_v24, %v1021_v22 }
  0xdb   : > { %v440_v27 = vpop.f32.mrf.mxu0  ;;  %v504_v28 = vpop.f32.mrf.mxu1 }
  0xdc   : > { %v569_v29 = vmul.f32 0.1, %v449_v25  ;;  %v585_v30 = vmul.f32 0.1, %v513_v26  ;;  %v441_v31 = vadd.f32 %v1021_v22, %v440_v27  ;;  %v505_v32 = vadd.f32 %v1021_v22, %v504_v28 }
  0xdd   : > { %v833_v33 = vpop.f32.mrf.mxu0  ;;  %v849_v34 = vpop.f32.mrf.mxu1 }
  0xde   : > { %v601_v35 = vmax.f32 %v449_v25, %v569_v29  ;;  %v617_v36 = vmax.f32 %v513_v26, %v585_v30  ;;  %v567_v37 = vmul.f32 0.1, %v441_v31  ;;  %v583_v38 = vmul.f32 0.1, %v505_v32 }
  0xdf   : > { %v452_v39 = vadd.f32 %v833_v33, %v1021_v22  ;;  %v516_v40 = vadd.f32 %v849_v34, %v1021_v22  ;;  %v443_v41 = vpop.f32.mrf.mxu0  ;;  %v507_v42 = vpop.f32.mrf.mxu1 }
  0xe0   : > { %634 = vst.msk [vmem:[%s1031_s29 + $0x10] sm:$0xff] %vm631_vm3, %v601_v35  ;;  %650 = vst.msk [vmem:[%s1031_s29 + $0x90] sm:$0xff] %vm631_vm3, %v617_v36  ;;  %v599_v43 = vmax.f32 %v441_v31, %v567_v37  ;;  %v615_v44 = vmax.f32 %v505_v32, %v583_v38  ;;  %v444_v45 = vadd.f32 %v1021_v22, %v443_v41 }
  0xe1   : > { %v508_v46 = vadd.f32 %v1021_v22, %v507_v42  ;;  %v570_v47 = vmul.f32 0.1, %v452_v39  ;;  %v586_v48 = vmul.f32 0.1, %v516_v40  ;;  %v836_v49 = vpop.f32.mrf.mxu0  ;;  %v852_v50 = vpop.f32.mrf.mxu1 }
  0xe2   : > { %632 = vst.msk [vmem:[%s1031_s29] sm:$0xff] %vm631_vm3, %v599_v43  ;;  %648 = vst.msk [vmem:[%s1031_s29 + $0x80] sm:$0xff] %vm631_vm3, %v615_v44  ;;  %v568_v51 = vmul.f32 0.1, %v444_v45  ;;  %v465_v53 = vadd.f32 %v836_v49, %v1021_v22  ;;  %v529_v54 = vadd.f32 %v852_v50, %v1021_v22 }
  0xe3   : > { %v584_v52 = vmul.f32 0.1, %v508_v46  ;;  %v602_v55 = vmax.f32 %v452_v39, %v570_v47  ;;  %v618_v56 = vmax.f32 %v516_v40, %v586_v48  ;;  %v456_v57 = vpop.f32.mrf.mxu0  ;;  %v520_v58 = vpop.f32.mrf.mxu1 }
  0xe4   : > { %v600_v59 = vmax.f32 %v444_v45, %v568_v51  ;;  %v573_v61 = vmul.f32 0.1, %v465_v53  ;;  %v589_v62 = vmul.f32 0.1, %v529_v54  ;;  %v457_v63 = vadd.f32 %v1021_v22, %v456_v57 }
  0xe5   : > { %v616_v60 = vmax.f32 %v508_v46, %v584_v52  ;;  %635 = vst.msk [vmem:[%s1031_s29 + $0x18] sm:$0xff] %vm631_vm3, %v602_v55  ;;  %651 = vst.msk [vmem:[%s1031_s29 + $0x98] sm:$0xff] %vm631_vm3, %v618_v56  ;;  %v521_v0 = vadd.f32 %v1021_v22, %v520_v58  ;;  %v837_v1 = vpop.f32.mrf.mxu0  ;;  %v853_v2 = vpop.f32.mrf.mxu1 }
  0xe6   : > { %633 = vst.msk [vmem:[%s1031_s29 + $0x8] sm:$0xff] %vm631_vm3, %v600_v59  ;;  %v605_v3 = vmax.f32 %v465_v53, %v573_v61  ;;  %v621_v4 = vmax.f32 %v529_v54, %v589_v62  ;;  %v468_v5 = vadd.f32 %v837_v1, %v1021_v22  ;;  %v532_v6 = vadd.f32 %v853_v2, %v1021_v22 }
  0xe7   : > { %649 = vst.msk [vmem:[%s1031_s29 + $0x88] sm:$0xff] %vm631_vm3, %v616_v60  ;;  %v571_v7 = vmul.f32 0.1, %v457_v63  ;;  %v587_v8 = vmul.f32 0.1, %v521_v0  ;;  %v459_v9 = vpop.f32.mrf.mxu0  ;;  %v523_v10 = vpop.f32.mrf.mxu1 }
  0xe8   : > { %638 = vst.msk [vmem:[%s1031_s29 + $0x30] sm:$0xff] %vm631_vm3, %v605_v3  ;;  %654 = vst.msk [vmem:[%s1031_s29 + $0xb0] sm:$0xff] %vm631_vm3, %v621_v4  ;;  %v574_v11 = vmul.f32 0.1, %v468_v5  ;;  %v590_v12 = vmul.f32 0.1, %v532_v6  ;;  %v460_v13 = vadd.f32 %v1021_v22, %v459_v9  ;;  %v524_v14 = vadd.f32 %v1021_v22, %v523_v10 }
  0xe9   : > { %v603_v15 = vmax.f32 %v457_v63, %v571_v7  ;;  %v619_v16 = vmax.f32 %v521_v0, %v587_v8  ;;  %v840_v17 = vpop.f32.mrf.mxu0  ;;  %v856_v18 = vpop.f32.mrf.mxu1 }
  0xea   : > { %v606_v19 = vmax.f32 %v468_v5, %v574_v11  ;;  %v622_v20 = vmax.f32 %v532_v6, %v590_v12  ;;  %v572_v21 = vmul.f32 0.1, %v460_v13  ;;  %v588_v23 = vmul.f32 0.1, %v524_v14 }
  0xeb   : > { %636 = vst.msk [vmem:[%s1031_s29 + $0x20] sm:$0xff] %vm631_vm3, %v603_v15  ;;  %652 = vst.msk [vmem:[%s1031_s29 + $0xa0] sm:$0xff] %vm631_vm3, %v619_v16  ;;  %v481_v24 = vadd.f32 %v840_v17, %v1021_v22  ;;  %v545_v25 = vadd.f32 %v856_v18, %v1021_v22  ;;  %v472_v26 = vpop.f32.mrf.mxu0  ;;  %v536_v27 = vpop.f32.mrf.mxu1 }
  0xec   : > { %639 = vst.msk [vmem:[%s1031_s29 + $0x38] sm:$0xff] %vm631_vm3, %v606_v19  ;;  %655 = vst.msk [vmem:[%s1031_s29 + $0xb8] sm:$0xff] %vm631_vm3, %v622_v20  ;;  %v604_v28 = vmax.f32 %v460_v13, %v572_v21  ;;  %v620_v29 = vmax.f32 %v524_v14, %v588_v23  ;;  %v473_v30 = vadd.f32 %v1021_v22, %v472_v26 }
  0xed   : > { %v537_v31 = vadd.f32 %v1021_v22, %v536_v27  ;;  %v577_v32 = vmul.f32 0.1, %v481_v24  ;;  %v593_v33 = vmul.f32 0.1, %v545_v25  ;;  %v841_v34 = vpop.f32.mrf.mxu0  ;;  %v857_v35 = vpop.f32.mrf.mxu1 }
  0xee   : > { %637 = vst.msk [vmem:[%s1031_s29 + $0x28] sm:$0xff] %vm631_vm3, %v604_v28  ;;  %653 = vst.msk [vmem:[%s1031_s29 + $0xa8] sm:$0xff] %vm631_vm3, %v620_v29  ;;  %v575_v36 = vmul.f32 0.1, %v473_v30  ;;  %v484_v38 = vadd.f32 %v841_v34, %v1021_v22  ;;  %v548_v39 = vadd.f32 %v857_v35, %v1021_v22 }
  0xef   : > { %v591_v37 = vmul.f32 0.1, %v537_v31  ;;  %v609_v40 = vmax.f32 %v481_v24, %v577_v32  ;;  %v625_v41 = vmax.f32 %v545_v25, %v593_v33  ;;  %v475_v42 = vpop.f32.mrf.mxu0  ;;  %v539_v43 = vpop.f32.mrf.mxu1 }
  0xf0   : > { %v607_v44 = vmax.f32 %v473_v30, %v575_v36  ;;  %v578_v46 = vmul.f32 0.1, %v484_v38  ;;  %v594_v47 = vmul.f32 0.1, %v548_v39  ;;  %v476_v48 = vadd.f32 %v1021_v22, %v475_v42 }
  0xf1   : > { %v623_v45 = vmax.f32 %v537_v31, %v591_v37  ;;  %642 = vst.msk [vmem:[%s1031_s29 + $0x50] sm:$0xff] %vm631_vm3, %v609_v40  ;;  %658 = vst.msk [vmem:[%s1031_s29 + $0xd0] sm:$0xff] %vm631_vm3, %v625_v41  ;;  %v540_v49 = vadd.f32 %v1021_v22, %v539_v43  ;;  %v844_v50 = vpop.f32.mrf.mxu0  ;;  %v860_v51 = vpop.f32.mrf.mxu1 }
  0xf2   : > { %640 = vst.msk [vmem:[%s1031_s29 + $0x40] sm:$0xff] %vm631_vm3, %v607_v44  ;;  %v610_v52 = vmax.f32 %v484_v38, %v578_v46  ;;  %v626_v53 = vmax.f32 %v548_v39, %v594_v47  ;;  %v497_v54 = vadd.f32 %v844_v50, %v1021_v22  ;;  %v561_v55 = vadd.f32 %v860_v51, %v1021_v22 }
  0xf3   : > { %656 = vst.msk [vmem:[%s1031_s29 + $0xc0] sm:$0xff] %vm631_vm3, %v623_v45  ;;  %v576_v56 = vmul.f32 0.1, %v476_v48  ;;  %v592_v57 = vmul.f32 0.1, %v540_v49  ;;  %v488_v58 = vpop.f32.mrf.mxu0  ;;  %v552_v59 = vpop.f32.mrf.mxu1 }
  0xf4   : > { %643 = vst.msk [vmem:[%s1031_s29 + $0x58] sm:$0xff] %vm631_vm3, %v610_v52  ;;  %659 = vst.msk [vmem:[%s1031_s29 + $0xd8] sm:$0xff] %vm631_vm3, %v626_v53  ;;  %v581_v60 = vmul.f32 0.1, %v497_v54  ;;  %v597_v61 = vmul.f32 0.1, %v561_v55  ;;  %v489_v62 = vadd.f32 %v1021_v22, %v488_v58  ;;  %v553_v63 = vadd.f32 %v1021_v22, %v552_v59 }
  0xf5   : > { %v608_v0 = vmax.f32 %v476_v48, %v576_v56  ;;  %v624_v1 = vmax.f32 %v540_v49, %v592_v57  ;;  %v845_v2 = vpop.f32.mrf.mxu0  ;;  %v861_v3 = vpop.f32.mrf.mxu1 }
  0xf6   : > { %v613_v4 = vmax.f32 %v497_v54, %v581_v60  ;;  %v629_v5 = vmax.f32 %v561_v55, %v597_v61  ;;  %v579_v6 = vmul.f32 0.1, %v489_v62  ;;  %v595_v7 = vmul.f32 0.1, %v553_v63 }
  0xf7   : > { %641 = vst.msk [vmem:[%s1031_s29 + $0x48] sm:$0xff] %vm631_vm3, %v608_v0  ;;  %657 = vst.msk [vmem:[%s1031_s29 + $0xc8] sm:$0xff] %vm631_vm3, %v624_v1  ;;  %v500_v8 = vadd.f32 %v845_v2, %v1021_v22  ;;  %v564_v9 = vadd.f32 %v861_v3, %v1021_v22  ;;  %v491_v10 = vpop.f32.mrf.mxu0  ;;  %v555_v11 = vpop.f32.mrf.mxu1 }
  0xf8   : > { %646 = vst.msk [vmem:[%s1031_s29 + $0x70] sm:$0xff] %vm631_vm3, %v613_v4  ;;  %662 = vst.msk [vmem:[%s1031_s29 + $0xf0] sm:$0xff] %vm631_vm3, %v629_v5  ;;  %v611_v12 = vmax.f32 %v489_v62, %v579_v6  ;;  %v627_v13 = vmax.f32 %v553_v63, %v595_v7  ;;  %v492_v14 = vadd.f32 %v1021_v22, %v491_v10 }
  0xf9   : > { %v556_v15 = vadd.f32 %v1021_v22, %v555_v11  ;;  %v582_v16 = vmul.f32 0.1, %v500_v8  ;;  %v598_v17 = vmul.f32 0.1, %v564_v9 }
  0xfa   : > { %644 = vst.msk [vmem:[%s1031_s29 + $0x60] sm:$0xff] %vm631_vm3, %v611_v12  ;;  %660 = vst.msk [vmem:[%s1031_s29 + $0xe0] sm:$0xff] %vm631_vm3, %v627_v13  ;;  %v580_v18 = vmul.f32 0.1, %v492_v14 }
  0xfb   : > { %v596_v19 = vmul.f32 0.1, %v556_v15  ;;  %v614_v20 = vmax.f32 %v500_v8, %v582_v16  ;;  %v630_v21 = vmax.f32 %v564_v9, %v598_v17 }
  0xfc   : > { %v612_v23 = vmax.f32 %v492_v14, %v580_v18 }
  0xfd   : > { %v628_v24 = vmax.f32 %v556_v15, %v596_v19  ;;  %647 = vst.msk [vmem:[%s1031_s29 + $0x78] sm:$0xff] %vm631_vm3, %v614_v20  ;;  %663 = vst.msk [vmem:[%s1031_s29 + $0xf8] sm:$0xff] %vm631_vm3, %v630_v21 }
  0xfe   : > { %645 = vst.msk [vmem:[%s1031_s29 + $0x68] sm:$0xff] %vm631_vm3, %v612_v23 }
  0xff   : > { %661 = vst.msk [vmem:[%s1031_s29 + $0xe8] sm:$0xff] %vm631_vm3, %v628_v24 }
 0x100 PF: > { %s13_s14 = sadd.s32 1, %s931_s14   ;;  %s1138_s12 = smov %s927_s13 }
 0x101   : > { %p10_p5 = scmp.ge.s32.totalorder %s13_s14, 4   ;;  %s1139_s13 = smov %s1141_s15 }
 0x103   :  { %12 = sbr.rel (!%p10_p5) target bundleno = 2 (0x2), region = 62 }

// kernel: content_extractor_forward.3
= control target key start
LH: loop header
LB: loop body
LE: loop exit
PB: predicated region body
PF: predicated region fallthrough
CT: control target
= control target key end

     0   :  { %s6672_s18 = smov 0   ;;  %s6674_s19 = smov 0   ;;  %s9609_s0 = inlined_call_operand.vmem [shape: f32[2,16,16,16], index: 0, kind: input, shape index: {}]   ;;  %s9610_s1 = inlined_call_operand.vmem [shape: bf16[2,3,48,16], index: 1, kind: input, shape index: {}]   ;;  %s9611_s2 = inlined_call_operand.vmem [shape: f32[2,16], index: 2, kind: input, shape index: {}]   ;;  %s9612_s3 = inlined_call_operand.vmem [shape: bf16[2,3,48,16], index: 3, kind: input, shape index: {}]   ;;  %s9613_s4 = inlined_call_operand.vmem [shape: f32[2,16], index: 4, kind: input, shape index: {}]   ;;  %s9614_s5 = inlined_call_operand.vmem [shape: f32[2,16,16,16], index: 5, kind: output, shape index: {}]  }
   0x1   :  { %s6676_s20 = smov 0  }
   0x2 LB: > { %s27_s21 = sadd.s32 1, %s6633_s19  ;;  %p5567_p0 = scmp.ge.s32.totalorder %s6637_s20, 1  ;;  %s6637_s20 = sphi %s6676_s20, %s15_s20   ;;  %s6633_s19 = sphi %s6674_s19, %s9762_s19   ;;  %s6629_s18 = sphi %s6672_s18, %s9761_s18  }
   0x3   : > { %p29_p1 = scmp.ge.s32.totalorder %s27_s21, 2  ;;  %p209_p2 = scmp.lt.s32.totalorder %s6637_s20, 3 }
   0x5   : > { %s9764_s21 = smov (%p29_p1, %s27_s21), 0  ;;  %p210_p3 = pnand %p5567_p0, %p209_p2 }
   0x7   : > { %213 = sbr.rel (%p210_p3) target bundleno = 1770 (0x6ea), region = 40 }
   0xc   : > { %p248_p4 = scmp.lt.s32.totalorder %s6629_s18, 1  ;;  %v6547_v0 = vld [vmem:[%s9610_s1 + $0x10] sm:$0xff]   ;;  %v6548_v1 = vld [vmem:[%s9610_s1 + $0x28] sm:$0xff]   ;;  %v6550_v3 = vld [vmem:[%s9610_s1 + $0x20] sm:$0xff]   ;;  %vm480_vm0 = vcmask 1040384   ;;  %vm772_vm2 = vcmask 1046528  }
   0xd   : > { %6102 = vmatprep.subr.bf16.mxu1 %v6547_v0  ;;  %6064 = vmatprep.subr.bf16.mxu0 %v6548_v1  ;;  %v6549_v2 = vld [vmem:[%s9610_s1 + $0x8] sm:$0xff]   ;;  %vm481_vm1 = vsmask.f32 256  ;;  %vm515_vm3 = vsmask.f32 7424  ;;  %v9655_v32 = vmov 0 }
   0xe   : > { %s9766_s18 = smov (!%p248_p4, %s6629_s18), 1  ;;  %6103 = vmatpush3.bf16.msra.mxu1 %v6547_v0  ;;  %6065 = vmatpush3.bf16.msra.mxu0 %v6548_v1  ;;  %vm6730_vm4 = vmand %vm480_vm0, %vm481_vm1  ;;  %v6551_v57 = vld [vmem:[%s9610_s1] sm:$0xff]   ;;  %v6552_v62 = vld [vmem:[%s9610_s1 + $0x18] sm:$0xff]   ;;  %s6639_s13 = smov 32   ;;  %vm853_vm5 = vcmask 130048   ;;  %vm886_vm6 = vcmask 261120  }
   0xf   : > { %s5834_s26 = sshll.u32 %s9766_s18, 8  ;;  %6104 = vmatprep.subr.bf16.mxu1 %v6549_v2  ;;  %6066 = vmatprep.subr.bf16.mxu0 %v6550_v3  ;;  %v9656_v32 = vsel %vm6730_vm4, 4294967295, %v9655_v32  ;;  %s6640_s16 = smov 16   ;;  %vm937_vm7 = vcmask 392192  }
  0x10   : > { %s6707_s6 = scalar_lea.vmem %s9609_s0, %s5834_s26  ;;  %9657 = vst [vmem:[#allocation2_spill] sm:$0xff] %v9656_v32  ;;  %s9418_s11 = scalar_lea.vmem %s9614_s5, %s5834_s26 }
  0x11   : > { %v270_v4 = vld [vmem:[%s6707_s6] sm:$0xff]  ;;  %v271_v5 = vld [vmem:[%s6707_s6 + $0x8] sm:$0xff]  ;;  %v272_v6 = vld [vmem:[%s6707_s6 + $0x10] sm:$0xff] }
  0x12   : > { %v302_v7 = vpack.c.bf16 %v271_v5, %v270_v4  ;;  %v273_v8 = vld [vmem:[%s6707_s6 + $0x18] sm:$0xff]  ;;  %v276_v9 = vld [vmem:[%s6707_s6 + $0x30] sm:$0xff]  ;;  %v274_v13 = vld [vmem:[%s6707_s6 + $0x20] sm:$0xff]  ;;  %6105 = vmatpush3.bf16.msra.mxu1 %v6549_v2  ;;  %6067 = vmatpush3.bf16.msra.mxu0 %v6550_v3 }
  0x13   : > { %v277_v10 = vld [vmem:[%s6707_s6 + $0x38] sm:$0xff]  ;;  %v303_v11 = vpack.c.bf16 %v273_v8, %v272_v6  ;;  %v275_v14 = vld [vmem:[%s6707_s6 + $0x28] sm:$0xff]  ;;  %v280_v15 = vld [vmem:[%s6707_s6 + $0x50] sm:$0xff]  ;;  %6106 = vmatprep.subr.bf16.mxu1 %v6551_v57  ;;  %6068 = vmatprep.subr.bf16.mxu0 %v6552_v62 }
  0x14   : > { %v305_v12 = vpack.c.bf16 %v277_v10, %v276_v9  ;;  %v337_v16 = vshrl.u32 %v302_v7, 16  ;;  %v340_v17 = vshll.u32 %v302_v7, 16  ;;  %v304_v18 = vpack.c.bf16 %v275_v14, %v274_v13  ;;  %v281_v19 = vld [vmem:[%s6707_s6 + $0x58] sm:$0xff]  ;;  %v278_v20 = vld [vmem:[%s6707_s6 + $0x40] sm:$0xff]  ;;  %v279_v21 = vld [vmem:[%s6707_s6 + $0x48] sm:$0xff] }
  0x15   : > { %v344_v22 = vshrl.u32 %v303_v11, 16  ;;  %v347_v23 = vshll.u32 %v303_v11, 16  ;;  %v284_v26 = vld [vmem:[%s6707_s6 + $0x70] sm:$0xff]  ;;  %v285_v27 = vld [vmem:[%s6707_s6 + $0x78] sm:$0xff]  ;;  %v6726_v31 = vpack.c.bf16 %v281_v19, %v280_v15  ;;  %v6734_v35 = vpack.c.bf16 %v279_v21, %v278_v20  ;;  %v6779_v7 = vld [vmem:[%s9610_s1 + $0x40] sm:$0xff]  }
  0x16   : > { %v358_v24 = vshrl.u32 %v305_v12, 16  ;;  %v361_v25 = vshll.u32 %v305_v12, 16  ;;  %v339_v28 = vrot.slane %v337_v16, 7  ;;  %v351_v29 = vshrl.u32 %v304_v18, 16  ;;  %6107 = vmatpush3.bf16.msra.mxu1 %v6551_v57  ;;  %6069 = vmatpush3.bf16.msra.mxu0 %v6552_v62 }
  0x17   : > { %v354_v30 = vshll.u32 %v304_v18, 16  ;;  %v346_v33 = vrot.slane %v344_v22, 7  ;;  %v6736_v36 = vpack.c.bf16 %v285_v27, %v284_v26  ;;  %v372_v40 = vshrl.u32 %v6726_v31, 16  ;;  %6140 = vmatprep.subr.bf16.mxu0 %v6779_v7 }
  0x18   : > { %v360_v34 = vrot.slane %v358_v24, 7  ;;  %v342_v37 = vor.u32 %v340_v17, %v339_v28  ;;  %v499_v38 = vsel %vm6730_vm4, %v339_v28, 0  ;;  %v353_v39 = vrot.slane %v351_v29, 7  ;;  %v283_v24 = vld [vmem:[%s6707_s6 + $0x68] sm:$0xff] }
  0x19   : > { %v774_v41 = vrot.slane %v499_v38, 1  ;;  %v524_v42 = vshll.u32 %v499_v38, 16  ;;  %v349_v43 = vor.u32 %v347_v23, %v346_v33  ;;  %v500_v44 = vsel %vm6730_vm4, %v346_v33, 0  ;;  %v282_v23 = vld [vmem:[%s6707_s6 + $0x60] sm:$0xff] }
  0x1a   : > { %v6745_v45 = vsel %vm6730_vm4, 0, %v342_v37  ;;  %v777_v46 = vrot.slane %v500_v44, 1  ;;  %v536_v47 = vshll.u32 %v500_v44, 16  ;;  %v363_v48 = vor.u32 %v361_v25, %v360_v34  ;;  %v288_v37 = vld [vmem:[%s6707_s6 + $0x90] sm:$0xff] }
  0x1b   : > { %v773_v49 = vrot.slane %v6745_v45, 1  ;;  %v517_v50 = vshrl.u32 %v6745_v45, 16  ;;  %v519_v51 = vshll.u32 %v6745_v45, 16  ;;  %v526_v52 = vrot.slane %v524_v42, 1  ;;  %v289_v42 = vld [vmem:[%s6707_s6 + $0x98] sm:$0xff] }
  0x1c   : > { %v6752_v53 = vsel %vm6730_vm4, 0, %v349_v43  ;;  %v538_v54 = vrot.slane %v536_v47, 1  ;;  %v6756_v55 = vsel %vm6730_vm4, 0, %v363_v48  ;;  %v502_v56 = vsel %vm6730_vm4, %v360_v34, 0 }
  0x1d   : > { %v775_v58 = vsel %vm772_vm2, %v773_v49, %v774_v41  ;;  %v521_v59 = vrot.slane %v519_v51, 1  ;;  %v776_v60 = vrot.slane %v6752_v53, 1  ;;  %v529_v61 = vshrl.u32 %v6752_v53, 16 }
  0x1e   : > { %821 = vrot.lane.b32.xlu1 %v775_v58, %s6639_s13  ;;  %v531_v63 = vshll.u32 %v6752_v53, 16  ;;  %v553_v0 = vshrl.u32 %v6756_v55, 16  ;;  %v555_v1 = vshll.u32 %v6756_v55, 16  ;;  %v560_v2 = vshll.u32 %v502_v56, 16 }
  0x1f   : > { %v522_v3 = vor.u32 %v521_v59, %v517_v50  ;;  %v778_v4 = vsel %vm772_vm2, %v776_v60, %v777_v46  ;;  %v356_v5 = vor.u32 %v354_v30, %v353_v39  ;;  %v501_v6 = vsel %vm6730_vm4, %v353_v39, 0 }
  0x20   : > { %v533_v8 = vrot.slane %v531_v63, 1  ;;  %v557_v9 = vrot.slane %v555_v1, 1  ;;  %v562_v10 = vrot.slane %v560_v2, 1  ;;  %v548_v11 = vshll.u32 %v501_v6, 16 }
  0x21   : > { %v527_v12 = vsel %vm515_vm3, %v522_v3, %v526_v52  ;;  %v6784_v13 = vsel %vm6730_vm4, 0, %v356_v5  ;;  %v782_v14 = vrot.slane %v6756_v55, 1  ;;  %v783_v15 = vrot.slane %v502_v56, 1 }
  0x22   : > { %708 = vrot.lane.b32.xlu0 %v527_v12, %s6640_s16  ;;  %823 = vrot.lane.b32.xlu1 %v778_v4, %s6639_s13  ;;  %v534_v16 = vor.u32 %v533_v8, %v529_v61  ;;  %v558_v17 = vor.u32 %v557_v9, %v553_v0  ;;  %v541_v18 = vshrl.u32 %v6784_v13, 16  ;;  %v543_v19 = vshll.u32 %v6784_v13, 16  ;;  %v286_v12 = vld [vmem:[%s6707_s6 + $0x80] sm:$0xff] }
  0x23   : > { %v550_v20 = vrot.slane %v548_v11, 1  ;;  %v779_v21 = vrot.slane %v6784_v13, 1  ;;  %v780_v22 = vrot.slane %v501_v6, 1  ;;  %v374_v28 = vrot.slane %v372_v40, 7 }
  0x24   : > { %v539_v25 = vsel %vm515_vm3, %v534_v16, %v538_v54  ;;  %v563_v26 = vsel %vm515_vm3, %v558_v17, %v562_v10  ;;  %v545_v27 = vrot.slane %v543_v19, 1  ;;  %v784_v29 = vsel %vm772_vm2, %v782_v14, %v783_v15 }
  0x25   : > { %v375_v30 = vshll.u32 %v6726_v31, 16  ;;  %v365_v33 = vshrl.u32 %v6734_v35, 16  ;;  %v368_v34 = vshll.u32 %v6734_v35, 16  ;;  %v781_v39 = vsel %vm772_vm2, %v779_v21, %v780_v22 }
  0x26   : > { %710 = vrot.lane.b32.xlu0 %v539_v25, %s6640_s16  ;;  %714 = vrot.lane.b32.xlu1 %v563_v26, %s6640_s16  ;;  %v546_v38 = vor.u32 %v545_v27, %v541_v18  ;;  %v504_v41 = vsel %vm6730_vm4, %v374_v28, 0  ;;  %v386_v40 = vshrl.u32 %v6736_v36, 16  ;;  %v389_v46 = vshll.u32 %v6736_v36, 16  ;;  %v287_v18 = vld [vmem:[%s6707_s6 + $0x88] sm:$0xff] }
  0x27   : > { %v377_v43 = vor.u32 %v375_v30, %v374_v28  ;;  %v584_v31 = vshll.u32 %v504_v41, 16  ;;  %v367_v44 = vrot.slane %v365_v33, 7  ;;  %v789_v47 = vrot.slane %v504_v41, 1 }
  0x28   : > { %v551_v35 = vsel %vm515_vm3, %v546_v38, %v550_v20  ;;  %v388_v48 = vrot.slane %v386_v40, 7  ;;  %v308_v49 = vpack.c.bf16 %v283_v24, %v282_v23  ;;  %v311_v54 = vpack.c.bf16 %v289_v42, %v288_v37  ;;  %v292_v23 = vld [vmem:[%s6707_s6 + $0xb0] sm:$0xff]  ;;  %v293_v24 = vld [vmem:[%s6707_s6 + $0xb8] sm:$0xff] }
  0x29   : > { %v6813_v50 = vsel %vm6730_vm4, 0, %v377_v43  ;;  %v370_v51 = vor.u32 %v368_v34, %v367_v44  ;;  %v503_v52 = vsel %vm6730_vm4, %v367_v44, 0  ;;  %v586_v57 = vrot.slane %v584_v31, 1 }
  0x2a   : > { %712 = vrot.lane.b32.xlu0 %v551_v35, %s6640_s16  ;;  %827 = vrot.lane.b32.xlu1 %v784_v29, %s6639_s13  ;;  %v577_v36 = vshrl.u32 %v6813_v50, 16  ;;  %v579_v56 = vshll.u32 %v6813_v50, 16  ;;  %v572_v58 = vshll.u32 %v503_v52, 16  ;;  %v788_v60 = vrot.slane %v6813_v50, 1 }
  0x2b   : > { %v6823_v59 = vsel %vm6730_vm4, 0, %v370_v51  ;;  %v391_v61 = vor.u32 %v389_v46, %v388_v48  ;;  %v506_v62 = vsel %vm6730_vm4, %v388_v48, 0  ;;  %v786_v2 = vrot.slane %v503_v52, 1 }
  0x2c   : > { %v581_v63 = vrot.slane %v579_v56, 1  ;;  %v565_v0 = vshrl.u32 %v6823_v59, 16  ;;  %v567_v1 = vshll.u32 %v6823_v59, 16  ;;  %v574_v3 = vrot.slane %v572_v58, 1 }
  0x2d   : > { %v785_v4 = vrot.slane %v6823_v59, 1  ;;  %v6833_v5 = vsel %vm6730_vm4, 0, %v391_v61  ;;  %v608_v6 = vshll.u32 %v506_v62, 16  ;;  %v790_v14 = vsel %vm772_vm2, %v788_v60, %v789_v47 }
  0x2e   : > { %825 = vrot.lane.b32.xlu0 %v781_v39, %s6639_s13  ;;  %v582_v8 = vor.u32 %v581_v63, %v577_v36  ;;  %v569_v9 = vrot.slane %v567_v1, 1  ;;  %v601_v10 = vshrl.u32 %v6833_v5, 16  ;;  %v603_v11 = vshll.u32 %v6833_v5, 16  ;;  %v290_v63 = vld [vmem:[%s6707_s6 + $0xa0] sm:$0xff] }
  0x2f   : > { %v610_v15 = vrot.slane %v608_v6, 1  ;;  %v379_v16 = vshrl.u32 %v308_v49, 16  ;;  %v382_v17 = vshll.u32 %v308_v49, 16  ;;  %v794_v22 = vrot.slane %v6833_v5, 1  ;;  %v296_v6 = vld [vmem:[%s6707_s6 + $0xd0] sm:$0xff] }
  0x30   : > { %v587_v19 = vsel %vm515_vm3, %v582_v8, %v586_v57  ;;  %v570_v20 = vor.u32 %v569_v9, %v565_v0  ;;  %v605_v21 = vrot.slane %v603_v11, 1  ;;  %v795_v26 = vrot.slane %v506_v62, 1  ;;  %v291_v0 = vld [vmem:[%s6707_s6 + $0xa8] sm:$0xff]  ;;  %v297_v8 = vld [vmem:[%s6707_s6 + $0xd8] sm:$0xff] }
  0x31   : > { %718 = vrot.lane.b32.xlu1 %v587_v19, %s6640_s16  ;;  %v381_v25 = vrot.slane %v379_v16, 7  ;;  %v400_v27 = vshrl.u32 %v311_v54, 16  ;;  %v403_v28 = vshll.u32 %v311_v54, 16  ;;  %v787_v30 = vsel %vm772_vm2, %v785_v4, %v786_v2 }
  0x32   : > { %v575_v29 = vsel %vm515_vm3, %v570_v20, %v574_v3  ;;  %v606_v33 = vor.u32 %v605_v21, %v601_v10  ;;  %v310_v34 = vpack.c.bf16 %v287_v18, %v286_v12  ;;  %v313_v41 = vpack.c.bf16 %v293_v24, %v292_v23 }
  0x33   : > { %716 = vrot.lane.b32.xlu0 %v575_v29, %s6640_s16  ;;  %v384_v37 = vor.u32 %v382_v17, %v381_v25  ;;  %v505_v38 = vsel %vm6730_vm4, %v381_v25, 0  ;;  %v402_v39 = vrot.slane %v400_v27, 7  ;;  %v796_v42 = vsel %vm772_vm2, %v794_v22, %v795_v26 }
  0x34   : > { %v596_v40 = vshll.u32 %v505_v38, 16  ;;  %v792_v43 = vrot.slane %v505_v38, 1  ;;  %v393_v31 = vshrl.u32 %v310_v34, 16  ;;  %v396_v47 = vshll.u32 %v310_v34, 16 }
  0x35   : > { %831 = vrot.lane.b32.xlu1 %v790_v14, %s6639_s13  ;;  %v6855_v44 = vsel %vm6730_vm4, 0, %v384_v37  ;;  %v405_v46 = vor.u32 %v403_v28, %v402_v39  ;;  %v508_v35 = vsel %vm6730_vm4, %v402_v39, 0  ;;  %v611_v48 = vsel %vm515_vm3, %v606_v33, %v610_v15  ;;  %v294_v14 = vld [vmem:[%s6707_s6 + $0xc0] sm:$0xff]  ;;  %v295_v15 = vld [vmem:[%s6707_s6 + $0xc8] sm:$0xff] }
  0x36   : > { %v589_v49 = vshrl.u32 %v6855_v44, 16  ;;  %v591_v51 = vshll.u32 %v6855_v44, 16  ;;  %v791_v52 = vrot.slane %v6855_v44, 1  ;;  %v598_v54 = vrot.slane %v596_v40, 1 }
  0x37   : > { %829 = vrot.lane.b32.xlu0 %v787_v30, %s6639_s13  ;;  %v6866_v36 = vsel %vm6730_vm4, 0, %v405_v46  ;;  %v632_v56 = vshll.u32 %v508_v35, 16  ;;  %v395_v57 = vrot.slane %v393_v31, 7  ;;  %v801_v62 = vrot.slane %v508_v35, 1 }
  0x38   : > { %v593_v58 = vrot.slane %v591_v51, 1  ;;  %v625_v60 = vshrl.u32 %v6866_v36, 16  ;;  %v627_v61 = vshll.u32 %v6866_v36, 16  ;;  %v793_v1 = vsel %vm772_vm2, %v791_v52, %v792_v43 }
  0x39   : > { %722 = vrot.lane.b32.xlu1 %v611_v48, %s6640_s16  ;;  %v398_v2 = vor.u32 %v396_v47, %v395_v57  ;;  %v507_v3 = vsel %vm6730_vm4, %v395_v57, 0  ;;  %v800_v4 = vrot.slane %v6866_v36, 1  ;;  %v634_v11 = vrot.slane %v632_v56, 1 }
  0x3a   : > { %v594_v9 = vor.u32 %v593_v58, %v589_v49  ;;  %v629_v10 = vrot.slane %v627_v61, 1  ;;  %v620_v12 = vshll.u32 %v507_v3, 16  ;;  %v798_v17 = vrot.slane %v507_v3, 1 }
  0x3b   : > { %v6883_v16 = vsel %vm6730_vm4, 0, %v398_v2  ;;  %v414_v18 = vshrl.u32 %v313_v41, 16  ;;  %v417_v19 = vshll.u32 %v313_v41, 16  ;;  %v802_v25 = vsel %vm772_vm2, %v800_v4, %v801_v62 }
  0x3c   : > { %v599_v20 = vsel %vm515_vm3, %v594_v9, %v598_v54  ;;  %v630_v21 = vor.u32 %v629_v10, %v625_v60  ;;  %v613_v22 = vshrl.u32 %v6883_v16, 16  ;;  %v615_v23 = vshll.u32 %v6883_v16, 16  ;;  %v300_v10 = vld [vmem:[%s6707_s6 + $0xf0] sm:$0xff] }
  0x3d   : > { %720 = vrot.lane.b32.xlu0 %v599_v20, %s6640_s16  ;;  %835 = vrot.lane.b32.xlu1 %v796_v42, %s6639_s13  ;;  %v622_v24 = vrot.slane %v620_v12, 1  ;;  %v416_v26 = vrot.slane %v414_v18, 7  ;;  %v312_v27 = vpack.c.bf16 %v291_v0, %v290_v63  ;;  %v797_v30 = vrot.slane %v6883_v16, 1 }
  0x3e   : > { %v635_v28 = vsel %vm515_vm3, %v630_v21, %v634_v11  ;;  %v617_v29 = vrot.slane %v615_v23, 1  ;;  %v315_v33 = vpack.c.bf16 %v297_v8, %v296_v6  ;;  %v314_v39 = vpack.c.bf16 %v295_v15, %v294_v14  ;;  %v301_v11 = vld [vmem:[%s6707_s6 + $0xf8] sm:$0xff] }
  0x3f   : > { %v419_v34 = vor.u32 %v417_v19, %v416_v26  ;;  %v510_v37 = vsel %vm6730_vm4, %v416_v26, 0  ;;  %v407_v38 = vshrl.u32 %v312_v27, 16  ;;  %v410_v42 = vshll.u32 %v312_v27, 16 }
  0x40   : > { %v618_v41 = vor.u32 %v617_v29, %v613_v22  ;;  %v656_v40 = vshll.u32 %v510_v37, 16  ;;  %v807_v43 = vrot.slane %v510_v37, 1  ;;  %v428_v35 = vshrl.u32 %v315_v33, 16  ;;  %v298_v22 = vld [vmem:[%s6707_s6 + $0xe0] sm:$0xff] }
  0x41   : > { %833 = vrot.lane.b32.xlu0 %v793_v1, %s6639_s13  ;;  %726 = vrot.lane.b32.xlu1 %v635_v28, %s6640_s16  ;;  %v6899_v31 = vsel %vm6730_vm4, 0, %v419_v34  ;;  %v409_v46 = vrot.slane %v407_v38, 7  ;;  %v431_v47 = vshll.u32 %v315_v33, 16  ;;  %v421_v63 = vshrl.u32 %v314_v39, 16 }
  0x42   : > { %v623_v48 = vsel %vm515_vm3, %v618_v41, %v622_v24  ;;  %v649_v49 = vshrl.u32 %v6899_v31, 16  ;;  %v651_v51 = vshll.u32 %v6899_v31, 16  ;;  %v658_v52 = vrot.slane %v656_v40, 1 }
  0x43   : > { %v412_v54 = vor.u32 %v410_v42, %v409_v46  ;;  %v509_v56 = vsel %vm6730_vm4, %v409_v46, 0  ;;  %v806_v57 = vrot.slane %v6899_v31, 1  ;;  %v430_v58 = vrot.slane %v428_v35, 7 }
  0x44   : > { %v653_v60 = vrot.slane %v651_v51, 1  ;;  %v644_v61 = vshll.u32 %v509_v56, 16  ;;  %v804_v62 = vrot.slane %v509_v56, 1  ;;  %v799_v0 = vsel %vm772_vm2, %v797_v30, %v798_v17 }
  0x45   : > { %724 = vrot.lane.b32.xlu0 %v623_v48, %s6640_s16  ;;  %839 = vrot.lane.b32.xlu1 %v802_v25, %s6639_s13  ;;  %v6912_v1 = vsel %vm6730_vm4, 0, %v412_v54  ;;  %v433_v2 = vor.u32 %v431_v47, %v430_v58  ;;  %v512_v3 = vsel %vm6730_vm4, %v430_v58, 0  ;;  %v423_v17 = vrot.slane %v421_v63, 7  ;;  %v299_v25 = vld [vmem:[%s6707_s6 + $0xe8] sm:$0xff] }
  0x46   : > { %v654_v4 = vor.u32 %v653_v60, %v649_v49  ;;  %v637_v6 = vshrl.u32 %v6912_v1, 16  ;;  %v639_v8 = vshll.u32 %v6912_v1, 16  ;;  %v646_v9 = vrot.slane %v644_v61, 1 }
  0x47   : > { %v803_v12 = vrot.slane %v6912_v1, 1  ;;  %v6923_v14 = vsel %vm6730_vm4, 0, %v433_v2  ;;  %v680_v15 = vshll.u32 %v512_v3, 16  ;;  %v424_v23 = vshll.u32 %v314_v39, 16 }
  0x48   : > { %v659_v18 = vsel %vm515_vm3, %v654_v4, %v658_v52  ;;  %v641_v19 = vrot.slane %v639_v8, 1  ;;  %v673_v20 = vshrl.u32 %v6923_v14, 16  ;;  %v675_v21 = vshll.u32 %v6923_v14, 16 }
  0x49   : > { %837 = vrot.lane.b32.xlu0 %v799_v0, %s6639_s13  ;;  %730 = vrot.lane.b32.xlu1 %v659_v18, %s6640_s16  ;;  %v511_v24 = vsel %vm6730_vm4, %v423_v17, 0  ;;  %v808_v27 = vsel %vm772_vm2, %v806_v57, %v807_v43  ;;  %v682_v29 = vrot.slane %v680_v15, 1  ;;  %v805_v30 = vsel %vm772_vm2, %v803_v12, %v804_v62 }
  0x4a   : > { %v642_v26 = vor.u32 %v641_v19, %v637_v6  ;;  %v677_v28 = vrot.slane %v675_v21, 1  ;;  %v426_v33 = vor.u32 %v424_v23, %v423_v17  ;;  %v317_v34 = vpack.c.bf16 %v301_v11, %v300_v10 }
  0x4b   : > { %v668_v41 = vshll.u32 %v511_v24, 16  ;;  %v316_v40 = vpack.c.bf16 %v299_v25, %v298_v22  ;;  %v812_v42 = vrot.slane %v6923_v14, 1  ;;  %v813_v49 = vrot.slane %v512_v3, 1 }
  0x4c   : > { %v647_v37 = vsel %vm515_vm3, %v642_v26, %v646_v9  ;;  %v678_v38 = vor.u32 %v677_v28, %v673_v20  ;;  %v6941_v39 = vsel %vm6730_vm4, 0, %v426_v33  ;;  %v442_v43 = vshrl.u32 %v317_v34, 16 }
  0x4d   : > { %728 = vrot.lane.b32.xlu0 %v647_v37, %s6640_s16  ;;  %843 = vrot.lane.b32.xlu1 %v808_v27, %s6639_s13  ;;  %v445_v46 = vshll.u32 %v317_v34, 16  ;;  %v661_v47 = vshrl.u32 %v6941_v39, 16  ;;  %v663_v48 = vshll.u32 %v6941_v39, 16  ;;  %v435_v52 = vshrl.u32 %v316_v40, 16 }
  0x4e   : > { %v683_v35 = vsel %vm515_vm3, %v678_v38, %v682_v29  ;;  %v444_v51 = vrot.slane %v442_v43, 7  ;;  %v438_v54 = vshll.u32 %v316_v40, 16  ;;  %v670_v57 = vrot.slane %v668_v41, 1 }
  0x4f   : > { %v665_v56 = vrot.slane %v663_v48, 1  ;;  %v810_v58 = vrot.slane %v511_v24, 1  ;;  %v9615_v60 = vmov 0   ;;  %v809_v61 = vrot.slane %v6941_v39, 1 }
  0x50   : > { %6108 = vmatprep.mubr.bf16.mxu1 %v9615_v60  ;;  %v447_v62 = vor.u32 %v445_v46, %v444_v51  ;;  %v514_v63 = vsel %vm6730_vm4, %v444_v51, 0  ;;  %v437_v0 = vrot.slane %v435_v52, 7  ;;  %v814_v3 = vsel %vm772_vm2, %v812_v42, %v813_v49  ;;  %v6554_v49 = vld [vmem:[%s9610_s1 + $0x38] sm:$0xff]  }
  0x51   : > { %841 = vrot.lane.b32.xlu0 %v805_v30, %s6639_s13  ;;  %734 = vrot.lane.b32.xlu1 %v683_v35, %s6640_s16  ;;  %v666_v2 = vor.u32 %v665_v56, %v661_v47  ;;  %v704_v4 = vshll.u32 %v514_v63, 16  ;;  %v811_v15 = vsel %vm772_vm2, %v809_v61, %v810_v58  ;;  %v819_v23 = vrot.slane %v514_v63, 1 }
  0x52   : > { %v6956_v6 = vsel %vm6730_vm4, 0, %v447_v62  ;;  %v440_v8 = vor.u32 %v438_v54, %v437_v0  ;;  %v513_v9 = vsel %vm6730_vm4, %v437_v0, 0 }
  0x53   : > { %v671_v10 = vsel %vm515_vm3, %v666_v2, %v670_v57  ;;  %v697_v11 = vshrl.u32 %v6956_v6, 16  ;;  %v699_v12 = vshll.u32 %v6956_v6, 16  ;;  %v692_v18 = vshll.u32 %v513_v9, 16 }
  0x54   : > { %v6968_v17 = vsel %vm6730_vm4, 0, %v440_v8  ;;  %v706_v20 = vrot.slane %v704_v4, 1  ;;  %v818_v27 = vrot.slane %v6956_v6, 1  ;;  %v816_v33 = vrot.slane %v513_v9, 1 }
  0x55   : > { %732 = vrot.lane.b32.xlu0 %v671_v10, %s6640_s16  ;;  %847 = vrot.lane.b32.xlu1 %v814_v3, %s6639_s13  ;;  %v701_v19 = vrot.slane %v699_v12, 1  ;;  %v685_v21 = vshrl.u32 %v6968_v17, 16  ;;  %v687_v22 = vshll.u32 %v6968_v17, 16  ;;  %v694_v26 = vrot.slane %v692_v18, 1 }
  0x56   : > { %v815_v30 = vrot.slane %v6968_v17, 1  ;;  %v820_v37 = vsel %vm772_vm2, %v818_v27, %v819_v23 }
  0x57   : > { %v702_v24 = vor.u32 %v701_v19, %v697_v11  ;;  %v689_v25 = vrot.slane %v687_v22, 1 }
  0x58   : > { %v817_v38 = vsel %vm772_vm2, %v815_v30, %v816_v33 }
  0x59   : > { %845 = vrot.lane.b32.xlu0 %v811_v15, %s6639_s13  ;;  %v707_v28 = vsel %vm515_vm3, %v702_v24, %v706_v20  ;;  %v690_v29 = vor.u32 %v689_v25, %v685_v21 }
  0x5a   : > { %738 = vrot.lane.b32.xlu1 %v707_v28, %s6640_s16 }
  0x5b   : > { %v695_v34 = vsel %vm515_vm3, %v690_v29, %v694_v26 }
  0x5d   : > { %736 = vrot.lane.b32.xlu0 %v695_v34, %s6640_s16 }
  0x5e   : > { %851 = vrot.lane.b32.xlu1 %v820_v37, %s6639_s13 }
  0x61   : > { %849 = vrot.lane.b32.xlu0 %v817_v38, %s6639_s13 }
  0x90   : > { %v822_v41 = vpop.permute.xlu1 %821 }
  0x94   : > { %v709_v40 = vpop.permute.xlu0 %708  ;;  %v824_v42 = vpop.permute.xlu1 %823 }
  0x95   : > { %v855_v43 = vsel %vm853_vm5, %v6745_v45, %v709_v40 }
  0x96   : > { %v888_v46 = vsel %vm886_vm6, %v855_v43, %v822_v41 }
  0x97   : > { %6070 = vmatprep.mubr.msk.bf16.mxu0 %vm937_vm7, %v888_v46  ;;  %6109 = vmatmul.mubr.msk.bf16.vlgmr.msra.gmra.mxu1 %vm937_vm7, %v888_v46 }
  0x98   : > { %v711_v35 = vpop.permute.xlu0 %710  ;;  %v715_v47 = vpop.permute.xlu1 %714 }
  0x99   : > { %v857_v48 = vsel %vm853_vm5, %v6752_v53, %v711_v35  ;;  %v6555_v53 = vld [vmem:[%s9610_s1 + $0x30] sm:$0xff]   ;;  %v861_v54 = vsel %vm853_vm5, %v6756_v55, %v715_v47 }
  0x9a   : > { %v6994_v51 = vsel %vm886_vm6, %v857_v48, %v824_v42 }
  0x9b   : > { %6071 = vmatmul.mubr.msk.bf16.vlgmr.msra.gmra.mxu0 %vm937_vm7, %v6994_v51  ;;  %6112 = vmatprep.mubr.msk.bf16.mxu1 %vm937_vm7, %v6994_v51 }
  0x9c   : > { %6141 = vmatpush3.bf16.msra.mxu0 %v6779_v7  ;;  %v713_v45 = vpop.permute.xlu0 %712  ;;  %v828_v52 = vpop.permute.xlu1 %827 }
  0x9d   : > { %6142 = vmatprep.subr.bf16.mxu0 %v6554_v49  ;;  %v859_v56 = vsel %vm853_vm5, %v6784_v13, %v713_v45  ;;  %v7012_v7 = vsel %vm886_vm6, %v861_v54, %v828_v52 }
  0xa0   : > { %v826_v57 = vpop.permute.xlu0 %825  ;;  %6143 = vmatpush3.bf16.msra.mxu0 %v6554_v49 }
  0xa1   : > { %v7009_v58 = vsel %vm886_vm6, %v859_v56, %v826_v57  ;;  %6144 = vmatprep.subr.bf16.mxu0 %v6555_v53 }
  0xa2   : > { %6074 = vmatprep.mubr.msk.bf16.mxu0 %vm937_vm7, %v7009_v58  ;;  %6113 = vmatmul.mubr.msk.bf16.gmra.mxu1 %vm937_vm7, %v7009_v58 }
  0xa3   : > { %v719_v61 = vpop.permute.xlu1 %718  ;;  %6075 = vmatmul.mubr.msk.bf16.gmra.mxu0 %vm937_vm7, %v7012_v7  ;;  %6116 = vmatprep.mubr.msk.bf16.mxu1 %vm937_vm7, %v7012_v7 }
  0xa4   : > { %6145 = vmatpush3.bf16.msra.mxu0 %v6555_v53  ;;  %v865_v62 = vsel %vm853_vm5, %v6813_v50, %v719_v61 }
  0xa5   : > { %v717_v55 = vpop.permute.xlu0 %716 }
  0xa6   : > { %v863_v63 = vsel %vm853_vm5, %v6823_v59, %v717_v55 }
  0xa7   : > { %v832_v13 = vpop.permute.xlu1 %831 }
  0xa8   : > { %v7030_v3 = vsel %vm886_vm6, %v865_v62, %v832_v13 }
  0xa9   : > { %v830_v0 = vpop.permute.xlu0 %829 }
  0xaa   : > { %v7027_v2 = vsel %vm886_vm6, %v863_v63, %v830_v0 }
  0xab   : > { %v723_v4 = vpop.permute.xlu1 %722  ;;  %6078 = vmatprep.mubr.msk.bf16.mxu0 %vm937_vm7, %v7027_v2  ;;  %6117 = vmatmul.mubr.msk.bf16.gmra.mxu1 %vm937_vm7, %v7027_v2 }
  0xac   : > { %6079 = vmatmul.mubr.msk.bf16.gmra.mxu0 %vm937_vm7, %v7030_v3  ;;  %6120 = vmatprep.mubr.msk.bf16.mxu1 %vm937_vm7, %v7030_v3  ;;  %v869_v8 = vsel %vm853_vm5, %v6833_v5, %v723_v4 }
  0xaf   : > { %v721_v50 = vpop.permute.xlu0 %720  ;;  %v836_v59 = vpop.permute.xlu1 %835 }
  0xb0   : > { %v867_v9 = vsel %vm853_vm5, %v6855_v44, %v721_v50  ;;  %v902_v15 = vsel %vm886_vm6, %v869_v8, %v836_v59 }
  0xb3   : > { %v834_v10 = vpop.permute.xlu0 %833  ;;  %v727_v11 = vpop.permute.xlu1 %726 }
  0xb4   : > { %v900_v12 = vsel %vm886_vm6, %v867_v9, %v834_v10  ;;  %v873_v5 = vsel %vm853_vm5, %v6866_v36, %v727_v11 }
  0xb5   : > { %6082 = vmatprep.mubr.msk.bf16.mxu0 %vm937_vm7, %v900_v12  ;;  %6121 = vmatmul.mubr.msk.bf16.gmra.mxu1 %vm937_vm7, %v900_v12 }
  0xb6   : > { %6083 = vmatmul.mubr.msk.bf16.gmra.mxu0 %vm937_vm7, %v902_v15  ;;  %6124 = vmatprep.mubr.msk.bf16.mxu1 %vm937_vm7, %v902_v15 }
  0xb7   : > { %v725_v18 = vpop.permute.xlu0 %724  ;;  %v840_v19 = vpop.permute.xlu1 %839 }
  0xb8   : > { %v871_v44 = vsel %vm853_vm5, %v6883_v16, %v725_v18  ;;  %v906_v23 = vsel %vm886_vm6, %v873_v5, %v840_v19 }
  0xbb   : > { %v838_v20 = vpop.permute.xlu0 %837  ;;  %v731_v21 = vpop.permute.xlu1 %730 }
  0xbc   : > { %v904_v22 = vsel %vm886_vm6, %v871_v44, %v838_v20  ;;  %v877_v36 = vsel %vm853_vm5, %v6899_v31, %v731_v21 }
  0xbd   : > { %6086 = vmatprep.mubr.msk.bf16.mxu0 %vm937_vm7, %v904_v22  ;;  %6125 = vmatmul.mubr.msk.bf16.gmra.mxu1 %vm937_vm7, %v904_v22 }
  0xbe   : > { %6087 = vmatmul.mubr.msk.bf16.gmra.mxu0 %vm937_vm7, %v906_v23  ;;  %6128 = vmatprep.mubr.msk.bf16.mxu1 %vm937_vm7, %v906_v23 }
  0xbf   : > { %v729_v24 = vpop.permute.xlu0 %728  ;;  %v844_v25 = vpop.permute.xlu1 %843 }
  0xc0   : > { %v875_v16 = vsel %vm853_vm5, %v6912_v1, %v729_v24  ;;  %v910_v29 = vsel %vm886_vm6, %v877_v36, %v844_v25 }
  0xc3   : > { %v842_v26 = vpop.permute.xlu0 %841  ;;  %v735_v27 = vpop.permute.xlu1 %734 }
  0xc4   : > { %v908_v28 = vsel %vm886_vm6, %v875_v16, %v842_v26  ;;  %v881_v31 = vsel %vm853_vm5, %v6923_v14, %v735_v27  ;;  %v6556_v26 = vld [vmem:[%s9612_s3 + $0x28] sm:$0xff]  }
  0xc5   : > { %6090 = vmatprep.mubr.msk.bf16.mxu0 %vm937_vm7, %v908_v28  ;;  %6129 = vmatmul.mubr.msk.bf16.gmra.mxu1 %vm937_vm7, %v908_v28 }
  0xc6   : > { %6091 = vmatmul.mubr.msk.bf16.gmra.mxu0 %vm937_vm7, %v910_v29  ;;  %6132 = vmatprep.mubr.msk.bf16.mxu1 %vm937_vm7, %v910_v29 }
  0xc7   : > { %v733_v30 = vpop.permute.xlu0 %732  ;;  %v848_v33 = vpop.permute.xlu1 %847  ;;  %6178 = vmatprep.subr.bf16.mxu1 %v6556_v26 }
  0xc8   : > { %v879_v1 = vsel %vm853_vm5, %v6941_v39, %v733_v30  ;;  %v914_v38 = vsel %vm886_vm6, %v881_v31, %v848_v33  ;;  %6179 = vmatpush3.bf16.msra.mxu1 %v6556_v26  ;;  %v6557_v31 = vld [vmem:[%s9612_s3 + $0x20] sm:$0xff]  }
  0xc9   : > { %6180 = vmatprep.subr.bf16.mxu1 %v6557_v31 }
  0xcb   : > { %v846_v34 = vpop.permute.xlu0 %845 }
  0xcc   : > { %v912_v37 = vsel %vm886_vm6, %v879_v1, %v846_v34  ;;  %v739_v41 = vpop.permute.xlu1 %738  ;;  %v6558_v1 = vld [vmem:[%s9612_s3 + $0x18] sm:$0xff]   ;;  %v6559_v34 = vld [vmem:[%s9612_s3 + $0x10] sm:$0xff]   ;;  %6181 = vmatpush3.bf16.msra.mxu1 %v6557_v31 }
  0xcd   : > { %6094 = vmatprep.mubr.msk.bf16.mxu0 %vm937_vm7, %v912_v37  ;;  %6133 = vmatmul.mubr.msk.bf16.gmra.mxu1 %vm937_vm7, %v912_v37  ;;  %v885_v14 = vsel %vm853_vm5, %v6956_v6, %v739_v41 }
  0xce   : > { %6095 = vmatmul.mubr.msk.bf16.gmra.mxu0 %vm937_vm7, %v914_v38  ;;  %6136 = vmatprep.mubr.msk.bf16.mxu1 %vm937_vm7, %v914_v38 }
  0xcf   : > { %v737_v40 = vpop.permute.xlu0 %736  ;;  %6216 = vmatprep.subr.bf16.mxu0 %v6559_v34  ;;  %6182 = vmatprep.subr.bf16.mxu1 %v6558_v1 }
  0xd0   : > { %v852_v42 = vpop.permute.xlu1 %851  ;;  %v883_v39 = vsel %vm853_vm5, %v6968_v17, %v737_v40  ;;  %6183 = vmatpush3.bf16.msra.mxu1 %v6558_v1 }
  0xd1   : > { %v918_v35 = vsel %vm886_vm6, %v885_v14, %v852_v42 }
  0xd3   : > { %v850_v43 = vpop.permute.xlu0 %849 }
  0xd4   : > { %v916_v46 = vsel %vm886_vm6, %v883_v39, %v850_v43 }
  0xd5   : > { %6098 = vmatprep.mubr.msk.bf16.mxu0 %vm937_vm7, %v916_v46  ;;  %6137 = vmatmul.mubr.msk.bf16.gmra.mxu1 %vm937_vm7, %v916_v46 }
  0xd6   : > { %6099 = vmatmul.mubr.msk.bf16.gmra.mxu0 %vm937_vm7, %v918_v35 }
  0xd7   : > { %6146 = vmatprep.mubr.msk.bf16.mxu0 %vm937_vm7, %v6994_v51 }
  0xde   : > { %6147 = vmatmul.mubr.msk.bf16.vlgmr.msra.gmra.mxu0 %vm937_vm7, %v7009_v58 }
  0xdf   : > { %6150 = vmatprep.mubr.msk.bf16.mxu0 %vm937_vm7, %v7012_v7  ;;  %6217 = vmatpush3.bf16.msra.mxu0 %v6559_v34 }
  0xe6   : > { %6151 = vmatmul.mubr.msk.bf16.gmra.mxu0 %vm937_vm7, %v7027_v2 }
  0xe7   : > { %6154 = vmatprep.mubr.msk.bf16.mxu0 %vm937_vm7, %v7030_v3 }
  0xee   : > { %6155 = vmatmul.mubr.msk.bf16.gmra.mxu0 %vm937_vm7, %v900_v12 }
  0xef   : > { %6158 = vmatprep.mubr.msk.bf16.mxu0 %vm937_vm7, %v902_v15 }
  0xf6   : > { %6159 = vmatmul.mubr.msk.bf16.gmra.mxu0 %vm937_vm7, %v904_v22 }
  0xf7   : > { %6162 = vmatprep.mubr.msk.bf16.mxu0 %vm937_vm7, %v906_v23 }
  0xfe   : > { %6163 = vmatmul.mubr.msk.bf16.gmra.mxu0 %vm937_vm7, %v908_v28 }
  0xff   : > { %6166 = vmatprep.mubr.msk.bf16.mxu0 %vm937_vm7, %v910_v29 }
 0x106   : > { %6167 = vmatmul.mubr.msk.bf16.gmra.mxu0 %vm937_vm7, %v912_v37  ;;  %v6560_v37 = vld [vmem:[%s9612_s3 + $0x8] sm:$0xff]  }
 0x107   : > { %6170 = vmatprep.mubr.msk.bf16.mxu0 %vm937_vm7, %v914_v38  ;;  %6218 = vmatprep.subr.bf16.mxu0 %v6560_v37 }
 0x108   : > { %6219 = vmatpush3.bf16.msra.mxu0 %v6560_v37  ;;  %v7245_v37 = vld [vmem:[%s9611_s2] ss:$0 sm:$0xff] }
 0x10e   : > { %6171 = vmatmul.mubr.msk.bf16.gmra.mxu0 %vm937_vm7, %v916_v46 }
 0x10f   : > { %6174 = vmatprep.mubr.msk.bf16.mxu0 %vm937_vm7, %v918_v35 }
 0x116   : > { %6175 = vmatmul.mubr.bf16.gmra.mxu0 %v9615_v60 }
 0x117   : > { %6222 = vmatprep.mubr.bf16.mxu0 %v9615_v60 }
 0x157   : > { %v7111_v6 = vpop.f32.mrf.mxu1 }
 0x159   : > { %v7113_v17 = vpop.f32.mrf.mxu1 }
 0x15b   : > { %v7115_v47 = vpop.f32.mrf.mxu0  ;;  %v7117_v48 = vpop.f32.mrf.mxu1 }
 0x15c   : > { %v1195_v31 = vadd.f32 %v7111_v6, %v7115_v47 }
 0x15d   : > { %v7119_v49 = vpop.f32.mrf.mxu0  ;;  %v7123_v45 = vpop.f32.mrf.mxu1 }
 0x15e   : > { %v1187_v32 = vadd.f32 %v7113_v17, %v7119_v49 }
 0x15f   : > { %v7121_v51 = vpop.f32.mrf.mxu0 }
 0x161   : > { %v7125_v52 = vpop.f32.mrf.mxu0 }
 0x162   : > { %v7127_v53 = vpop.f32.mrf.mxu1 }
 0x163   : > { %v7129_v54 = vpop.f32.mrf.mxu0 }
 0x164   : > { %v7131_v56 = vpop.f32.mrf.mxu1 }
 0x165   : > { %v7133_v57 = vpop.f32.mrf.mxu0 }
 0x166   : > { %v7135_v58 = vpop.f32.mrf.mxu1 }
 0x167   : > { %v7137_v7 = vpop.f32.mrf.mxu0 }
 0x168   : > { %v7139_v61 = vpop.f32.mrf.mxu1 }
 0x169   : > { %v7141_v55 = vpop.f32.mrf.mxu0 }
 0x16b   : > { %v7143_v13 = vpop.f32.mrf.mxu1 }
 0x16c   : > { %v7145_v62 = vpop.f32.mrf.mxu0 }
 0x16d   : > { %v7147_v63 = vpop.f32.mrf.mxu1 }
 0x16e   : > { %v7149_v0 = vpop.f32.mrf.mxu0 }
 0x16f   : > { %v7151_v2 = vpop.f32.mrf.mxu1 }
 0x170   : > { %v7153_v3 = vpop.f32.mrf.mxu0 }
 0x171   : > { %v7155_v4 = vpop.f32.mrf.mxu1 }
 0x172   : > { %v7157_v50 = vpop.f32.mrf.mxu0 }
 0x175   : > { %v7159_v59 = vpop.f32.mrf.mxu1 }
 0x176   : > { %v7161_v8 = vpop.f32.mrf.mxu0 }
 0x177   : > { %v7163_v9 = vpop.f32.mrf.mxu1 }
 0x178   : > { %v7165_v10 = vpop.f32.mrf.mxu0 }
 0x179   : > { %v7167_v11 = vpop.f32.mrf.mxu1 }
 0x17a   : > { %v7169_v12 = vpop.f32.mrf.mxu0 }
 0x17b   : > { %v7171_v15 = vpop.f32.mrf.mxu1 }
 0x17c   : > { %v7173_v18 = vpop.f32.mrf.mxu0 }
 0x17d   : > { %v7175_v19 = vpop.f32.mrf.mxu1 }
 0x17e   : > { %v7177_v5 = vpop.f32.mrf.mxu0 }
 0x17f   : > { %v7179_v44 = vpop.f32.mrf.mxu1 }
 0x180   : > { %v7181_v20 = vpop.f32.mrf.mxu0 }
 0x181   : > { %v7183_v21 = vpop.f32.mrf.mxu1 }
 0x182   : > { %v7185_v22 = vpop.f32.mrf.mxu0 }
 0x183   : > { %v7187_v23 = vpop.f32.mrf.mxu1 }
 0x184   : > { %v7189_v24 = vpop.f32.mrf.mxu0 }
 0x185   : > { %v7191_v25 = vpop.f32.mrf.mxu1 }
 0x186   : > { %v7193_v36 = vpop.f32.mrf.mxu0 }
 0x187   : > { %v7200_v27 = vpop.f32.mrf.mxu1 }
 0x188   : > { %v7195_v16 = vpop.f32.mrf.mxu0 }
 0x189   : > { %v7206_v30 = vpop.f32.mrf.mxu1 }
 0x18a   : > { %v7202_v28 = vpop.f32.mrf.mxu0 }
 0x18b   : > { %v7224_v41 = vpop.f32.mrf.mxu1 }
 0x18c   : > { %v7204_v29 = vpop.f32.mrf.mxu0 }
 0x18d   : > { %v6134_v42 = vpop.f32.mrf.mxu1 }
 0x18e   : > { %v7208_v33 = vpop.f32.mrf.mxu0 }
 0x18f   : > { %v1282_v46 = vpop.f32.mrf.mxu1 }
 0x190   : > { %v7222_v38 = vpop.f32.mrf.mxu0 }
 0x191   : > { %v6135_v34 = vpop.f32.mrf.mxu1 }
 0x192   : > { %v7226_v40 = vpop.f32.mrf.mxu0 }
 0x193   : > { %v1285_v6 = vpop.f32.mrf.mxu1 }
 0x194   : > { %v7228_v14 = vpop.f32.mrf.mxu0 }
 0x195   : > { %9658 = vst [vmem:[#allocation3_spill] sm:$0xff] %v7228_v14  ;;  %v1211_v14 = vadd.f32 %v7127_v53, %v7129_v54 }
 0x196   : > { %v7230_v39 = vpop.f32.mrf.mxu0 }
 0x197   : > { %9659 = vst [vmem:[#allocation4_spill] sm:$0xff] %v7230_v39 }
 0x198   : > { %v7232_v43 = vpop.f32.mrf.mxu0 }
 0x199   : > { %9660 = vst [vmem:[#allocation5_spill] sm:$0xff] %v7232_v43 }
 0x19a   : > { %v7234_v35 = vpop.f32.mrf.mxu0 }
 0x19b   : > { %9661 = vst [vmem:[#allocation6_spill] sm:$0xff] %v7234_v35  ;;  %v1198_v35 = vadd.f32 %v7117_v48, %v7121_v51  ;;  %v1227_v48 = vadd.f32 %v7143_v13, %v7145_v62  ;;  %v7264_v51 = vadd.f32 %v7147_v63, %v7149_v0  ;;  %v7290_v62 = vadd.f32 %v7171_v15, %v7173_v18 }
 0x19c   : > { %v7236_v26 = vpop.f32.mrf.mxu0  ;;  %v7307_v15 = vadd.f32 %v7187_v23, %v7189_v24  ;;  %v7311_v18 = vadd.f32 %v7191_v25, %v7193_v36  ;;  %v7329_v25 = vadd.f32 %v1282_v46, %v7222_v38 }
 0x19d   : > { %9662 = vst [vmem:[#allocation7_spill] sm:$0xff] %v7236_v26  ;;  %v1190_v26 = vadd.f32 %v7123_v45, %v7125_v52  ;;  %v7268_v52 = vadd.f32 %v7151_v2, %v7153_v3  ;;  %v7295_v3 = vadd.f32 %v7175_v19, %v7177_v5  ;;  %v7315_v19 = vadd.f32 %v7200_v27, %v7195_v16 }
 0x19e   : > { %v6148_v60 = vpop.f32.mrf.mxu0  ;;  %v7319_v5 = vadd.f32 %v7206_v30, %v7202_v28 }
 0x19f   : > { %v1494_v1 = vadd.f32 %v6148_v60, %v1195_v31  ;;  %v1203_v60 = vadd.f32 %v7131_v56, %v7133_v57  ;;  %v1214_v31 = vadd.f32 %v7135_v58, %v7137_v7  ;;  %v7274_v57 = vadd.f32 %v7155_v4, %v7157_v50 }
 0x1a0   : > { %v1365_v43 = vpop.f32.mrf.mxu0  ;;  %v7278_v58 = vadd.f32 %v7159_v59, %v7161_v8  ;;  %v7282_v7 = vadd.f32 %v7163_v9, %v7165_v10  ;;  %v7299_v4 = vadd.f32 %v7179_v44, %v7181_v20  ;;  %v7303_v50 = vadd.f32 %v7183_v21, %v7185_v22 }
 0x1a1   : > { %v1492_v39 = vadd.f32 %v1365_v43, %v1187_v32  ;;  %v1531_v17 = vadd.f32 %v7245_v37, %v1494_v1  ;;  %v1206_v32 = vadd.f32 %v7139_v61, %v7141_v55  ;;  %v7286_v61 = vadd.f32 %v7167_v11, %v7169_v12  ;;  %v6138_v55 = vpop.f32.mrf.mxu1  ;;  %v9665_v1 = vld [vmem:[#allocation5_spill] sm:$0xff] }
 0x1a2   : > { %v6149_v47 = vpop.f32.mrf.mxu0  ;;  %v7323_v21 = vadd.f32 %v7224_v41, %v7204_v29  ;;  %v7326_v22 = vadd.f32 %v6134_v42, %v7208_v33  ;;  %v7334_v29 = vadd.f32 %v6135_v34, %v7226_v40  ;;  %v9663_v33 = vld [vmem:[#allocation3_spill] sm:$0xff]  ;;  %v9664_v42 = vld [vmem:[#allocation4_spill] sm:$0xff] }
 0x1a3   : > { %v1495_v49 = vadd.f32 %v6149_v47, %v1198_v35  ;;  %v1529_v53 = vadd.f32 %v7245_v37, %v1492_v39  ;;  %v1563_v63 = vmax.f32 %v1531_v17, 0.0  ;;  %v1298_v44 = vpop.f32.mrf.mxu1  ;;  %v7337_v41 = vadd.f32 %v1285_v6, %v9663_v33 }
 0x1a4   : > { %v1368_v45 = vpop.f32.mrf.mxu0  ;;  %v7340_v35 = vadd.f32 %v6138_v55, %v9664_v42  ;;  %v7344_v47 = vadd.f32 %v1298_v44, %v9665_v1 }
 0x1a5   : > { %v1532_v54 = vadd.f32 %v7245_v37, %v1495_v49  ;;  %v1493_v56 = vadd.f32 %v1368_v45, %v1190_v26  ;;  %v1561_v9 = vmax.f32 %v1529_v53, 0.0  ;;  %v6139_v38 = vpop.f32.mrf.mxu1  ;;  %v9667_v53 = vld [vmem:[#allocation6_spill] sm:$0xff] }
 0x1a6   : > { %v6152_v13 = vpop.f32.mrf.mxu0 }
 0x1a7   : > { %v1564_v0 = vmax.f32 %v1532_v54, 0.0  ;;  %v1530_v2 = vadd.f32 %v7245_v37, %v1493_v56  ;;  %v1498_v59 = vadd.f32 %v6152_v13, %v1211_v14  ;;  %v7352_v54 = vadd.f32 %v6139_v38, %v9667_v53 }
 0x1a8   : > { %v1381_v8 = vpop.f32.mrf.mxu0 }
 0x1a9   : > { %v1594_v10 = vpack.c.bf16 %v1564_v0, %v1563_v63  ;;  %v1562_v11 = vmax.f32 %v1530_v2, 0.0  ;;  %v1496_v12 = vadd.f32 %v1381_v8, %v1203_v60  ;;  %v1535_v16 = vadd.f32 %v7245_v37, %v1498_v59  ;;  %v1301_v63 = vpop.f32.mrf.mxu1 }
 0x1aa   : > { %v6153_v20 = vpop.f32.mrf.mxu0 }
 0x1ab   : > { %v1635_v23 = vshrl.u32 %v1594_v10, 16  ;;  %v1593_v24 = vpack.c.bf16 %v1562_v11, %v1561_v9  ;;  %v1638_v36 = vshll.u32 %v1594_v10, 16  ;;  %v1499_v27 = vadd.f32 %v6153_v20, %v1214_v31 }
 0x1ac   : > { %v1384_v28 = vpop.f32.mrf.mxu0  ;;  %v1533_v39 = vadd.f32 %v7245_v37, %v1496_v12  ;;  %v1567_v40 = vmax.f32 %v1535_v16, 0.0 }
 0x1ad   : > { %v1637_v30 = vrot.slane %v1635_v23, 7  ;;  %v1628_v14 = vshrl.u32 %v1593_v24, 16  ;;  %v1497_v43 = vadd.f32 %v1384_v28, %v1206_v32  ;;  %v1536_v46 = vadd.f32 %v7245_v37, %v1499_v27 }
 0x1ae   : > { %v6156_v26 = vpop.f32.mrf.mxu0  ;;  %v1565_v55 = vmax.f32 %v1533_v39, 0.0  ;;  %v1631_v0 = vshll.u32 %v1593_v24, 16  ;;  %v9668_v24 = vld [vmem:[#allocation7_spill] sm:$0xff] }
 0x1af   : > { %v1640_v60 = vor.u32 %v1638_v36, %v1637_v30  ;;  %v1534_v17 = vadd.f32 %v7245_v37, %v1497_v43  ;;  %v1502_v49 = vadd.f32 %v6156_v26, %v1227_v48  ;;  %v1630_v31 = vrot.slane %v1628_v14, 7 }
 0x1b0   : > { %v1568_v34 = vmax.f32 %v1536_v46, 0.0  ;;  %v1397_v32 = vpop.f32.mrf.mxu0  ;;  %v7349_v45 = vsel %vm6730_vm4, %v1637_v30, 0  ;;  %v7368_v27 = vadd.f32 %v1301_v63, %v9668_v24 }
 0x1b1   : > { %v7356_v56 = vsel %vm6730_vm4, 0, %v1640_v60  ;;  %v1566_v13 = vmax.f32 %v1534_v17, 0.0  ;;  %v1500_v2 = vadd.f32 %v1397_v32, %v7264_v51  ;;  %v1539_v10 = vadd.f32 %v7245_v37, %v1502_v49  ;;  %v6561_v51 = vld [vmem:[%s9612_s3] sm:$0xff]  }
 0x1b2   : > { %v1596_v48 = vpack.c.bf16 %v1568_v34, %v1567_v40  ;;  %v6157_v59 = vpop.f32.mrf.mxu0  ;;  %v1818_v8 = vshll.u32 %v7356_v56, 16  ;;  %v1823_v12 = vshll.u32 %v7349_v45, 16  ;;  %v1633_v44 = vor.u32 %v1631_v0, %v1630_v31  ;;  %6220 = vmatprep.subr.bf16.mxu0 %v6561_v51 }
 0x1b3   : > { %v1595_v9 = vpack.c.bf16 %v1566_v13, %v1565_v55  ;;  %v1503_v11 = vadd.f32 %v6157_v59, %v7268_v52  ;;  %v1816_v36 = vshrl.u32 %v7356_v56, 16  ;;  %v1537_v28 = vadd.f32 %v7245_v37, %v1500_v2  ;;  %6221 = vmatpush3.bf16.msra.mxu0 %v6561_v51 }
 0x1b4   : > { %v1649_v20 = vshrl.u32 %v1596_v48, 16  ;;  %v1400_v23 = vpop.f32.mrf.mxu0  ;;  %v1820_v16 = vrot.slane %v1818_v8, 1  ;;  %v1825_v42 = vrot.slane %v1823_v12, 1  ;;  %v1571_v38 = vmax.f32 %v1539_v10, 0.0 }
 0x1b5   : > { %v1540_v30 = vadd.f32 %v7245_v37, %v1503_v11  ;;  %v1501_v52 = vadd.f32 %v1400_v23, %v7274_v57  ;;  %v1642_v39 = vshrl.u32 %v1595_v9, 16  ;;  %v1652_v60 = vshll.u32 %v1596_v48, 16 }
 0x1b6   : > { %v7373_v14 = vrot.slane %v1649_v20, 7  ;;  %v6160_v43 = vpop.f32.mrf.mxu0  ;;  %v1821_v33 = vor.u32 %v1820_v16, %v1816_v36  ;;  %v1645_v17 = vshll.u32 %v1595_v9, 16  ;;  %v7380_v57 = vsel %vm6730_vm4, 0, %v1633_v44 }
 0x1b7   : > { %v1572_v46 = vmax.f32 %v1540_v30, 0.0  ;;  %v1538_v26 = vadd.f32 %v7245_v37, %v1501_v52  ;;  %v1506_v1 = vadd.f32 %v6160_v43, %v7278_v58  ;;  %v1569_v34 = vmax.f32 %v1537_v28, 0.0  ;;  %v7388_v58 = vld [vmem:[%s9612_s3 + $0x40] sm:$0xff]  }
 0x1b8   : > { %v1413_v49 = vpop.f32.mrf.mxu0  ;;  %v1826_v40 = vsel %vm515_vm3, %v1821_v33, %v1825_v42  ;;  %v1787_v55 = vsel %vm6730_vm4, %v1630_v31, 0  ;;  %v1654_v13 = vor.u32 %v1652_v60, %v7373_v14  ;;  %v7391_v63 = vrot.slane %v1642_v39, 7  ;;  %6254 = vmatprep.subr.bf16.mxu1 %v7388_v58 }
 0x1b9   : > { %v1598_v32 = vpack.c.bf16 %v1572_v46, %v1571_v38  ;;  %v1570_v53 = vmax.f32 %v1538_v26, 0.0  ;;  %1997 = vrot.lane.b32.xlu1 %v1826_v40, %s6640_s16  ;;  %v1504_v0 = vadd.f32 %v1413_v49, %v7282_v7  ;;  %v1806_v2 = vshll.u32 %v7380_v57, 16 }
 0x1ba   : > { %v6161_v48 = vpop.f32.mrf.mxu0  ;;  %v1543_v9 = vadd.f32 %v7245_v37, %v1506_v1  ;;  %v1804_v31 = vshrl.u32 %v7380_v57, 16  ;;  %v1811_v44 = vshll.u32 %v1787_v55, 16  ;;  %v1647_v51 = vor.u32 %v1645_v17, %v7391_v63 }
 0x1bb   : > { %v1663_v59 = vshrl.u32 %v1598_v32, 16  ;;  %v1597_v8 = vpack.c.bf16 %v1570_v53, %v1569_v34  ;;  %v1666_v10 = vshll.u32 %v1598_v32, 16  ;;  %v1507_v11 = vadd.f32 %v6161_v48, %v7286_v61 }
 0x1bc   : > { %v1808_v12 = vrot.slane %v1806_v2, 1  ;;  %v1416_v20 = vpop.f32.mrf.mxu0  ;;  %v1541_v36 = vadd.f32 %v7245_v37, %v1504_v0  ;;  %v1813_v30 = vrot.slane %v1811_v44, 1  ;;  %v1575_v61 = vmax.f32 %v1543_v9, 0.0 }
 0x1bd   : > { %v7399_v23 = vrot.slane %v1663_v59, 7  ;;  %v1656_v7 = vshrl.u32 %v1597_v8, 16  ;;  %v1505_v16 = vadd.f32 %v1416_v20, %v7290_v62  ;;  %v1544_v24 = vadd.f32 %v7245_v37, %v1507_v11 }
 0x1be   : > { %v1809_v28 = vor.u32 %v1808_v12, %v1804_v31  ;;  %v6164_v52 = vpop.f32.mrf.mxu0  ;;  %v2062_v33 = vrot.slane %v7356_v56, 1  ;;  %v2063_v46 = vrot.slane %v7349_v45, 1  ;;  %v1573_v60 = vmax.f32 %v1541_v36, 0.0 }
 0x1bf   : > { %v1668_v39 = vor.u32 %v1666_v10, %v7399_v23  ;;  %v1542_v43 = vadd.f32 %v7245_v37, %v1505_v16  ;;  %v1576_v42 = vmax.f32 %v1544_v24, 0.0  ;;  %v1510_v62 = vadd.f32 %v6164_v52, %v7295_v3 }
 0x1c0   : > { %v1814_v38 = vsel %vm515_vm3, %v1809_v28, %v1813_v30  ;;  %v1429_v26 = vpop.f32.mrf.mxu0  ;;  %v7411_v1 = vrot.slane %v1656_v7, 7  ;;  %v2059_v49 = vrot.slane %v7380_v57, 1  ;;  %v7417_v40 = vsel %vm6730_vm4, 0, %v1654_v13 }
 0x1c1   : > { %1995 = vrot.lane.b32.xlu0 %v1814_v38, %s6640_s16  ;;  %v1574_v17 = vmax.f32 %v1542_v43, 0.0  ;;  %v1600_v34 = vpack.c.bf16 %v1576_v42, %v1575_v61  ;;  %v2064_v32 = vsel %vm772_vm2, %v2062_v33, %v2063_v46  ;;  %v2060_v53 = vrot.slane %v1787_v55, 1 }
 0x1c2   : > { %v6165_v45 = vpop.f32.mrf.mxu0  ;;  %v1659_v0 = vshll.u32 %v1597_v8, 16  ;;  %2109 = vrot.lane.b32.xlu1 %v2064_v32, %s6639_s13  ;;  %v1508_v48 = vadd.f32 %v1429_v26, %v7299_v4  ;;  %v1790_v2 = vsel %vm6730_vm4, %v7373_v14, 0  ;;  %v7427_v59 = vsel %vm6730_vm4, 0, %v1668_v39 }
 0x1c3   : > { %v1599_v3 = vpack.c.bf16 %v1574_v17, %v1573_v60  ;;  %v1677_v13 = vshrl.u32 %v1600_v34, 16  ;;  %v1547_v9 = vadd.f32 %v7245_v37, %v1510_v62  ;;  %v2061_v55 = vsel %vm772_vm2, %v2059_v49, %v2060_v53 }
 0x1c4   : > { %v1432_v31 = vpop.f32.mrf.mxu0  ;;  %v7432_v8 = vor.u32 %v1659_v0, %v7411_v1  ;;  %v1545_v4 = vadd.f32 %v7245_v37, %v1508_v48  ;;  %v1842_v14 = vshll.u32 %v7417_v40, 16  ;;  %v1847_v12 = vshll.u32 %v1790_v2, 16 }
 0x1c5   : > { %v1670_v10 = vshrl.u32 %v1599_v3, 16  ;;  %2107 = vrot.lane.b32.xlu0 %v2061_v55, %s6639_s13  ;;  %v7437_v11 = vrot.slane %v1677_v13, 7  ;;  %v1511_v44 = vadd.f32 %v6165_v45, %v7303_v50  ;;  %v7442_v20 = vsel %vm6730_vm4, 0, %v1647_v51 }
 0x1c6   : > { %v6168_v7 = vpop.f32.mrf.mxu0  ;;  %v1680_v36 = vshll.u32 %v1600_v34, 16  ;;  %v1840_v16 = vshrl.u32 %v7417_v40, 16  ;;  %v1844_v24 = vrot.slane %v1842_v14, 1  ;;  %v1789_v28 = vsel %vm6730_vm4, %v7391_v63, 0 }
 0x1c7   : > { %v7448_v30 = vrot.slane %v1670_v10, 7  ;;  %v1673_v52 = vshll.u32 %v1599_v3, 16  ;;  %v1579_v39 = vmax.f32 %v1547_v9, 0.0  ;;  %v1548_v61 = vadd.f32 %v7245_v37, %v1511_v44 }
 0x1c8   : > { %v1445_v50 = vpop.f32.mrf.mxu0  ;;  %v1845_v43 = vor.u32 %v1844_v24, %v1840_v16  ;;  %v1849_v33 = vrot.slane %v1847_v12, 1  ;;  %v1830_v51 = vshll.u32 %v7442_v20, 16  ;;  %v1835_v42 = vshll.u32 %v1789_v28, 16 }
 0x1c9   : > { %v1682_v38 = vor.u32 %v1680_v36, %v7437_v11  ;;  %v1577_v46 = vmax.f32 %v1545_v4, 0.0  ;;  %v1580_v62 = vmax.f32 %v1548_v61, 0.0  ;;  %v1509_v26 = vadd.f32 %v1432_v31, %v7307_v15 }
 0x1ca   : > { %v6169_v60 = vpop.f32.mrf.mxu0  ;;  %v1850_v63 = vsel %vm515_vm3, %v1845_v43, %v1849_v33  ;;  %v1828_v17 = vshrl.u32 %v7442_v20, 16  ;;  %v1832_v49 = vrot.slane %v1830_v51, 1  ;;  %v2068_v34 = vrot.slane %v7417_v40, 1 }
 0x1cb   : > { %v7458_v32 = vor.u32 %v1673_v52, %v7448_v30  ;;  %2001 = vrot.lane.b32.xlu1 %v1850_v63, %s6640_s16  ;;  %v1602_v53 = vpack.c.bf16 %v1580_v62, %v1579_v39  ;;  %v1546_v45 = vadd.f32 %v7245_v37, %v1509_v26  ;;  %v1514_v0 = vadd.f32 %v6168_v7, %v7311_v18 }
 0x1cc   : > { %v1448_v3 = vpop.f32.mrf.mxu0  ;;  %v1833_v15 = vor.u32 %v1832_v49, %v1828_v17  ;;  %v1837_v48 = vrot.slane %v1835_v42, 1  ;;  %v2069_v13 = vrot.slane %v1790_v2, 1  ;;  %v1512_v9 = vadd.f32 %v1445_v50, %v7315_v19 }
 0x1cd   : > { %v1691_v55 = vshrl.u32 %v1602_v53, 16  ;;  %v1578_v31 = vmax.f32 %v1546_v45, 0.0  ;;  %v1551_v10 = vadd.f32 %v7245_v37, %v1514_v0  ;;  %v2065_v4 = vrot.slane %v7442_v20, 1 }
 0x1ce   : > { %v6172_v14 = vpop.f32.mrf.mxu0  ;;  %v1838_v12 = vsel %vm515_vm3, %v1833_v15, %v1837_v48  ;;  %v2070_v44 = vsel %vm772_vm2, %v2068_v34, %v2069_v13  ;;  %v1549_v36 = vadd.f32 %v7245_v37, %v1512_v9  ;;  %v1792_v18 = vsel %vm6730_vm4, %v7399_v23, 0 }
 0x1cf   : > { %v7474_v19 = vsel %vm6730_vm4, 0, %v1682_v38  ;;  %v7476_v2 = vrot.slane %v1691_v55, 7  ;;  %1999 = vrot.lane.b32.xlu0 %v1838_v12, %s6640_s16  ;;  %v1601_v7 = vpack.c.bf16 %v1578_v31, %v1577_v46  ;;  %2113 = vrot.lane.b32.xlu1 %v2070_v44, %s6639_s13  ;;  %v2066_v16 = vrot.slane %v1789_v28, 1 }
 0x1d0   : > { %v1694_v24 = vshll.u32 %v1602_v53, 16  ;;  %v1866_v52 = vshll.u32 %v7427_v59, 16  ;;  %v1871_v39 = vshll.u32 %v1792_v18, 16  ;;  %v1515_v61 = vadd.f32 %v6169_v60, %v7319_v5  ;;  %v1461_v50 = vpop.f32.mrf.mxu0 }
 0x1d1   : > { %v1583_v23 = vmax.f32 %v1551_v10, 0.0  ;;  %v2067_v43 = vsel %vm772_vm2, %v2065_v4, %v2066_v16  ;;  %v1864_v33 = vshrl.u32 %v7427_v59, 16  ;;  %v7487_v51 = vsel %vm6730_vm4, 0, %v7432_v8 }
 0x1d2   : > { %v1581_v42 = vmax.f32 %v1549_v36, 0.0  ;;  %v1868_v38 = vrot.slane %v1866_v52, 1  ;;  %v1552_v28 = vadd.f32 %v7245_v37, %v1515_v61  ;;  %v1791_v46 = vsel %vm6730_vm4, %v7411_v1, 0  ;;  %v6173_v34 = vpop.f32.mrf.mxu0 }
 0x1d3   : > { %v1696_v5 = vor.u32 %v1694_v24, %v7476_v2  ;;  %v1684_v62 = vshrl.u32 %v1601_v7, 16  ;;  %2111 = vrot.lane.b32.xlu0 %v2067_v43, %s6639_s13  ;;  %v1873_v26 = vrot.slane %v1871_v39, 1  ;;  %v1854_v60 = vshll.u32 %v7487_v51, 16 }
 0x1d4   : > { %v1869_v63 = vor.u32 %v1868_v38, %v1864_v33  ;;  %v1584_v17 = vmax.f32 %v1552_v28, 0.0  ;;  %v1859_v8 = vshll.u32 %v1791_v46, 16  ;;  %v1513_v49 = vadd.f32 %v1448_v3, %v7323_v21  ;;  %v1464_v36 = vpop.f32.mrf.mxu0 }
 0x1d5   : > { %v1687_v53 = vshll.u32 %v1601_v7, 16  ;;  %v1852_v45 = vshrl.u32 %v7487_v51, 16  ;;  %v1856_v0 = vrot.slane %v1854_v60, 1  ;;  %v2074_v1 = vrot.slane %v7427_v59, 1 }
 0x1d6   : > { %v1874_v15 = vsel %vm515_vm3, %v1869_v63, %v1873_v26  ;;  %v1604_v48 = vpack.c.bf16 %v1584_v17, %v1583_v23  ;;  %v1550_v13 = vadd.f32 %v7245_v37, %v1513_v49  ;;  %v2075_v9 = vrot.slane %v1792_v18, 1  ;;  %v6176_v38 = vpop.f32.mrf.mxu0 }
 0x1d7   : > { %v7501_v55 = vrot.slane %v1684_v62, 7  ;;  %2005 = vrot.lane.b32.xlu1 %v1874_v15, %s6640_s16  ;;  %v1857_v31 = vor.u32 %v1856_v0, %v1852_v45  ;;  %v1861_v10 = vrot.slane %v1859_v8, 1  ;;  %v1518_v21 = vadd.f32 %v6172_v14, %v7326_v22 }
 0x1d8   : > { %v1705_v3 = vshrl.u32 %v1604_v48, 16  ;;  %v1582_v4 = vmax.f32 %v1550_v13, 0.0  ;;  %v2076_v12 = vsel %vm772_vm2, %v2074_v1, %v2075_v9  ;;  %v2071_v44 = vrot.slane %v7487_v51, 1  ;;  %v1477_v1 = vpop.f32.mrf.mxu0 }
 0x1d9   : > { %v1862_v7 = vsel %vm515_vm3, %v1857_v31, %v1861_v10  ;;  %v1555_v16 = vadd.f32 %v7245_v37, %v1518_v21  ;;  %v1516_v18 = vadd.f32 %v1461_v50, %v7329_v25  ;;  %v1794_v24 = vsel %vm6730_vm4, %v7437_v11, 0 }
 0x1da   : > { %v7513_v52 = vrot.slane %v1705_v3, 7  ;;  %v1708_v22 = vshll.u32 %v1604_v48, 16  ;;  %2003 = vrot.lane.b32.xlu0 %v1862_v7, %s6640_s16  ;;  %v1603_v14 = vpack.c.bf16 %v1582_v4, %v1581_v42  ;;  %v2072_v39 = vrot.slane %v1791_v46, 1 }
 0x1db   : > { %v7518_v61 = vsel %vm6730_vm4, 0, %v1696_v5  ;;  %v1689_v23 = vor.u32 %v1687_v53, %v7501_v55  ;;  %2117 = vrot.lane.b32.xlu1 %v2076_v12, %s6639_s13  ;;  %v1890_v25 = vshll.u32 %v7474_v19, 16  ;;  %v1895_v50 = vshll.u32 %v1794_v24, 16 }
 0x1dc   : > { %v1710_v11 = vor.u32 %v1708_v22, %v7513_v52  ;;  %v2073_v43 = vsel %vm772_vm2, %v2071_v44, %v2072_v39  ;;  %v1553_v33 = vadd.f32 %v7245_v37, %v1516_v18  ;;  %v1519_v42 = vadd.f32 %v6173_v34, %v7334_v29  ;;  %v6177_v18 = vpop.f32.mrf.mxu0 }
 0x1dd   : > { %v1587_v28 = vmax.f32 %v1555_v16, 0.0  ;;  %v1888_v46 = vshrl.u32 %v7474_v19, 16  ;;  %v1892_v5 = vrot.slane %v1890_v25, 1  ;;  %v7531_v62 = vsel %vm6730_vm4, 0, %v7458_v32 }
 0x1de   : > { %v1698_v26 = vshrl.u32 %v1603_v14, 16  ;;  %v1701_v60 = vshll.u32 %v1603_v14, 16  ;;  %2115 = vrot.lane.b32.xlu0 %v2073_v43, %s6639_s13  ;;  %v1556_v63 = vadd.f32 %v7245_v37, %v1519_v42  ;;  %v1793_v29 = vsel %vm6730_vm4, %v7448_v30, 0 }
 0x1df   : > { %v1893_v17 = vor.u32 %v1892_v5, %v1888_v46  ;;  %v1897_v8 = vrot.slane %v1895_v50, 1  ;;  %v1878_v49 = vshll.u32 %v7531_v62, 16  ;;  %v1883_v34 = vshll.u32 %v1793_v29, 16  ;;  %v1480_v5 = vpop.f32.mrf.mxu0 }
 0x1e0   : > { %v7541_v53 = vsel %vm6730_vm4, 0, %v1710_v11  ;;  %v1585_v32 = vmax.f32 %v1553_v33, 0.0  ;;  %v1588_v45 = vmax.f32 %v1556_v63, 0.0  ;;  %v1517_v0 = vadd.f32 %v1464_v36, %v7337_v41 }
 0x1e1   : > { %v1898_v15 = vsel %vm515_vm3, %v1893_v17, %v1897_v8  ;;  %v1876_v48 = vshrl.u32 %v7531_v62, 16  ;;  %v1880_v13 = vrot.slane %v1878_v49, 1  ;;  %v2080_v30 = vrot.slane %v7474_v19, 1 }
 0x1e2   : > { %v7547_v9 = vrot.slane %v1698_v26, 7  ;;  %2009 = vrot.lane.b32.xlu1 %v1898_v15, %s6640_s16  ;;  %v1606_v31 = vpack.c.bf16 %v1588_v45, %v1587_v28  ;;  %v1554_v10 = vadd.f32 %v7245_v37, %v1517_v0  ;;  %v1522_v21 = vadd.f32 %v6176_v38, %v7340_v35 }
 0x1e3   : > { %v1881_v3 = vor.u32 %v1880_v13, %v1876_v48  ;;  %v1885_v4 = vrot.slane %v1883_v34, 1  ;;  %v2081_v41 = vrot.slane %v1794_v24, 1  ;;  %v1520_v12 = vadd.f32 %v1477_v1, %v7344_v47 }
 0x1e4   : > { %v1719_v44 = vshrl.u32 %v1606_v31, 16  ;;  %v1586_v36 = vmax.f32 %v1554_v10, 0.0  ;;  %v1559_v7 = vadd.f32 %v7245_v37, %v1522_v21  ;;  %v2077_v16 = vrot.slane %v7531_v62, 1 }
 0x1e5   : > { %v1886_v22 = vsel %vm515_vm3, %v1881_v3, %v1885_v4  ;;  %v2082_v14 = vsel %vm772_vm2, %v2080_v30, %v2081_v41  ;;  %v1557_v39 = vadd.f32 %v7245_v37, %v1520_v12  ;;  %v1796_v35 = vsel %vm6730_vm4, %v7476_v2, 0 }
 0x1e6   : > { %v1703_v24 = vor.u32 %v1701_v60, %v7547_v9  ;;  %v7562_v47 = vrot.slane %v1719_v44, 7  ;;  %2007 = vrot.lane.b32.xlu0 %v1886_v22, %s6640_s16  ;;  %v7565_v25 = vpack.c.bf16 %v1586_v36, %v1585_v32  ;;  %2121 = vrot.lane.b32.xlu1 %v2082_v14, %s6639_s13  ;;  %v2078_v50 = vrot.slane %v1793_v29, 1 }
 0x1e7   : > { %v1722_v11 = vshll.u32 %v1606_v31, 16  ;;  %v1914_v43 = vshll.u32 %v7518_v61, 16  ;;  %v1919_v33 = vshll.u32 %v1796_v35, 16  ;;  %v1523_v42 = vadd.f32 %v6177_v18, %v7352_v54 }
 0x1e8   : > { %v1591_v38 = vmax.f32 %v1559_v7, 0.0  ;;  %v2079_v2 = vsel %vm772_vm2, %v2077_v16, %v2078_v50  ;;  %v1912_v28 = vshrl.u32 %v7518_v61, 16  ;;  %v7574_v46 = vsel %vm6730_vm4, 0, %v1689_v23 }
 0x1e9   : > { %v1589_v26 = vmax.f32 %v1557_v39, 0.0  ;;  %v1916_v60 = vrot.slane %v1914_v43, 1  ;;  %v1560_v63 = vadd.f32 %v7245_v37, %v1523_v42  ;;  %v1795_v29 = vsel %vm6730_vm4, %v7501_v55, 0 }
 0x1ea   : > { %v1724_v54 = vor.u32 %v1722_v11, %v7562_v47  ;;  %v1712_v17 = vshrl.u32 %v7565_v25, 16  ;;  %2119 = vrot.lane.b32.xlu0 %v2079_v2, %s6639_s13  ;;  %v1921_v8 = vrot.slane %v1919_v33, 1  ;;  %v1902_v49 = vshll.u32 %v7574_v46, 16 }
 0x1eb   : > { %v1917_v23 = vor.u32 %v1916_v60, %v1912_v28  ;;  %v1592_v34 = vmax.f32 %v1560_v63, 0.0  ;;  %v1907_v32 = vshll.u32 %v1795_v29, 16  ;;  %v1521_v45 = vadd.f32 %v1480_v5, %v7368_v27 }
 0x1ec   : > { %v1900_v0 = vshrl.u32 %v7574_v46, 16  ;;  %v1904_v1 = vrot.slane %v1902_v49, 1  ;;  %v2086_v15 = vrot.slane %v7518_v61, 1  ;;  %v2087_v55 = vrot.slane %v1796_v35, 1 }
 0x1ed   : > { %v1715_v48 = vshll.u32 %v7565_v25, 16  ;;  %v1922_v13 = vsel %vm515_vm3, %v1917_v23, %v1921_v8  ;;  %v1608_v30 = vpack.c.bf16 %v1592_v34, %v1591_v38  ;;  %v1558_v31 = vadd.f32 %v7245_v37, %v1521_v45 }
 0x1ee   : > { %v1714_v10 = vrot.slane %v1712_v17, 7  ;;  %2013 = vrot.lane.b32.xlu1 %v1922_v13, %s6640_s16  ;;  %v1905_v21 = vor.u32 %v1904_v1, %v1900_v0  ;;  %v1909_v3 = vrot.slane %v1907_v32, 1  ;;  %v2088_v27 = vsel %vm772_vm2, %v2086_v15, %v2087_v55 }
 0x1ef   : > { %v1733_v4 = vshrl.u32 %v1608_v30, 16  ;;  %v1590_v41 = vmax.f32 %v1558_v31, 0.0  ;;  %v2083_v12 = vrot.slane %v7574_v46, 1  ;;  %v1798_v44 = vsel %vm6730_vm4, %v7513_v52, 0 }
 0x1f0   : > { %v1736_v36 = vshll.u32 %v1608_v30, 16  ;;  %v1910_v7 = vsel %vm515_vm3, %v1905_v21, %v1909_v3  ;;  %v2084_v16 = vrot.slane %v1795_v29, 1  ;;  %v1938_v37 = vshll.u32 %v7541_v53, 16 }
 0x1f1   : > { %v1735_v18 = vrot.slane %v1733_v4, 7  ;;  %2011 = vrot.lane.b32.xlu0 %v1910_v7, %s6640_s16  ;;  %v1607_v22 = vpack.c.bf16 %v1590_v41, %v1589_v26  ;;  %v1943_v14 = vshll.u32 %v1798_v44, 16  ;;  %v7601_v39 = vsel %vm6730_vm4, 0, %v1703_v24 }
 0x1f2   : > { %2125 = vrot.lane.b32.xlu1 %v2088_v27, %s6639_s13  ;;  %v1936_v35 = vshrl.u32 %v7541_v53, 16  ;;  %v1940_v52 = vrot.slane %v1938_v37, 1  ;;  %v1797_v25 = vsel %vm6730_vm4, %v7547_v9, 0  ;;  %v1926_v50 = vshll.u32 %v7601_v39, 16 }
 0x1f3   : > { %v1738_v11 = vor.u32 %v1736_v36, %v1735_v18  ;;  %v1726_v43 = vshrl.u32 %v1607_v22, 16  ;;  %v2085_v33 = vsel %vm772_vm2, %v2083_v12, %v2084_v16  ;;  %v1924_v42 = vshrl.u32 %v7601_v39, 16 }
 0x1f4   : > { %v1941_v38 = vor.u32 %v1940_v52, %v1936_v35  ;;  %v1945_v24 = vrot.slane %v1943_v14, 1  ;;  %v1928_v2 = vrot.slane %v1926_v50, 1  ;;  %v1931_v28 = vshll.u32 %v1797_v25, 16 }
 0x1f5   : > { %v7613_v5 = vsel %vm6730_vm4, 0, %v1724_v54  ;;  %v1717_v26 = vor.u32 %v1715_v48, %v1714_v10  ;;  %v1728_v60 = vrot.slane %v1726_v43, 7  ;;  %2123 = vrot.lane.b32.xlu0 %v2085_v33, %s6639_s13  ;;  %v2092_v17 = vrot.slane %v7541_v53, 1 }
 0x1f6   : > { %v1946_v9 = vsel %vm515_vm3, %v1941_v38, %v1945_v24  ;;  %v1929_v63 = vor.u32 %v1928_v2, %v1924_v42  ;;  %v1933_v29 = vrot.slane %v1931_v28, 1  ;;  %v7620_v8 = vsel %vm6730_vm4, 0, %v1738_v11 }
 0x1f7   : > { %v1729_v49 = vshll.u32 %v1607_v22, 16  ;;  %2017 = vrot.lane.b32.xlu1 %v1946_v9, %s6640_s16  ;;  %v2089_v54 = vrot.slane %v7601_v39, 1  ;;  %v1800_v23 = vsel %vm6730_vm4, %v7562_v47, 0  ;;  %v2093_v32 = vrot.slane %v1798_v44, 1 }
 0x1f8   : > { %v1934_v34 = vsel %vm515_vm3, %v1929_v63, %v1933_v29  ;;  %v1962_v45 = vshll.u32 %v7613_v5, 16  ;;  %v1967_v0 = vshll.u32 %v1800_v23, 16  ;;  %v2090_v15 = vrot.slane %v1797_v25, 1 }
 0x1f9   : > { %v1731_v1 = vor.u32 %v1729_v49, %v1728_v60  ;;  %2015 = vrot.lane.b32.xlu0 %v1934_v34, %s6640_s16  ;;  %v7632_v55 = vsel %vm6730_vm4, 0, %v1717_v26  ;;  %v1799_v48 = vsel %vm6730_vm4, %v1714_v10, 0  ;;  %v2094_v13 = vsel %vm772_vm2, %v2092_v17, %v2093_v32 }
 0x1fa   : > { %v1960_v47 = vshrl.u32 %v7613_v5, 16  ;;  %v1964_v30 = vrot.slane %v1962_v45, 1  ;;  %v1950_v31 = vshll.u32 %v7632_v55, 16  ;;  %v2091_v21 = vsel %vm772_vm2, %v2089_v54, %v2090_v15 }
 0x1fb   : > { %2129 = vrot.lane.b32.xlu1 %v2094_v13, %s6639_s13  ;;  %v1969_v3 = vrot.slane %v1967_v0, 1  ;;  %v1955_v27 = vshll.u32 %v1799_v48, 16  ;;  %v1948_v41 = vshrl.u32 %v7632_v55, 16  ;;  %v1802_v10 = vsel %vm6730_vm4, %v1735_v18, 0 }
 0x1fc   : > { %v1965_v4 = vor.u32 %v1964_v30, %v1960_v47  ;;  %v1952_v12 = vrot.slane %v1950_v31, 1  ;;  %v2098_v36 = vrot.slane %v7613_v5, 1  ;;  %v1986_v7 = vshll.u32 %v7620_v8, 16  ;;  %v6563_v31 = vld [vmem:[%s9612_s3 + $0x38] sm:$0xff]  }
 0x1fd   : > { %2127 = vrot.lane.b32.xlu0 %v2091_v21, %s6639_s13  ;;  %v1957_v44 = vrot.slane %v1955_v27, 1  ;;  %v1991_v16 = vshll.u32 %v1802_v10, 16  ;;  %v7650_v14 = vsel %vm6730_vm4, 0, %v1731_v1  ;;  %v1801_v35 = vsel %vm6730_vm4, %v1728_v60, 0 }
 0x1fe   : > { %v1970_v37 = vsel %vm515_vm3, %v1965_v4, %v1969_v3  ;;  %v1953_v22 = vor.u32 %v1952_v12, %v1948_v41  ;;  %v1984_v18 = vshrl.u32 %v7620_v8, 16  ;;  %v1988_v52 = vrot.slane %v1986_v7, 1 }
 0x1ff   : > { %2021 = vrot.lane.b32.xlu1 %v1970_v37, %s6640_s16  ;;  %v1974_v25 = vshll.u32 %v7650_v14, 16  ;;  %v2099_v11 = vrot.slane %v1800_v23, 1  ;;  %v2095_v43 = vrot.slane %v7632_v55, 1  ;;  %v1979_v33 = vshll.u32 %v1801_v35, 16 }
 0x200   : > { %v1958_v50 = vsel %vm515_vm3, %v1953_v22, %v1957_v44  ;;  %v1989_v42 = vor.u32 %v1988_v52, %v1984_v18  ;;  %v1972_v38 = vshrl.u32 %v7650_v14, 16  ;;  %v2096_v28 = vrot.slane %v1799_v48, 1 }
 0x201   : > { %2019 = vrot.lane.b32.xlu0 %v1958_v50, %s6640_s16  ;;  %v1976_v24 = vrot.slane %v1974_v25, 1  ;;  %v2100_v2 = vsel %vm772_vm2, %v2098_v36, %v2099_v11  ;;  %v1993_v26 = vrot.slane %v1991_v16, 1  ;;  %v1981_v29 = vrot.slane %v1979_v33, 1 }
 0x202   : > { %v2097_v9 = vsel %vm772_vm2, %v2095_v43, %v2096_v28  ;;  %v2104_v49 = vrot.slane %v7620_v8, 1  ;;  %v2105_v54 = vrot.slane %v1802_v10, 1  ;;  %v2101_v23 = vrot.slane %v7650_v14, 1 }
 0x203   : > { %2133 = vrot.lane.b32.xlu1 %v2100_v2, %s6639_s13  ;;  %v1977_v60 = vor.u32 %v1976_v24, %v1972_v38  ;;  %v1994_v63 = vsel %vm515_vm3, %v1989_v42, %v1993_v26  ;;  %v2102_v32 = vrot.slane %v1801_v35, 1 }
 0x204   : > { %v2106_v34 = vsel %vm772_vm2, %v2104_v49, %v2105_v54 }
 0x205   : > { %2131 = vrot.lane.b32.xlu0 %v2097_v9, %s6639_s13  ;;  %v1982_v17 = vsel %vm515_vm3, %v1977_v60, %v1981_v29  ;;  %v2103_v45 = vsel %vm772_vm2, %v2101_v23, %v2102_v32 }
 0x207   : > { %2025 = vrot.lane.b32.xlu1 %v1994_v63, %s6640_s16 }
 0x209   : > { %2023 = vrot.lane.b32.xlu0 %v1982_v17, %s6640_s16 }
 0x20b   : > { %2137 = vrot.lane.b32.xlu1 %v2106_v34, %s6639_s13 }
 0x20d   : > { %2135 = vrot.lane.b32.xlu0 %v2103_v45, %s6639_s13 }
 0x22b   : > { %v1998_v0 = vpop.permute.xlu1 %1997 }
 0x22c   : > { %v2142_v47 = vsel %vm853_vm5, %v7356_v56, %v1998_v0  ;;  %v6564_v56 = vld [vmem:[%s9612_s3 + $0x30] sm:$0xff]  }
 0x233   : > { %v1996_v1 = vpop.permute.xlu0 %1995 }
 0x234   : > { %v2110_v15 = vpop.permute.xlu1 %2109  ;;  %v2140_v48 = vsel %vm853_vm5, %v7380_v57, %v1996_v1 }
 0x235   : > { %v7684_v21 = vsel %vm886_vm6, %v2142_v47, %v2110_v15 }
 0x237   : > { %v2108_v13 = vpop.permute.xlu0 %2107 }
 0x238   : > { %v2172_v30 = vsel %vm886_vm6, %v2140_v48, %v2108_v13 }
 0x239   : > { %6184 = vmatprep.mubr.msk.bf16.mxu1 %vm937_vm7, %v2172_v30  ;;  %6223 = vmatmul.mubr.msk.bf16.vlgmr.msra.gmra.mxu0 %vm937_vm7, %v2172_v30 }
 0x23a   : > { %6185 = vmatmul.mubr.msk.bf16.vlgmr.msra.gmra.mxu1 %vm937_vm7, %v7684_v21  ;;  %6226 = vmatprep.mubr.msk.bf16.mxu0 %vm937_vm7, %v7684_v21 }
 0x23b   : > { %6255 = vmatpush3.bf16.msra.mxu1 %v7388_v58 }
 0x23c   : > { %6256 = vmatprep.subr.bf16.mxu1 %v6563_v31 }
 0x23d   : > { %v2002_v57 = vpop.permute.xlu1 %2001 }
 0x23e   : > { %v2146_v12 = vsel %vm853_vm5, %v7417_v40, %v2002_v57 }
 0x23f   : > { %6257 = vmatpush3.bf16.msra.mxu1 %v6563_v31 }
 0x240   : > { %6258 = vmatprep.subr.bf16.mxu1 %v6564_v56 }
 0x241   : > { %v2000_v3 = vpop.permute.xlu0 %1999  ;;  %v2114_v27 = vpop.permute.xlu1 %2113 }
 0x242   : > { %v2144_v4 = vsel %vm853_vm5, %v7442_v20, %v2000_v3  ;;  %v7704_v10 = vsel %vm886_vm6, %v2146_v12, %v2114_v27 }
 0x243   : > { %6259 = vmatpush3.bf16.msra.mxu1 %v6564_v56 }
 0x245   : > { %v2112_v41 = vpop.permute.xlu0 %2111 }
 0x246   : > { %v7701_v58 = vsel %vm886_vm6, %v2144_v4, %v2112_v41 }
 0x247   : > { %6188 = vmatprep.mubr.msk.bf16.mxu1 %vm937_vm7, %v7701_v58  ;;  %6227 = vmatmul.mubr.msk.bf16.gmra.mxu0 %vm937_vm7, %v7701_v58 }
 0x248   : > { %6189 = vmatmul.mubr.msk.bf16.gmra.mxu1 %vm937_vm7, %v7704_v10  ;;  %6230 = vmatprep.mubr.msk.bf16.mxu0 %vm937_vm7, %v7704_v10 }
 0x249   : > { %v2006_v20 = vpop.permute.xlu1 %2005 }
 0x24a   : > { %v2150_v16 = vsel %vm853_vm5, %v7427_v59, %v2006_v20 }
 0x24c   : > { %v2004_v40 = vpop.permute.xlu0 %2003 }
 0x24d   : > { %v2118_v44 = vpop.permute.xlu1 %2117  ;;  %v2148_v36 = vsel %vm853_vm5, %v7487_v51, %v2004_v40 }
 0x24e   : > { %v7722_v22 = vsel %vm886_vm6, %v2150_v16, %v2118_v44 }
 0x250   : > { %v2116_v7 = vpop.permute.xlu0 %2115 }
 0x251   : > { %v7719_v37 = vsel %vm886_vm6, %v2148_v36, %v2116_v7 }
 0x252   : > { %6192 = vmatprep.mubr.msk.bf16.mxu1 %vm937_vm7, %v7719_v37  ;;  %6231 = vmatmul.mubr.msk.bf16.gmra.mxu0 %vm937_vm7, %v7719_v37 }
 0x253   : > { %6193 = vmatmul.mubr.msk.bf16.gmra.mxu1 %vm937_vm7, %v7722_v22  ;;  %6234 = vmatprep.mubr.msk.bf16.mxu0 %vm937_vm7, %v7722_v22 }
 0x254   : > { %v2010_v51 = vpop.permute.xlu1 %2009 }
 0x255   : > { %v2154_v25 = vsel %vm853_vm5, %v7474_v19, %v2010_v51 }
 0x258   : > { %v2008_v59 = vpop.permute.xlu0 %2007  ;;  %v2122_v35 = vpop.permute.xlu1 %2121 }
 0x259   : > { %v2152_v18 = vsel %vm853_vm5, %v7531_v62, %v2008_v59  ;;  %v2186_v11 = vsel %vm886_vm6, %v2154_v25, %v2122_v35 }
 0x25c   : > { %v2120_v52 = vpop.permute.xlu0 %2119 }
 0x25d   : > { %v2184_v50 = vsel %vm886_vm6, %v2152_v18, %v2120_v52 }
 0x25e   : > { %6196 = vmatprep.mubr.msk.bf16.mxu1 %vm937_vm7, %v2184_v50  ;;  %6235 = vmatmul.mubr.msk.bf16.gmra.mxu0 %vm937_vm7, %v2184_v50 }
 0x25f   : > { %6197 = vmatmul.mubr.msk.bf16.gmra.mxu1 %vm937_vm7, %v2186_v11  ;;  %6238 = vmatprep.mubr.msk.bf16.mxu0 %vm937_vm7, %v2186_v11 }
 0x260   : > { %v2014_v43 = vpop.permute.xlu1 %2013 }
 0x261   : > { %v2158_v19 = vsel %vm853_vm5, %v7518_v61, %v2014_v43 }
 0x263   : > { %v2012_v33 = vpop.permute.xlu0 %2011 }
 0x264   : > { %v2126_v42 = vpop.permute.xlu1 %2125  ;;  %v2156_v62 = vsel %vm853_vm5, %v7574_v46, %v2012_v33 }
 0x265   : > { %v2190_v2 = vsel %vm886_vm6, %v2158_v19, %v2126_v42 }
 0x267   : > { %v2124_v38 = vpop.permute.xlu0 %2123 }
 0x268   : > { %v2188_v24 = vsel %vm886_vm6, %v2156_v62, %v2124_v38 }
 0x269   : > { %6200 = vmatprep.mubr.msk.bf16.mxu1 %vm937_vm7, %v2188_v24  ;;  %6239 = vmatmul.mubr.msk.bf16.gmra.mxu0 %vm937_vm7, %v2188_v24  ;;  %v2018_v28 = vpop.permute.xlu1 %2017 }
 0x26a   : > { %6201 = vmatmul.mubr.msk.bf16.gmra.mxu1 %vm937_vm7, %v2190_v2  ;;  %6242 = vmatprep.mubr.msk.bf16.mxu0 %vm937_vm7, %v2190_v2  ;;  %v2162_v61 = vsel %vm853_vm5, %v7541_v53, %v2018_v28 }
 0x26b   : > { %v2016_v26 = vpop.permute.xlu0 %2015 }
 0x26c   : > { %v2160_v46 = vsel %vm853_vm5, %v7601_v39, %v2016_v26 }
 0x26d   : > { %v2130_v60 = vpop.permute.xlu1 %2129 }
 0x26e   : > { %v2194_v29 = vsel %vm886_vm6, %v2162_v61, %v2130_v60 }
 0x26f   : > { %v2128_v9 = vpop.permute.xlu0 %2127 }
 0x270   : > { %v2192_v63 = vsel %vm886_vm6, %v2160_v46, %v2128_v9  ;;  %v6565_v9 = vld [vmem:[%s9610_s1 + $0x70] sm:$0xff]  }
 0x271   : > { %6204 = vmatprep.mubr.msk.bf16.mxu1 %vm937_vm7, %v2192_v63  ;;  %6243 = vmatmul.mubr.msk.bf16.gmra.mxu0 %vm937_vm7, %v2192_v63  ;;  %v2022_v17 = vpop.permute.xlu1 %2021 }
 0x272   : > { %6205 = vmatmul.mubr.msk.bf16.gmra.mxu1 %vm937_vm7, %v2194_v29  ;;  %6246 = vmatprep.mubr.msk.bf16.mxu0 %vm937_vm7, %v2194_v29  ;;  %v2166_v53 = vsel %vm853_vm5, %v7613_v5, %v2022_v17 }
 0x273   : > { %v2020_v49 = vpop.permute.xlu0 %2019  ;;  %6292 = vmatprep.subr.bf16.mxu0 %v6565_v9 }
 0x274   : > { %v2164_v39 = vsel %vm853_vm5, %v7632_v55, %v2020_v49  ;;  %6293 = vmatpush3.bf16.msra.mxu0 %v6565_v9 }
 0x275   : > { %v2134_v54 = vpop.permute.xlu1 %2133 }
 0x276   : > { %v2198_v32 = vsel %vm886_vm6, %v2166_v53, %v2134_v54  ;;  %v6568_v53 = vld [vmem:[%s9610_s1 + $0x58] sm:$0xff]  }
 0x277   : > { %v2132_v23 = vpop.permute.xlu0 %2131  ;;  %6330 = vmatprep.subr.bf16.mxu1 %v6568_v53 }
 0x278   : > { %v2196_v34 = vsel %vm886_vm6, %v2164_v39, %v2132_v23  ;;  %v6566_v39 = vld [vmem:[%s9610_s1 + $0x68] sm:$0xff]   ;;  %v6567_v23 = vld [vmem:[%s9610_s1 + $0x60] sm:$0xff]  }
 0x279   : > { %6208 = vmatprep.mubr.msk.bf16.mxu1 %vm937_vm7, %v2196_v34  ;;  %6247 = vmatmul.mubr.msk.bf16.gmra.mxu0 %vm937_vm7, %v2196_v34  ;;  %v2026_v45 = vpop.permute.xlu1 %2025 }
 0x27a   : > { %6209 = vmatmul.mubr.msk.bf16.gmra.mxu1 %vm937_vm7, %v2198_v32  ;;  %6250 = vmatprep.mubr.msk.bf16.mxu0 %vm937_vm7, %v2198_v32  ;;  %v2170_v5 = vsel %vm853_vm5, %v7620_v8, %v2026_v45  ;;  %v9669_v8 = vmov 0  }
 0x27b   : > { %v2024_v0 = vpop.permute.xlu0 %2023  ;;  %6294 = vmatprep.subr.bf16.mxu0 %v6566_v39 }
 0x27c   : > { %v2168_v55 = vsel %vm853_vm5, %v7650_v14, %v2024_v0  ;;  %6295 = vmatpush3.bf16.msra.mxu0 %v6566_v39 }
 0x27d   : > { %v2138_v1 = vpop.permute.xlu1 %2137  ;;  %6296 = vmatprep.subr.bf16.mxu0 %v6567_v23 }
 0x27e   : > { %v2202_v13 = vsel %vm886_vm6, %v2170_v5, %v2138_v1 }
 0x27f   : > { %v2136_v15 = vpop.permute.xlu0 %2135 }
 0x280   : > { %v2200_v48 = vsel %vm886_vm6, %v2168_v55, %v2136_v15  ;;  %6297 = vmatpush3.bf16.msra.mxu0 %v6567_v23 }
 0x281   : > { %6212 = vmatprep.mubr.msk.bf16.mxu1 %vm937_vm7, %v2200_v48  ;;  %6251 = vmatmul.mubr.msk.bf16.gmra.mxu0 %vm937_vm7, %v2200_v48 }
 0x282   : > { %6213 = vmatmul.mubr.msk.bf16.gmra.mxu1 %vm937_vm7, %v2202_v13 }
 0x283   : > { %6260 = vmatprep.mubr.msk.bf16.mxu1 %vm937_vm7, %v7684_v21 }
 0x28a   : > { %6261 = vmatmul.mubr.msk.bf16.vlgmr.msra.gmra.mxu1 %vm937_vm7, %v7701_v58 }
 0x28b   : > { %6264 = vmatprep.mubr.msk.bf16.mxu1 %vm937_vm7, %v7704_v10  ;;  %6331 = vmatpush3.bf16.msra.mxu1 %v6568_v53 }
 0x292   : > { %6265 = vmatmul.mubr.msk.bf16.gmra.mxu1 %vm937_vm7, %v7719_v37 }
 0x293   : > { %6268 = vmatprep.mubr.msk.bf16.mxu1 %vm937_vm7, %v7722_v22 }
 0x29a   : > { %6269 = vmatmul.mubr.msk.bf16.gmra.mxu1 %vm937_vm7, %v2184_v50 }
 0x29b   : > { %6272 = vmatprep.mubr.msk.bf16.mxu1 %vm937_vm7, %v2186_v11 }
 0x2a2   : > { %6273 = vmatmul.mubr.msk.bf16.gmra.mxu1 %vm937_vm7, %v2188_v24 }
 0x2a3   : > { %6276 = vmatprep.mubr.msk.bf16.mxu1 %vm937_vm7, %v2190_v2 }
 0x2aa   : > { %6277 = vmatmul.mubr.msk.bf16.gmra.mxu1 %vm937_vm7, %v2192_v63 }
 0x2ab   : > { %6280 = vmatprep.mubr.msk.bf16.mxu1 %vm937_vm7, %v2194_v29 }
 0x2b2   : > { %6281 = vmatmul.mubr.msk.bf16.gmra.mxu1 %vm937_vm7, %v2196_v34  ;;  %v6569_v34 = vld [vmem:[%s9610_s1 + $0x50] sm:$0xff]  }
 0x2b3   : > { %6284 = vmatprep.mubr.msk.bf16.mxu1 %vm937_vm7, %v2198_v32  ;;  %6332 = vmatprep.subr.bf16.mxu1 %v6569_v34 }
 0x2b4   : > { %6333 = vmatpush3.bf16.msra.mxu1 %v6569_v34  ;;  %v7939_v34 = vld [vmem:[%s9613_s4] ss:$0 sm:$0xff] }
 0x2ba   : > { %6285 = vmatmul.mubr.msk.bf16.gmra.mxu1 %vm937_vm7, %v2200_v48 }
 0x2bb   : > { %6288 = vmatprep.mubr.msk.bf16.mxu1 %vm937_vm7, %v2202_v13 }
 0x2c2   : > { %6289 = vmatmul.mubr.bf16.gmra.mxu1 %v9669_v8 }
 0x2c3   : > { %6336 = vmatprep.mubr.bf16.mxu1 %v9669_v8 }
 0x2f9   : > { %v7803_v14 = vpop.f32.mrf.mxu0 }
 0x2fa   : > { %v7805_v47 = vpop.f32.mrf.mxu1 }
 0x2fb   : > { %v7807_v30 = vpop.f32.mrf.mxu0  ;;  %v2475_v53 = vadd.f32 %v7803_v14, %v7805_v47 }
 0x2fc   : > { %v7809_v31 = vpop.f32.mrf.mxu1 }
 0x2fd   : > { %v7811_v21 = vpop.f32.mrf.mxu0  ;;  %v2467_v6 = vadd.f32 %v7807_v30, %v7809_v31 }
 0x2fe   : > { %v7813_v56 = vpop.f32.mrf.mxu1 }
 0x2ff   : > { %v7815_v57 = vpop.f32.mrf.mxu0 }
 0x300   : > { %v7817_v3 = vpop.f32.mrf.mxu1 }
 0x307   : > { %v7819_v27 = vpop.f32.mrf.mxu0 }
 0x308   : > { %v7821_v4 = vpop.f32.mrf.mxu1 }
 0x309   : > { %v7823_v41 = vpop.f32.mrf.mxu0  ;;  %v2491_v14 = vadd.f32 %v7819_v27, %v7821_v4 }
 0x30a   : > { %v7825_v12 = vpop.f32.mrf.mxu1 }
 0x30b   : > { %v7827_v58 = vpop.f32.mrf.mxu0 }
 0x30c   : > { %v7829_v10 = vpop.f32.mrf.mxu1 }
 0x30d   : > { %v7831_v20 = vpop.f32.mrf.mxu0  ;;  %v2494_v30 = vadd.f32 %v7827_v58, %v7829_v10 }
 0x30e   : > { %v7833_v40 = vpop.f32.mrf.mxu1 }
 0x312   : > { %v7835_v44 = vpop.f32.mrf.mxu0 }
 0x313   : > { %v7837_v36 = vpop.f32.mrf.mxu1 }
 0x314   : > { %v7839_v7 = vpop.f32.mrf.mxu0 }
 0x315   : > { %v7841_v16 = vpop.f32.mrf.mxu1 }
 0x316   : > { %v7843_v37 = vpop.f32.mrf.mxu0 }
 0x317   : > { %v7845_v22 = vpop.f32.mrf.mxu1 }
 0x318   : > { %v7847_v51 = vpop.f32.mrf.mxu0 }
 0x319   : > { %v7849_v59 = vpop.f32.mrf.mxu1 }
 0x31a   : > { %v7966_v4 = vadd.f32 %v7847_v51, %v7849_v59 }
 0x31e   : > { %v7851_v35 = vpop.f32.mrf.mxu0 }
 0x31f   : > { %v7853_v18 = vpop.f32.mrf.mxu1 }
 0x320   : > { %v7855_v52 = vpop.f32.mrf.mxu0  ;;  %v7972_v10 = vadd.f32 %v7851_v35, %v7853_v18 }
 0x321   : > { %v7857_v25 = vpop.f32.mrf.mxu1 }
 0x322   : > { %v7859_v50 = vpop.f32.mrf.mxu0 }
 0x323   : > { %v7861_v11 = vpop.f32.mrf.mxu1 }
 0x324   : > { %v7863_v43 = vpop.f32.mrf.mxu0 }
 0x325   : > { %v7865_v33 = vpop.f32.mrf.mxu1 }
 0x329   : > { %v7867_v42 = vpop.f32.mrf.mxu0 }
 0x32a   : > { %v7869_v62 = vpop.f32.mrf.mxu1 }
 0x32b   : > { %v7871_v38 = vpop.f32.mrf.mxu0 }
 0x32c   : > { %v7873_v19 = vpop.f32.mrf.mxu1 }
 0x32d   : > { %v7875_v24 = vpop.f32.mrf.mxu0  ;;  %v7999_v35 = vadd.f32 %v7871_v38, %v7873_v19  ;;  %v6586_v38 = vld [vmem:[%s6707_s6 + $0x8] sm:$0xff] }
 0x32e   : > { %v7877_v2 = vpop.f32.mrf.mxu1 }
 0x32f   : > { %v7879_v28 = vpop.f32.mrf.mxu0  ;;  %v8003_v18 = vadd.f32 %v7875_v24, %v7877_v2 }
 0x330   : > { %v7881_v26 = vpop.f32.mrf.mxu1 }
 0x331   : > { %v7883_v60 = vpop.f32.mrf.mxu0 }
 0x332   : > { %v7885_v46 = vpop.f32.mrf.mxu1 }
 0x333   : > { %v7890_v61 = vpop.f32.mrf.mxu0 }
 0x334   : > { %v7892_v63 = vpop.f32.mrf.mxu1 }
 0x335   : > { %v7896_v17 = vpop.f32.mrf.mxu0  ;;  %v8023_v24 = vadd.f32 %v7890_v61, %v7892_v63 }
 0x336   : > { %v7894_v29 = vpop.f32.mrf.mxu1 }
 0x337   : > { %v7914_v32 = vpop.f32.mrf.mxu0  ;;  %v8027_v2 = vadd.f32 %v7896_v17, %v7894_v29 }
 0x338   : > { %v7898_v49 = vpop.f32.mrf.mxu1 }
 0x339   : > { %v7920_v1 = vpop.f32.mrf.mxu0 }
 0x33a   : > { %v7900_v54 = vpop.f32.mrf.mxu1 }
 0x33b   : > { %v2562_v5 = vpop.f32.mrf.mxu0 }
 0x33c   : > { %v7916_v45 = vpop.f32.mrf.mxu1 }
 0x33d   : > { %v6249_v9 = vpop.f32.mrf.mxu0 }
 0x33e   : > { %v7918_v0 = vpop.f32.mrf.mxu1 }
 0x33f   : > { %v2565_v23 = vpop.f32.mrf.mxu0  ;;  %v8043_v63 = vadd.f32 %v6249_v9, %v7918_v0 }
 0x340   : > { %v7922_v55 = vpop.f32.mrf.mxu1 }
 0x341   : > { %9670 = vst [vmem:[#allocation3_spill] sm:$0xff] %v7922_v55 }
 0x342   : > { %v7924_v15 = vpop.f32.mrf.mxu1 }
 0x343   : > { %9671 = vst [vmem:[#allocation4_spill] sm:$0xff] %v7924_v15 }
 0x344   : > { %v7926_v48 = vpop.f32.mrf.mxu1 }
 0x345   : > { %9672 = vst [vmem:[#allocation5_spill] sm:$0xff] %v7926_v48 }
 0x346   : > { %v7928_v13 = vpop.f32.mrf.mxu1 }
 0x347   : > { %9673 = vst [vmem:[#allocation6_spill] sm:$0xff] %v7928_v13  ;;  %v2478_v13 = vadd.f32 %v7811_v21, %v7813_v56  ;;  %v2486_v21 = vadd.f32 %v7831_v20, %v7833_v40  ;;  %v7958_v56 = vadd.f32 %v7839_v7, %v7841_v16  ;;  %v7976_v20 = vadd.f32 %v7855_v52, %v7857_v25  ;;  %v6583_v16 = vld [vmem:[%s6707_s6 + $0x10] sm:$0xff] }
 0x348   : > { %v7930_v39 = vpop.f32.mrf.mxu1  ;;  %v7980_v40 = vadd.f32 %v7859_v50, %v7861_v11  ;;  %v7988_v7 = vadd.f32 %v7867_v42, %v7869_v62  ;;  %v8007_v52 = vadd.f32 %v7879_v28, %v7881_v26  ;;  %v8031_v28 = vadd.f32 %v7914_v32, %v7898_v49  ;;  %v9679_v29 = vld [vmem:[#allocation3_spill] sm:$0xff] }
 0x349   : > { %9674 = vst [vmem:[#allocation7_spill] sm:$0xff] %v7930_v39  ;;  %v2470_v39 = vadd.f32 %v7815_v57, %v7817_v3  ;;  %v7962_v57 = vadd.f32 %v7843_v37, %v7845_v22  ;;  %v6252_v3 = vpop.f32.mrf.mxu0  ;;  %v6584_v22 = vld [vmem:[%s6707_s6 + $0x18] sm:$0xff]  ;;  %v8046_v17 = vadd.f32 %v2565_v23, %v9679_v29 }
 0x34a   : > { %v6262_v8 = vpop.f32.mrf.mxu1 }
 0x34b   : > { %v2774_v55 = vadd.f32 %v6262_v8, %v2475_v53  ;;  %v2483_v8 = vadd.f32 %v7823_v41, %v7825_v12  ;;  %v2578_v25 = vpop.f32.mrf.mxu0 }
 0x34c   : > { %v2645_v48 = vpop.f32.mrf.mxu1 }
 0x34d   : > { %v2772_v15 = vadd.f32 %v2645_v48, %v2467_v6  ;;  %v2811_v31 = vadd.f32 %v7939_v34, %v2774_v55  ;;  %v2507_v6 = vadd.f32 %v7835_v44, %v7837_v36  ;;  %v7984_v44 = vadd.f32 %v7863_v43, %v7865_v33  ;;  %v6585_v33 = vld [vmem:[%s6707_s6] sm:$0xff]  ;;  %v6253_v49 = vpop.f32.mrf.mxu0 }
 0x34e   : > { %v6263_v47 = vpop.f32.mrf.mxu1  ;;  %v8011_v43 = vadd.f32 %v7883_v60, %v7885_v46  ;;  %v8035_v46 = vadd.f32 %v7920_v1, %v7900_v54  ;;  %v8038_v55 = vadd.f32 %v2562_v5, %v7916_v45 }
 0x34f   : > { %v2775_v53 = vadd.f32 %v6263_v47, %v2478_v13  ;;  %v2809_v41 = vadd.f32 %v7939_v34, %v2772_v15  ;;  %v7991_v37 = vadd.f32 %v6583_v16, %v2811_v31  ;;  %v9681_v47 = vld [vmem:[#allocation5_spill] sm:$0xff] }
 0x350   : > { %v2648_v27 = vpop.f32.mrf.mxu1  ;;  %v8053_v0 = vadd.f32 %v2578_v25, %v9681_v47  ;;  %v6588_v16 = vld [vmem:[%s6707_s6 + $0x38] sm:$0xff] }
 0x351   : > { %v2812_v12 = vadd.f32 %v7939_v34, %v2775_v53  ;;  %v2773_v58 = vadd.f32 %v2648_v27, %v2470_v39  ;;  %9675 = vst [vmem:[#allocation8_spill] sm:$0xff] %v7991_v37  ;;  %v8014_v42 = vadd.f32 %v6585_v33, %v2809_v41  ;;  %v9680_v39 = vld [vmem:[#allocation4_spill] sm:$0xff] }
 0x352   : > { %v6266_v36 = vpop.f32.mrf.mxu1 }
 0x353   : > { %v7994_v51 = vadd.f32 %v6584_v22, %v2812_v12  ;;  %v2810_v59 = vadd.f32 %v7939_v34, %v2773_v58  ;;  %v2778_v50 = vadd.f32 %v6266_v36, %v2491_v14  ;;  %9677 = vst [vmem:[#allocation10_spill] sm:$0xff] %v8014_v42  ;;  %v8050_v14 = vadd.f32 %v6252_v3, %v9680_v39  ;;  %v2581_v12 = vpop.f32.mrf.mxu0  ;;  %v6587_v58 = vld [vmem:[%s6707_s6 + $0x30] sm:$0xff] }
 0x354   : > { %v2661_v11 = vpop.f32.mrf.mxu1 }
 0x355   : > { %9676 = vst [vmem:[#allocation9_spill] sm:$0xff] %v7994_v51  ;;  %v2874_v62 = vpack.c.bf16 %v7994_v51, %v7991_v37  ;;  %v8019_v19 = vadd.f32 %v6586_v38, %v2810_v59  ;;  %v2776_v26 = vadd.f32 %v2661_v11, %v2483_v8  ;;  %v2815_v32 = vadd.f32 %v7939_v34, %v2778_v50  ;;  %v6589_v50 = vld [vmem:[%s6707_s6 + $0x28] sm:$0xff] }
 0x356   : > { %v6267_v60 = vpop.f32.mrf.mxu1 }
 0x357   : > { %9678 = vst [vmem:[#allocation11_spill] sm:$0xff] %v8019_v19  ;;  %v2916_v15 = vshrl.u32 %v2874_v62, 16  ;;  %v2873_v61 = vpack.c.bf16 %v8019_v19, %v8014_v42  ;;  %v2779_v48 = vadd.f32 %v6267_v60, %v2494_v30  ;;  %v2919_v1 = vshll.u32 %v2874_v62, 16 }
 0x358   : > { %v2664_v13 = vpop.f32.mrf.mxu1  ;;  %v2813_v9 = vadd.f32 %v7939_v34, %v2776_v26  ;;  %v8066_v36 = vadd.f32 %v6587_v58, %v2815_v32  ;;  %v9687_v32 = vld [vmem:[#allocation7_spill] sm:$0xff] }
 0x359   : > { %v2918_v54 = vrot.slane %v2916_v15, 7  ;;  %v2909_v45 = vshrl.u32 %v2873_v61, 16  ;;  %v2777_v5 = vadd.f32 %v2664_v13, %v2486_v21  ;;  %v2816_v23 = vadd.f32 %v7939_v34, %v2779_v48  ;;  %v9683_v21 = vld [vmem:[#allocation6_spill] sm:$0xff] }
 0x35a   : > { %v6270_v8 = vpop.f32.mrf.mxu1  ;;  %v8063_v3 = vadd.f32 %v6253_v49, %v9683_v21  ;;  %9684 = vst [vmem:[#allocation3_spill] sm:$0xff] %v8066_v36  ;;  %v2912_v38 = vshll.u32 %v2873_v61, 16  ;;  %v6570_v49 = vld [vmem:[%s9610_s1 + $0x48] sm:$0xff]   ;;  %v8088_v48 = vadd.f32 %v2581_v12, %v9687_v32  ;;  %v6590_v13 = vld [vmem:[%s6707_s6 + $0x20] sm:$0xff] }
 0x35b   : > { %v2921_v30 = vor.u32 %v2919_v1, %v2918_v54  ;;  %v2814_v31 = vadd.f32 %v7939_v34, %v2777_v5  ;;  %v2782_v53 = vadd.f32 %v6270_v8, %v2507_v6  ;;  %v8060_v41 = vsel %vm6730_vm4, %v2918_v54, 0  ;;  %6334 = vmatprep.subr.bf16.mxu1 %v6570_v49  ;;  %v6591_v8 = vld [vmem:[%s6707_s6 + $0x50] sm:$0xff]  ;;  %v6593_v32 = vld [vmem:[%s6707_s6 + $0x48] sm:$0xff] }
 0x35c   : > { %v8069_v22 = vadd.f32 %v6588_v16, %v2816_v23  ;;  %v2677_v59 = vpop.f32.mrf.mxu1  ;;  %v2911_v25 = vrot.slane %v2909_v45, 7  ;;  %v3104_v62 = vshll.u32 %v8060_v41, 16  ;;  %v8091_v54 = vadd.f32 %v6590_v13, %v2813_v9  ;;  %6335 = vmatpush3.bf16.msra.mxu1 %v6570_v49  ;;  %v6592_v16 = vld [vmem:[%s6707_s6 + $0x58] sm:$0xff] }
 0x35d   : > { %v8072_v11 = vadd.f32 %v6589_v50, %v2814_v31  ;;  %v2819_v6 = vadd.f32 %v7939_v34, %v2782_v53  ;;  %v8077_v33 = vsel %vm6730_vm4, 0, %v2921_v30  ;;  %v2780_v60 = vadd.f32 %v2677_v59, %v7958_v56 }
 0x35e   : > { %9685 = vst [vmem:[#allocation4_spill] sm:$0xff] %v8069_v22  ;;  %v2876_v26 = vpack.c.bf16 %v8069_v22, %v8066_v36  ;;  %v6271_v15 = vpop.f32.mrf.mxu1  ;;  %v3099_v29 = vshll.u32 %v8077_v33, 16  ;;  %9688 = vst [vmem:[#allocation6_spill] sm:$0xff] %v8091_v54  ;;  %v3344_v1 = vrot.slane %v8060_v41, 1  ;;  %v3097_v5 = vshrl.u32 %v8077_v33, 16 }
 0x35f   : > { %9686 = vst [vmem:[#allocation5_spill] sm:$0xff] %v8072_v11  ;;  %v2783_v61 = vadd.f32 %v6271_v15, %v7962_v57  ;;  %v2914_v47 = vor.u32 %v2912_v38, %v2911_v25  ;;  %v8098_v23 = vpack.c.bf16 %v8072_v11, %v8091_v54  ;;  %v8101_v30 = vadd.f32 %v6591_v8, %v2819_v6 }
 0x360   : > { %v2930_v45 = vshrl.u32 %v2876_v26, 16  ;;  %v2680_v56 = vpop.f32.mrf.mxu1  ;;  %v3101_v39 = vrot.slane %v3099_v29, 1  ;;  %v3106_v57 = vrot.slane %v3104_v62, 1  ;;  %v2817_v31 = vadd.f32 %v7939_v34, %v2780_v60 }
 0x361   : > { %9689 = vst [vmem:[#allocation7_spill] sm:$0xff] %v8101_v30  ;;  %v2820_v9 = vadd.f32 %v7939_v34, %v2783_v61  ;;  %v2781_v53 = vadd.f32 %v2680_v56, %v7966_v4  ;;  %v8108_v12 = vsel %vm6730_vm4, 0, %v2914_v47  ;;  %v2933_v58 = vshll.u32 %v2876_v26, 16  ;;  %v8119_v4 = vld [vmem:[%s9610_s1 + $0x88] sm:$0xff]  }
 0x362   : > { %v6274_v41 = vpop.f32.mrf.mxu1  ;;  %v3102_v21 = vor.u32 %v3101_v39, %v3097_v5  ;;  %v3068_v6 = vsel %vm6730_vm4, %v2911_v25, 0  ;;  %v2932_v62 = vrot.slane %v2930_v45, 7  ;;  %v3087_v15 = vshll.u32 %v8108_v12, 16  ;;  %6368 = vmatprep.subr.bf16.mxu0 %v8119_v4 }
 0x363   : > { %v8111_v59 = vadd.f32 %v6592_v16, %v2820_v9  ;;  %v2786_v50 = vadd.f32 %v6274_v41, %v7972_v10  ;;  %v2818_v38 = vadd.f32 %v7939_v34, %v2781_v53  ;;  %v3085_v25 = vshrl.u32 %v8108_v12, 16 }
 0x364   : > { %v2693_v60 = vpop.f32.mrf.mxu1  ;;  %v3107_v26 = vsel %vm515_vm3, %v3102_v21, %v3106_v57  ;;  %v3092_v49 = vshll.u32 %v3068_v6, 16  ;;  %v3089_v56 = vrot.slane %v3087_v15, 1  ;;  %v3343_v5 = vrot.slane %v8077_v33, 1  ;;  %v6595_v15 = vld [vmem:[%s6707_s6 + $0x70] sm:$0xff] }
 0x365   : > { %9690 = vst [vmem:[#allocation12_spill] sm:$0xff] %v8111_v59  ;;  %v2878_v10 = vpack.c.bf16 %v8111_v59, %v8101_v30  ;;  %v2784_v29 = vadd.f32 %v2693_v60, %v7976_v20  ;;  %3278 = vrot.lane.b32.xlu1 %v3107_v26, %s6640_s16  ;;  %v8131_v13 = vadd.f32 %v6593_v32, %v2818_v38  ;;  %v2923_v39 = vshrl.u32 %v8098_v23, 16  ;;  %v6594_v20 = vld [vmem:[%s6707_s6 + $0x40] sm:$0xff] }
 0x366   : > { %v2823_v61 = vadd.f32 %v7939_v34, %v2786_v50  ;;  %v6275_v45 = vpop.f32.mrf.mxu1  ;;  %v8137_v47 = vadd.f32 %v6594_v20, %v2817_v31  ;;  %v2935_v57 = vor.u32 %v2933_v58, %v2932_v62  ;;  %v3090_v41 = vor.u32 %v3089_v56, %v3085_v25 }
 0x367   : > { %9691 = vst [vmem:[#allocation13_spill] sm:$0xff] %v8131_v13  ;;  %v2944_v8 = vshrl.u32 %v2878_v10, 16  ;;  %v2821_v9 = vadd.f32 %v7939_v34, %v2784_v29  ;;  %v2787_v53 = vadd.f32 %v6275_v45, %v7980_v40  ;;  %v3094_v21 = vrot.slane %v3092_v49, 1 }
 0x368   : > { %9692 = vst [vmem:[#allocation14_spill] sm:$0xff] %v8137_v47  ;;  %v2696_v16 = vpop.f32.mrf.mxu1  ;;  %v2947_v50 = vshll.u32 %v2878_v10, 16  ;;  %v3345_v60 = vsel %vm772_vm2, %v3343_v5, %v3344_v1  ;;  %v3340_v26 = vrot.slane %v8108_v12, 1  ;;  %v8146_v31 = vpack.c.bf16 %v8131_v13, %v8137_v47  ;;  %v6596_v1 = vld [vmem:[%s6707_s6 + $0x60] sm:$0xff] }
 0x369   : > { %v2785_v38 = vadd.f32 %v2696_v16, %v7984_v44  ;;  %v8149_v58 = vadd.f32 %v6595_v15, %v2823_v61  ;;  %v2824_v40 = vadd.f32 %v7939_v34, %v2787_v53  ;;  %v3095_v29 = vsel %vm515_vm3, %v3090_v41, %v3094_v21  ;;  %3390 = vrot.lane.b32.xlu1 %v3345_v60, %s6639_s13  ;;  %v6597_v61 = vld [vmem:[%s6707_s6 + $0x78] sm:$0xff] }
 0x36a   : > { %v6278_v44 = vpop.f32.mrf.mxu1  ;;  %v8154_v10 = vrot.slane %v2944_v8, 7  ;;  %v8157_v25 = vadd.f32 %v6596_v1, %v2821_v9  ;;  %3276 = vrot.lane.b32.xlu0 %v3095_v29, %s6640_s16  ;;  %v3341_v56 = vrot.slane %v3068_v6, 1  ;;  %v8167_v20 = vsel %vm6730_vm4, 0, %v2935_v57  ;;  %v6598_v9 = vld [vmem:[%s6707_s6 + $0x68] sm:$0xff] }
 0x36b   : > { %9693 = vst [vmem:[#allocation15_spill] sm:$0xff] %v8149_v58  ;;  %v2822_v49 = vadd.f32 %v7939_v34, %v2785_v38  ;;  %v2790_v32 = vadd.f32 %v6278_v44, %v7988_v7  ;;  %v8163_v45 = vadd.f32 %v6597_v61, %v2824_v40  ;;  %v3071_v8 = vsel %vm6730_vm4, %v2932_v62, 0 }
 0x36c   : > { %9694 = vst [vmem:[#allocation16_spill] sm:$0xff] %v8157_v25  ;;  %v2709_v5 = vpop.f32.mrf.mxu1  ;;  %v2925_v7 = vrot.slane %v2923_v39, 7  ;;  %v3342_v6 = vsel %vm772_vm2, %v3340_v26, %v3341_v56  ;;  %v3123_v57 = vshll.u32 %v8167_v20, 16  ;;  %v3128_v38 = vshll.u32 %v3071_v8, 16 }
 0x36d   : > { %9695 = vst [vmem:[#allocation17_spill] sm:$0xff] %v8163_v45  ;;  %v8172_v53 = vadd.f32 %v6598_v9, %v2822_v49  ;;  %v2827_v41 = vadd.f32 %v7939_v34, %v2790_v32  ;;  %v2788_v21 = vadd.f32 %v2709_v5, %v7999_v35  ;;  %v8178_v16 = vpack.c.bf16 %v8163_v45, %v8149_v58  ;;  %v6599_v49 = vld [vmem:[%s6707_s6 + $0x90] sm:$0xff]  ;;  %v6575_v45 = vld [vmem:[%s9612_s3 + $0x68] sm:$0xff]   ;;  %v6577_v58 = vld [vmem:[%s9612_s3 + $0x58] sm:$0xff]  }
 0x36e   : > { %v6279_v60 = vpop.f32.mrf.mxu1  ;;  %v2926_v62 = vshll.u32 %v8098_v23, 16  ;;  %3388 = vrot.lane.b32.xlu0 %v3342_v6, %s6639_s13  ;;  %v2949_v39 = vor.u32 %v2947_v50, %v8154_v10  ;;  %v3121_v29 = vshrl.u32 %v8167_v20, 16  ;;  %v3125_v44 = vrot.slane %v3123_v57, 1 }
 0x36f   : > { %9696 = vst [vmem:[#allocation18_spill] sm:$0xff] %v8172_v53  ;;  %v2791_v35 = vadd.f32 %v6279_v60, %v8003_v18  ;;  %v8190_v26 = vpack.c.bf16 %v8172_v53, %v8157_v25  ;;  %v2958_v23 = vshrl.u32 %v8178_v16, 16  ;;  %v8195_v32 = vadd.f32 %v6599_v49, %v2827_v41  ;;  %v6600_v60 = vld [vmem:[%s6707_s6 + $0x98] sm:$0xff]  ;;  %v6576_v25 = vld [vmem:[%s9612_s3 + $0x60] sm:$0xff]  }
 0x370   : > { %v2712_v1 = vpop.f32.mrf.mxu1  ;;  %v2825_v61 = vadd.f32 %v7939_v34, %v2788_v21  ;;  %v3126_v56 = vor.u32 %v3125_v44, %v3121_v29  ;;  %v3130_v50 = vrot.slane %v3128_v38, 1  ;;  %v2928_v5 = vor.u32 %v2926_v62, %v2925_v7 }
 0x371   : > { %9697 = vst [vmem:[#allocation19_spill] sm:$0xff] %v8195_v32  ;;  %v2828_v18 = vadd.f32 %v7939_v34, %v2791_v35  ;;  %v3070_v9 = vsel %vm6730_vm4, %v2925_v7, 0  ;;  %v2789_v41 = vadd.f32 %v2712_v1, %v8007_v52  ;;  %v3349_v49 = vrot.slane %v8167_v20, 1 }
 0x372   : > { %v6282_v6 = vpop.f32.mrf.mxu1  ;;  %v3131_v38 = vsel %vm515_vm3, %v3126_v56, %v3130_v50  ;;  %v8212_v7 = vsel %vm6730_vm4, 0, %v2928_v5  ;;  %v3116_v44 = vshll.u32 %v3070_v9, 16  ;;  %v3350_v1 = vrot.slane %v3071_v8, 1 }
 0x373   : > { %v8203_v40 = vadd.f32 %v6600_v60, %v2828_v18  ;;  %3282 = vrot.lane.b32.xlu1 %v3131_v38, %s6640_s16  ;;  %v3111_v52 = vshll.u32 %v8212_v7, 16  ;;  %v6601_v18 = vld [vmem:[%s6707_s6 + $0x80] sm:$0xff]  ;;  %v3109_v56 = vshrl.u32 %v8212_v7, 16  ;;  %v2826_v50 = vadd.f32 %v7939_v34, %v2789_v41 }
 0x374   : > { %v2725_v62 = vpop.f32.mrf.mxu1  ;;  %v8221_v60 = vadd.f32 %v6601_v18, %v2825_v61  ;;  %v2794_v5 = vadd.f32 %v6282_v6, %v8011_v43  ;;  %v3351_v57 = vsel %vm772_vm2, %v3349_v49, %v3350_v1  ;;  %v3346_v15 = vrot.slane %v8212_v7, 1 }
 0x375   : > { %9698 = vst [vmem:[#allocation20_spill] sm:$0xff] %v8203_v40  ;;  %v8217_v29 = vpack.c.bf16 %v8203_v40, %v8195_v32  ;;  %v3113_v21 = vrot.slane %v3111_v52, 1  ;;  %v6602_v40 = vld [vmem:[%s6707_s6 + $0x88] sm:$0xff]  ;;  %v2792_v61 = vadd.f32 %v2725_v62, %v8023_v24  ;;  %v8236_v41 = vsel %vm6730_vm4, 0, %v2949_v39 }
 0x376   : > { %9699 = vst [vmem:[#allocation21_spill] sm:$0xff] %v8221_v60  ;;  %v6283_v35 = vpop.f32.mrf.mxu1  ;;  %v8230_v32 = vadd.f32 %v6602_v40, %v2826_v50  ;;  %v2831_v8 = vadd.f32 %v7939_v34, %v2794_v5  ;;  %v3118_v18 = vrot.slane %v3116_v44, 1  ;;  %v3347_v49 = vrot.slane %v3070_v9, 1 }
 0x377   : > { %v2972_v38 = vshrl.u32 %v8217_v29, 16  ;;  %v3114_v6 = vor.u32 %v3113_v21, %v3109_v56  ;;  %3394 = vrot.lane.b32.xlu1 %v3351_v57, %s6639_s13  ;;  %v3073_v40 = vsel %vm6730_vm4, %v8154_v10, 0  ;;  %v8242_v52 = vrot.slane %v2958_v23, 7  ;;  %v6603_v23 = vld [vmem:[%s6707_s6 + $0xb0] sm:$0xff] }
 0x378   : > { %9700 = vst [vmem:[#allocation22_spill] sm:$0xff] %v8230_v32  ;;  %v2728_v43 = vpop.f32.mrf.mxu1  ;;  %v2975_v24 = vshll.u32 %v8217_v29, 16  ;;  %v2881_v39 = vpack.c.bf16 %v8230_v32, %v8221_v60  ;;  %v3348_v44 = vsel %vm772_vm2, %v3346_v15, %v3347_v49  ;;  %v3147_v9 = vshll.u32 %v8236_v41, 16 }
 0x379   : > { %v8244_v1 = vrot.slane %v2972_v38, 7  ;;  %v3119_v21 = vsel %vm515_vm3, %v3114_v6, %v3118_v18  ;;  %v3152_v57 = vshll.u32 %v3073_v40, 16  ;;  %v8254_v56 = vadd.f32 %v6603_v23, %v2831_v8 }
 0x37a   : > { %v6286_v62 = vpop.f32.mrf.mxu1  ;;  %3280 = vrot.lane.b32.xlu0 %v3119_v21, %s6640_s16  ;;  %v2965_v10 = vshrl.u32 %v2881_v39, 16  ;;  %v2829_v50 = vadd.f32 %v7939_v34, %v2792_v61  ;;  %v2795_v29 = vadd.f32 %v6283_v35, %v8027_v2  ;;  %v3145_v38 = vshrl.u32 %v8236_v41, 16 }
 0x37b   : > { %9701 = vst [vmem:[#allocation23_spill] sm:$0xff] %v8254_v56  ;;  %v3149_v6 = vrot.slane %v3147_v9, 1  ;;  %v9702_v15 = vshrl.u32 %v8146_v31, 16  ;;  %v2793_v49 = vadd.f32 %v2728_v43, %v8031_v28  ;;  %v2968_v32 = vshll.u32 %v2881_v39, 16  ;;  %v6605_v43 = vld [vmem:[%s6707_s6 + $0xb8] sm:$0xff] }
 0x37c   : > { %v2741_v5 = vpop.f32.mrf.mxu1  ;;  %v8262_v21 = vrot.slane %v2965_v10, 7  ;;  %v3154_v8 = vrot.slane %v3152_v57, 1  ;;  %v2832_v61 = vadd.f32 %v7939_v34, %v2795_v29  ;;  %v9703_v2 = vshll.u32 %v8146_v31, 16 }
 0x37d   : > { %v2939_v18 = vrot.slane %v9702_v15, 7  ;;  %v3150_v23 = vor.u32 %v3149_v6, %v3145_v38  ;;  %v2830_v9 = vadd.f32 %v7939_v34, %v2793_v49  ;;  %v6604_v15 = vld [vmem:[%s6707_s6 + $0xa0] sm:$0xff]  ;;  %v3355_v10 = vrot.slane %v8236_v41, 1  ;;  %v6606_v6 = vld [vmem:[%s6707_s6 + $0xa8] sm:$0xff] }
 0x37e   : > { %3392 = vrot.lane.b32.xlu0 %v3348_v44, %s6639_s13  ;;  %v8272_v28 = vadd.f32 %v6604_v15, %v2829_v50  ;;  %v8275_v39 = vadd.f32 %v6605_v43, %v2832_v61  ;;  %v6287_v29 = vpop.f32.mrf.mxu1  ;;  %v2798_v44 = vadd.f32 %v6286_v62, %v8035_v46  ;;  %v9707_v50 = vshll.u32 %v8178_v16, 16 }
 0x37f   : > { %v2942_v35 = vor.u32 %v9703_v2, %v2939_v18  ;;  %v3072_v60 = vsel %vm6730_vm4, %v2939_v18, 0  ;;  %v3155_v31 = vsel %vm515_vm3, %v3150_v23, %v3154_v8  ;;  %v8284_v18 = vadd.f32 %v6606_v6, %v2830_v9 }
 0x380   : > { %9704 = vst [vmem:[#allocation24_spill] sm:$0xff] %v8272_v28  ;;  %9705 = vst [vmem:[#allocation25_spill] sm:$0xff] %v8275_v39  ;;  %v3140_v57 = vshll.u32 %v3072_v60, 16  ;;  %v2963_v49 = vor.u32 %v9707_v50, %v8242_v52  ;;  %v8291_v61 = vor.u32 %v2975_v24, %v8244_v1  ;;  %3286 = vrot.lane.b32.xlu1 %v3155_v31, %s6640_s16  ;;  %v3356_v16 = vrot.slane %v3073_v40, 1  ;;  %v2744_v43 = vpop.f32.mrf.mxu1 }
 0x381   : > { %v8281_v38 = vsel %vm6730_vm4, 0, %v2942_v35  ;;  %9706 = vst [vmem:[#allocation26_spill] sm:$0xff] %v8284_v18  ;;  %v8296_v8 = vpack.c.bf16 %v8275_v39, %v8254_v56  ;;  %v8300_v2 = vor.u32 %v2968_v32, %v8262_v21  ;;  %v8304_v46 = vpack.c.bf16 %v8284_v18, %v8272_v28 }
 0x382   : > { %v3135_v23 = vshll.u32 %v8281_v38, 16  ;;  %v2835_v62 = vadd.f32 %v7939_v34, %v2798_v44  ;;  %v3133_v24 = vshrl.u32 %v8281_v38, 16  ;;  %v3352_v9 = vrot.slane %v8281_v38, 1 }
 0x383   : > { %v2796_v15 = vadd.f32 %v2741_v5, %v8038_v55  ;;  %v2986_v31 = vshrl.u32 %v8296_v8, 16  ;;  %v3142_v32 = vrot.slane %v3140_v57, 1  ;;  %v3357_v6 = vsel %vm772_vm2, %v3355_v10, %v3356_v16  ;;  %v6607_v5 = vld [vmem:[%s6707_s6 + $0xd0] sm:$0xff] }
 0x384   : > { %v3137_v35 = vrot.slane %v3135_v23, 1  ;;  %v3353_v50 = vrot.slane %v3072_v60, 1  ;;  %v2989_v18 = vshll.u32 %v8296_v8, 16  ;;  %v2979_v44 = vshrl.u32 %v8304_v46, 16  ;;  %3398 = vrot.lane.b32.xlu1 %v3357_v6, %s6639_s13 }
 0x385   : > { %v8317_v23 = vsel %vm6730_vm4, 0, %v2963_v49  ;;  %v2982_v55 = vshll.u32 %v8304_v46, 16  ;;  %v8321_v39 = vadd.f32 %v6607_v5, %v2835_v62  ;;  %v3075_v60 = vsel %vm6730_vm4, %v8242_v52, 0 }
 0x386   : > { %v3138_v40 = vor.u32 %v3137_v35, %v3133_v24  ;;  %v3171_v57 = vshll.u32 %v8317_v23, 16  ;;  %v3354_v8 = vsel %vm772_vm2, %v3352_v9, %v3353_v50  ;;  %v2833_v16 = vadd.f32 %v7939_v34, %v2796_v15  ;;  %v6290_v24 = vpop.f32.mrf.mxu1 }
 0x387   : > { %9708 = vst [vmem:[#allocation27_spill] sm:$0xff] %v8321_v39  ;;  %v3176_v49 = vshll.u32 %v3075_v60, 16  ;;  %v3169_v46 = vshrl.u32 %v8317_v23, 16  ;;  %v2799_v35 = vadd.f32 %v6287_v29, %v8043_v63  ;;  %v9709_v52 = vshrl.u32 %v8190_v26, 16  ;;  %v6608_v29 = vld [vmem:[%s6707_s6 + $0xc0] sm:$0xff] }
 0x388   : > { %v3143_v10 = vsel %vm515_vm3, %v3138_v40, %v3142_v32  ;;  %v3173_v62 = vrot.slane %v3171_v57, 1  ;;  %v8335_v5 = vrot.slane %v2986_v31, 7  ;;  %v8337_v32 = vrot.slane %v2979_v44, 7 }
 0x389   : > { %3284 = vrot.lane.b32.xlu0 %v3143_v10, %s6640_s16  ;;  %v2953_v6 = vrot.slane %v9709_v52, 7  ;;  %v3178_v9 = vrot.slane %v3176_v49, 1  ;;  %v2797_v15 = vadd.f32 %v2744_v43, %v8046_v17  ;;  %v2836_v40 = vadd.f32 %v7939_v34, %v2799_v35  ;;  %v2757_v17 = vpop.f32.mrf.mxu1 }
 0x38a   : > { %v3174_v50 = vor.u32 %v3173_v62, %v3169_v46  ;;  %v9710_v10 = vshll.u32 %v8190_v26, 16  ;;  %v8346_v57 = vadd.f32 %v6608_v29, %v2833_v16  ;;  %v3361_v44 = vrot.slane %v8317_v23, 1  ;;  %v6609_v26 = vld [vmem:[%s6707_s6 + $0xd8] sm:$0xff] }
 0x38b   : > { %v3074_v63 = vsel %vm6730_vm4, %v2953_v6, 0  ;;  %v2834_v31 = vadd.f32 %v7939_v34, %v2797_v15  ;;  %v2802_v49 = vadd.f32 %v6290_v24, %v8050_v14  ;;  %v8354_v46 = vadd.f32 %v6609_v26, %v2836_v40  ;;  %v6610_v24 = vld [vmem:[%s6707_s6 + $0xc8] sm:$0xff]  ;;  %v6291_v29 = vpop.f32.mrf.mxu1 }
 0x38c   : > { %v2956_v28 = vor.u32 %v9710_v10, %v2953_v6  ;;  %9711 = vst [vmem:[#allocation28_spill] sm:$0xff] %v8346_v57  ;;  %v3179_v43 = vsel %vm515_vm3, %v3174_v50, %v3178_v9  ;;  %v3362_v16 = vrot.slane %v3075_v60, 1  ;;  %v3164_v14 = vshll.u32 %v3074_v63, 16 }
 0x38d   : > { %3396 = vrot.lane.b32.xlu0 %v3354_v8, %s6639_s13  ;;  %9712 = vst [vmem:[#allocation29_spill] sm:$0xff] %v8354_v46  ;;  %3290 = vrot.lane.b32.xlu1 %v3179_v43, %s6640_s16  ;;  %v8364_v6 = vadd.f32 %v6610_v24, %v2834_v31  ;;  %v2886_v8 = vpack.c.bf16 %v8354_v46, %v8321_v39  ;;  %v8378_v40 = vsel %vm6730_vm4, 0, %v8291_v61  ;;  %v3077_v10 = vsel %vm6730_vm4, %v8244_v1, 0  ;;  %v6611_v61 = vld [vmem:[%s6707_s6 + $0xf0] sm:$0xff] }
 0x38e   : > { %v8358_v62 = vsel %vm6730_vm4, 0, %v2956_v28  ;;  %v2839_v9 = vadd.f32 %v7939_v34, %v2802_v49  ;;  %v2800_v28 = vadd.f32 %v2757_v17, %v8053_v0  ;;  %v2991_v31 = vor.u32 %v2989_v18, %v8335_v5 }
 0x38f   : > { %v3157_v35 = vshrl.u32 %v8358_v62, 16  ;;  %v3159_v52 = vshll.u32 %v8358_v62, 16  ;;  %9713 = vst [vmem:[#allocation30_spill] sm:$0xff] %v8364_v6  ;;  %v3358_v15 = vrot.slane %v8358_v62, 1  ;;  %v8373_v50 = vpack.c.bf16 %v8364_v6, %v8346_v57 }
 0x390   : > { %v2984_v49 = vor.u32 %v2982_v55, %v8337_v32  ;;  %v3363_v0 = vsel %vm772_vm2, %v3361_v44, %v3362_v16  ;;  %v3359_v17 = vrot.slane %v3074_v63, 1  ;;  %v3000_v43 = vshrl.u32 %v2886_v8, 16  ;;  %v2760_v16 = vpop.f32.mrf.mxu1 }
 0x391   : > { %v3161_v60 = vrot.slane %v3159_v52, 1  ;;  %v3003_v26 = vshll.u32 %v2886_v8, 16  ;;  %v3166_v24 = vrot.slane %v3164_v14, 1  ;;  %3402 = vrot.lane.b32.xlu1 %v3363_v0, %s6639_s13  ;;  %v8388_v6 = vadd.f32 %v6611_v61, %v2839_v9 }
 0x392   : > { %v3360_v46 = vsel %vm772_vm2, %v3358_v15, %v3359_v17  ;;  %v3195_v1 = vshll.u32 %v8378_v40, 16  ;;  %v3200_v57 = vshll.u32 %v3077_v10, 16  ;;  %v2993_v55 = vshrl.u32 %v8373_v50, 16 }
 0x393   : > { %v3162_v52 = vor.u32 %v3161_v60, %v3157_v35  ;;  %9714 = vst [vmem:[#allocation31_spill] sm:$0xff] %v8388_v6  ;;  %v2837_v63 = vadd.f32 %v7939_v34, %v2800_v28  ;;  %v2803_v44 = vadd.f32 %v6291_v29, %v8063_v3  ;;  %v2996_v35 = vshll.u32 %v8373_v50, 16 }
 0x394   : > { %v3193_v14 = vshrl.u32 %v8378_v40, 16  ;;  %v3197_v8 = vrot.slane %v3195_v1, 1  ;;  %v8402_v9 = vsel %vm6730_vm4, 0, %v8300_v2  ;;  %v8404_v15 = vrot.slane %v3000_v43, 7  ;;  %v6613_v43 = vld [vmem:[%s6707_s6 + $0xf8] sm:$0xff] }
 0x395   : > { %v3167_v18 = vsel %vm515_vm3, %v3162_v52, %v3166_v24  ;;  %v3202_v28 = vrot.slane %v3200_v57, 1  ;;  %v2840_v3 = vadd.f32 %v7939_v34, %v2803_v44  ;;  %v3076_v60 = vsel %vm6730_vm4, %v8262_v21, 0  ;;  %v6612_v24 = vld [vmem:[%s6707_s6 + $0xe0] sm:$0xff] }
 0x396   : > { %3288 = vrot.lane.b32.xlu0 %v3167_v18, %s6640_s16  ;;  %v3198_v29 = vor.u32 %v3197_v8, %v3193_v14  ;;  %v3183_v50 = vshll.u32 %v8402_v9, 16  ;;  %v3188_v0 = vshll.u32 %v3076_v60, 16  ;;  %v2801_v17 = vadd.f32 %v2760_v16, %v8088_v48  ;;  %v6614_v8 = vld [vmem:[%s6707_s6 + $0xe8] sm:$0xff] }
 0x397   : > { %v8412_v52 = vrot.slane %v2993_v55, 7  ;;  %v8415_v2 = vadd.f32 %v6612_v24, %v2837_v63  ;;  %v8418_v57 = vadd.f32 %v6613_v43, %v2840_v3  ;;  %v3367_v61 = vrot.slane %v8378_v40, 1 }
 0x398   : > { %v3203_v21 = vsel %vm515_vm3, %v3198_v29, %v3202_v28  ;;  %v3181_v1 = vshrl.u32 %v8402_v9, 16  ;;  %v3185_v18 = vrot.slane %v3183_v50, 1  ;;  %v2838_v48 = vadd.f32 %v7939_v34, %v2801_v17 }
 0x399   : > { %9715 = vst [vmem:[#allocation32_spill] sm:$0xff] %v8415_v2  ;;  %9716 = vst [vmem:[#allocation33_spill] sm:$0xff] %v8418_v57  ;;  %v3005_v55 = vor.u32 %v3003_v26, %v8404_v15  ;;  %3294 = vrot.lane.b32.xlu1 %v3203_v21, %s6640_s16  ;;  %v2888_v63 = vpack.c.bf16 %v8418_v57, %v8388_v6  ;;  %v3368_v44 = vrot.slane %v3077_v10, 1  ;;  %v8431_v16 = vsel %vm6730_vm4, 0, %v2991_v31 }
 0x39a   : > { %3400 = vrot.lane.b32.xlu0 %v3360_v46, %s6639_s13  ;;  %v3186_v46 = vor.u32 %v3185_v18, %v3181_v1  ;;  %v3190_v14 = vrot.slane %v3188_v0, 1  ;;  %v8434_v28 = vadd.f32 %v6614_v8, %v2838_v48  ;;  %v3079_v34 = vsel %vm6730_vm4, %v8335_v5, 0 }
 0x39b   : > { %v3014_v26 = vshrl.u32 %v2888_v63, 16  ;;  %v3369_v3 = vsel %vm772_vm2, %v3367_v61, %v3368_v44  ;;  %v3364_v29 = vrot.slane %v8402_v9, 1  ;;  %v3219_v10 = vshll.u32 %v8431_v16, 16 }
 0x39c   : > { %9717 = vst [vmem:[#allocation34_spill] sm:$0xff] %v8434_v28  ;;  %v3191_v50 = vsel %vm515_vm3, %v3186_v46, %v3190_v14  ;;  %v2887_v31 = vpack.c.bf16 %v8434_v28, %v8415_v2  ;;  %v3224_v0 = vshll.u32 %v3079_v34, 16  ;;  %v8447_v17 = vsel %vm6730_vm4, 0, %v2984_v49  ;;  %v6574_v2 = vld [vmem:[%s9612_s3 + $0x70] sm:$0xff]  }
 0x39d   : > { %v3016_v24 = vrot.slane %v3014_v26, 7  ;;  %3406 = vrot.lane.b32.xlu1 %v3369_v3, %s6639_s13  ;;  %v3217_v5 = vshrl.u32 %v8431_v16, 16  ;;  %v3221_v43 = vrot.slane %v3219_v10, 1  ;;  %v3078_v61 = vsel %vm6730_vm4, %v8337_v32, 0  ;;  %6406 = vmatprep.subr.bf16.mxu1 %v6574_v2 }
 0x39e   : > { %3292 = vrot.lane.b32.xlu0 %v3191_v50, %s6640_s16  ;;  %v2998_v21 = vor.u32 %v2996_v35, %v8412_v52  ;;  %v3007_v1 = vshrl.u32 %v2887_v31, 16  ;;  %v3365_v18 = vrot.slane %v3076_v60, 1  ;;  %v3207_v48 = vshll.u32 %v8447_v17, 16 }
 0x39f   : > { %v3017_v49 = vshll.u32 %v2888_v63, 16  ;;  %v3222_v44 = vor.u32 %v3221_v43, %v3217_v5  ;;  %v3226_v46 = vrot.slane %v3224_v0, 1  ;;  %v3212_v14 = vshll.u32 %v3078_v61, 16 }
 0x3a0   : > { %v3010_v8 = vshll.u32 %v2887_v31, 16  ;;  %v3366_v26 = vsel %vm772_vm2, %v3364_v29, %v3365_v18  ;;  %v3205_v3 = vshrl.u32 %v8447_v17, 16  ;;  %v3209_v10 = vrot.slane %v3207_v48, 1 }
 0x3a1   : > { %v3019_v50 = vor.u32 %v3017_v49, %v3016_v24  ;;  %v3227_v32 = vsel %vm515_vm3, %v3222_v44, %v3226_v46  ;;  %v3373_v35 = vrot.slane %v8431_v16, 1  ;;  %v8464_v60 = vsel %vm6730_vm4, 0, %v3005_v55 }
 0x3a2   : > { %3404 = vrot.lane.b32.xlu0 %v3366_v26, %s6639_s13  ;;  %v3009_v63 = vrot.slane %v3007_v1, 7  ;;  %3298 = vrot.lane.b32.xlu1 %v3227_v32, %s6640_s16  ;;  %v3210_v31 = vor.u32 %v3209_v10, %v3205_v3  ;;  %v3214_v0 = vrot.slane %v3212_v14, 1  ;;  %v3081_v29 = vsel %vm6730_vm4, %v8404_v15, 0 }
 0x3a3   : > { %v3374_v5 = vrot.slane %v3079_v34, 1  ;;  %v3370_v43 = vrot.slane %v8447_v17, 1  ;;  %v3243_v18 = vshll.u32 %v8464_v60, 16  ;;  %v3248_v48 = vshll.u32 %v3081_v29, 16 }
 0x3a4   : > { %v3215_v49 = vsel %vm515_vm3, %v3210_v31, %v3214_v0  ;;  %v3371_v44 = vrot.slane %v3078_v61, 1  ;;  %v8475_v55 = vsel %vm6730_vm4, 0, %v2998_v21  ;;  %v3080_v1 = vsel %vm6730_vm4, %v8412_v52, 0 }
 0x3a5   : > { %v3375_v15 = vsel %vm772_vm2, %v3373_v35, %v3374_v5  ;;  %v3241_v34 = vshrl.u32 %v8464_v60, 16  ;;  %v3245_v46 = vrot.slane %v3243_v18, 1  ;;  %v3231_v14 = vshll.u32 %v8475_v55, 16 }
 0x3a6   : > { %3296 = vrot.lane.b32.xlu0 %v3215_v49, %s6640_s16  ;;  %v3012_v26 = vor.u32 %v3010_v8, %v3009_v63  ;;  %3410 = vrot.lane.b32.xlu1 %v3375_v15, %s6639_s13  ;;  %v3250_v61 = vrot.slane %v3248_v48, 1  ;;  %v3229_v21 = vshrl.u32 %v8475_v55, 16  ;;  %v3236_v3 = vshll.u32 %v3080_v1, 16 }
 0x3a7   : > { %v3246_v10 = vor.u32 %v3245_v46, %v3241_v34  ;;  %v3233_v32 = vrot.slane %v3231_v14, 1  ;;  %v8488_v52 = vsel %vm6730_vm4, 0, %v3019_v50  ;;  %v3083_v35 = vsel %vm6730_vm4, %v3016_v24, 0 }
 0x3a8   : > { %v3372_v31 = vsel %vm772_vm2, %v3370_v43, %v3371_v44  ;;  %v3238_v0 = vrot.slane %v3236_v3, 1  ;;  %v3379_v8 = vrot.slane %v8464_v60, 1  ;;  %v3267_v48 = vshll.u32 %v8488_v52, 16 }
 0x3a9   : > { %v3251_v5 = vsel %vm515_vm3, %v3246_v10, %v3250_v61  ;;  %v3234_v18 = vor.u32 %v3233_v32, %v3229_v21  ;;  %v3272_v49 = vshll.u32 %v3083_v35, 16  ;;  %v8500_v50 = vsel %vm6730_vm4, 0, %v3012_v26 }
 0x3aa   : > { %3408 = vrot.lane.b32.xlu0 %v3372_v31, %s6639_s13  ;;  %3302 = vrot.lane.b32.xlu1 %v3251_v5, %s6640_s16  ;;  %v3082_v24 = vsel %vm6730_vm4, %v3009_v63, 0  ;;  %v3380_v44 = vrot.slane %v3081_v29, 1  ;;  %v3265_v15 = vshrl.u32 %v8488_v52, 16  ;;  %v3269_v34 = vrot.slane %v3267_v48, 1 }
 0x3ab   : > { %v3239_v43 = vsel %vm515_vm3, %v3234_v18, %v3238_v0  ;;  %v3376_v46 = vrot.slane %v8475_v55, 1  ;;  %v3255_v14 = vshll.u32 %v8500_v50, 16  ;;  %v3260_v61 = vshll.u32 %v3082_v24, 16 }
 0x3ac   : > { %v3381_v21 = vsel %vm772_vm2, %v3379_v8, %v3380_v44  ;;  %v3270_v26 = vor.u32 %v3269_v34, %v3265_v15  ;;  %v3274_v3 = vrot.slane %v3272_v49, 1  ;;  %v3377_v63 = vrot.slane %v3080_v1, 1 }
 0x3ad   : > { %v3253_v10 = vshrl.u32 %v8500_v50, 16  ;;  %v3257_v29 = vrot.slane %v3255_v14, 1  ;;  %v3262_v5 = vrot.slane %v3260_v61, 1  ;;  %v3385_v18 = vrot.slane %v8488_v52, 1 }
 0x3ae   : > { %3300 = vrot.lane.b32.xlu0 %v3239_v43, %s6640_s16  ;;  %3414 = vrot.lane.b32.xlu1 %v3381_v21, %s6639_s13  ;;  %v3275_v32 = vsel %vm515_vm3, %v3270_v26, %v3274_v3  ;;  %v3378_v31 = vsel %vm772_vm2, %v3376_v46, %v3377_v63  ;;  %v3386_v48 = vrot.slane %v3083_v35, 1  ;;  %v3382_v1 = vrot.slane %v8500_v50, 1 }
 0x3af   : > { %v3258_v0 = vor.u32 %v3257_v29, %v3253_v10  ;;  %v3383_v43 = vrot.slane %v3082_v24, 1  ;;  %v6572_v24 = vld [vmem:[%s9610_s1 + $0x80] sm:$0xff]  }
 0x3b0   : > { %v3387_v49 = vsel %vm772_vm2, %v3385_v18, %v3386_v48 }
 0x3b1   : > { %v3263_v8 = vsel %vm515_vm3, %v3258_v0, %v3262_v5  ;;  %v3384_v44 = vsel %vm772_vm2, %v3382_v1, %v3383_v43 }
 0x3b2   : > { %3412 = vrot.lane.b32.xlu0 %v3378_v31, %s6639_s13  ;;  %3306 = vrot.lane.b32.xlu1 %v3275_v32, %s6640_s16 }
 0x3b6   : > { %3304 = vrot.lane.b32.xlu0 %v3263_v8, %s6640_s16  ;;  %3418 = vrot.lane.b32.xlu1 %v3387_v49, %s6639_s13 }
 0x3ba   : > { %3416 = vrot.lane.b32.xlu0 %v3384_v44, %s6639_s13 }
 0x3d7   : > { %v3279_v15 = vpop.permute.xlu1 %3278 }
 0x3d8   : > { %v3423_v61 = vsel %vm853_vm5, %v8077_v33, %v3279_v15  ;;  %v6573_v33 = vld [vmem:[%s9610_s1 + $0x78] sm:$0xff]  }
 0x3db   : > { %v3391_v46 = vpop.permute.xlu1 %3390 }
 0x3dc   : > { %v3277_v34 = vpop.permute.xlu0 %3276  ;;  %v8533_v26 = vsel %vm886_vm6, %v3423_v61, %v3391_v46 }
 0x3dd   : > { %v3421_v14 = vsel %vm853_vm5, %v8108_v12, %v3277_v34 }
 0x3e0   : > { %v3389_v35 = vpop.permute.xlu0 %3388 }
 0x3e1   : > { %v3453_v21 = vsel %vm886_vm6, %v3421_v14, %v3389_v35 }
 0x3e2   : > { %6298 = vmatprep.mubr.msk.bf16.mxu0 %vm937_vm7, %v3453_v21  ;;  %6337 = vmatmul.mubr.msk.bf16.vlgmr.msra.gmra.mxu1 %vm937_vm7, %v3453_v21 }
 0x3e3   : > { %6299 = vmatmul.mubr.msk.bf16.vlgmr.msra.gmra.mxu0 %vm937_vm7, %v8533_v26  ;;  %6340 = vmatprep.mubr.msk.bf16.mxu1 %vm937_vm7, %v8533_v26 }
 0x3e4   : > { %6369 = vmatpush3.bf16.msra.mxu0 %v8119_v4  ;;  %6407 = vmatpush3.bf16.msra.mxu1 %v6574_v2  ;;  %v6578_v2 = vld [vmem:[%s9612_s3 + $0x50] sm:$0xff]  }
 0x3e5   : > { %6370 = vmatprep.subr.bf16.mxu0 %v6572_v24  ;;  %v3283_v12 = vpop.permute.xlu1 %3282  ;;  %6408 = vmatprep.subr.bf16.mxu1 %v6575_v45 }
 0x3e6   : > { %v3427_v32 = vsel %vm853_vm5, %v8167_v20, %v3283_v12 }
 0x3e8   : > { %6371 = vmatpush3.bf16.msra.mxu0 %v6572_v24  ;;  %6409 = vmatpush3.bf16.msra.mxu1 %v6575_v45 }
 0x3e9   : > { %6372 = vmatprep.subr.bf16.mxu0 %v6573_v33  ;;  %v3395_v63 = vpop.permute.xlu1 %3394  ;;  %6410 = vmatprep.subr.bf16.mxu1 %v6576_v25 }
 0x3ea   : > { %v8553_v31 = vsel %vm886_vm6, %v3427_v32, %v3395_v63 }
 0x3ec   : > { %6373 = vmatpush3.bf16.msra.mxu0 %v6573_v33  ;;  %v3281_v3 = vpop.permute.xlu0 %3280  ;;  %6411 = vmatpush3.bf16.msra.mxu1 %v6576_v25 }
 0x3ed   : > { %v3425_v10 = vsel %vm853_vm5, %v8212_v7, %v3281_v3  ;;  %6444 = vmatprep.subr.bf16.mxu0 %v6577_v58 }
 0x3f0   : > { %v3393_v29 = vpop.permute.xlu0 %3392 }
 0x3f1   : > { %v8550_v4 = vsel %vm886_vm6, %v3425_v10, %v3393_v29 }
 0x3f2   : > { %6302 = vmatprep.mubr.msk.bf16.mxu0 %vm937_vm7, %v8550_v4  ;;  %6341 = vmatmul.mubr.msk.bf16.gmra.mxu1 %vm937_vm7, %v8550_v4  ;;  %v3287_v0 = vpop.permute.xlu1 %3286 }
 0x3f3   : > { %6303 = vmatmul.mubr.msk.bf16.gmra.mxu0 %vm937_vm7, %v8553_v31  ;;  %6344 = vmatprep.mubr.msk.bf16.mxu1 %vm937_vm7, %v8553_v31  ;;  %v3431_v8 = vsel %vm853_vm5, %v8236_v41, %v3287_v0 }
 0x3f6   : > { %v3399_v20 = vpop.permute.xlu1 %3398 }
 0x3f7   : > { %v8571_v49 = vsel %vm886_vm6, %v3431_v8, %v3399_v20 }
 0x3fb   : > { %v3285_v7 = vpop.permute.xlu0 %3284 }
 0x3fc   : > { %v3429_v5 = vsel %vm853_vm5, %v8281_v38, %v3285_v7 }
 0x3ff   : > { %v3397_v18 = vpop.permute.xlu0 %3396  ;;  %v3291_v1 = vpop.permute.xlu1 %3290 }
 0x400   : > { %v8568_v48 = vsel %vm886_vm6, %v3429_v5, %v3397_v18  ;;  %v3435_v15 = vsel %vm853_vm5, %v8317_v23, %v3291_v1 }
 0x401   : > { %6306 = vmatprep.mubr.msk.bf16.mxu0 %vm937_vm7, %v8568_v48  ;;  %6345 = vmatmul.mubr.msk.bf16.gmra.mxu1 %vm937_vm7, %v8568_v48 }
 0x402   : > { %6307 = vmatmul.mubr.msk.bf16.gmra.mxu0 %vm937_vm7, %v8571_v49  ;;  %6348 = vmatprep.mubr.msk.bf16.mxu1 %vm937_vm7, %v8571_v49 }
 0x403   : > { %v3403_v41 = vpop.permute.xlu1 %3402 }
 0x404   : > { %v3467_v14 = vsel %vm886_vm6, %v3435_v15, %v3403_v41 }
 0x408   : > { %v3289_v38 = vpop.permute.xlu0 %3288 }
 0x409   : > { %v3433_v43 = vsel %vm853_vm5, %v8358_v62, %v3289_v38 }
 0x40b   : > { %v3295_v46 = vpop.permute.xlu1 %3294 }
 0x40c   : > { %v3401_v44 = vpop.permute.xlu0 %3400  ;;  %v3439_v23 = vsel %vm853_vm5, %v8378_v40, %v3295_v46 }
 0x40d   : > { %v3465_v34 = vsel %vm886_vm6, %v3433_v43, %v3401_v44 }
 0x40e   : > { %6310 = vmatprep.mubr.msk.bf16.mxu0 %vm937_vm7, %v3465_v34  ;;  %6349 = vmatmul.mubr.msk.bf16.gmra.mxu1 %vm937_vm7, %v3465_v34 }
 0x40f   : > { %6311 = vmatmul.mubr.msk.bf16.gmra.mxu0 %vm937_vm7, %v3467_v14  ;;  %6352 = vmatprep.mubr.msk.bf16.mxu1 %vm937_vm7, %v3467_v14  ;;  %v3407_v61 = vpop.permute.xlu1 %3406 }
 0x410   : > { %v3293_v35 = vpop.permute.xlu0 %3292  ;;  %v3471_v12 = vsel %vm886_vm6, %v3439_v23, %v3407_v61 }
 0x411   : > { %v3437_v62 = vsel %vm853_vm5, %v8402_v9, %v3293_v35 }
 0x414   : > { %v3405_v21 = vpop.permute.xlu0 %3404  ;;  %v3299_v33 = vpop.permute.xlu1 %3298 }
 0x415   : > { %v3469_v24 = vsel %vm886_vm6, %v3437_v62, %v3405_v21  ;;  %v3443_v40 = vsel %vm853_vm5, %v8431_v16, %v3299_v33 }
 0x416   : > { %6314 = vmatprep.mubr.msk.bf16.mxu0 %vm937_vm7, %v3469_v24  ;;  %6353 = vmatmul.mubr.msk.bf16.gmra.mxu1 %vm937_vm7, %v3469_v24 }
 0x417   : > { %6315 = vmatmul.mubr.msk.bf16.gmra.mxu0 %vm937_vm7, %v3471_v12  ;;  %6356 = vmatprep.mubr.msk.bf16.mxu1 %vm937_vm7, %v3471_v12 }
 0x418   : > { %v3297_v3 = vpop.permute.xlu0 %3296  ;;  %v3411_v63 = vpop.permute.xlu1 %3410 }
 0x419   : > { %v3441_v9 = vsel %vm853_vm5, %v8447_v17, %v3297_v3  ;;  %v3475_v0 = vsel %vm886_vm6, %v3443_v40, %v3411_v63 }
 0x41c   : > { %v3409_v10 = vpop.permute.xlu0 %3408  ;;  %v3303_v32 = vpop.permute.xlu1 %3302 }
 0x41d   : > { %v3473_v29 = vsel %vm886_vm6, %v3441_v9, %v3409_v10  ;;  %v3447_v16 = vsel %vm853_vm5, %v8464_v60, %v3303_v32 }
 0x41e   : > { %6318 = vmatprep.mubr.msk.bf16.mxu0 %vm937_vm7, %v3473_v29  ;;  %6357 = vmatmul.mubr.msk.bf16.gmra.mxu1 %vm937_vm7, %v3473_v29 }
 0x41f   : > { %6319 = vmatmul.mubr.msk.bf16.gmra.mxu0 %vm937_vm7, %v3475_v0  ;;  %6360 = vmatprep.mubr.msk.bf16.mxu1 %vm937_vm7, %v3475_v0 }
 0x420   : > { %v3301_v20 = vpop.permute.xlu0 %3300  ;;  %v3415_v7 = vpop.permute.xlu1 %3414 }
 0x421   : > { %v3445_v17 = vsel %vm853_vm5, %v8475_v55, %v3301_v20  ;;  %v3479_v1 = vsel %vm886_vm6, %v3447_v16, %v3415_v7 }
 0x424   : > { %v3413_v5 = vpop.permute.xlu0 %3412  ;;  %v3307_v8 = vpop.permute.xlu1 %3306 }
 0x425   : > { %v3477_v18 = vsel %vm886_vm6, %v3445_v17, %v3413_v5  ;;  %v3451_v60 = vsel %vm853_vm5, %v8488_v52, %v3307_v8  ;;  %v9718_v52 = vmov 0  }
 0x426   : > { %6322 = vmatprep.mubr.msk.bf16.mxu0 %vm937_vm7, %v3477_v18  ;;  %6361 = vmatmul.mubr.msk.bf16.gmra.mxu1 %vm937_vm7, %v3477_v18 }
 0x427   : > { %6323 = vmatmul.mubr.msk.bf16.gmra.mxu0 %vm937_vm7, %v3479_v1  ;;  %6364 = vmatprep.mubr.msk.bf16.mxu1 %vm937_vm7, %v3479_v1 }
 0x428   : > { %v3305_v41 = vpop.permute.xlu0 %3304  ;;  %v3419_v38 = vpop.permute.xlu1 %3418 }
 0x429   : > { %v3449_v55 = vsel %vm853_vm5, %v8500_v50, %v3305_v41  ;;  %v3483_v15 = vsel %vm886_vm6, %v3451_v60, %v3419_v38 }
 0x42c   : > { %v3417_v43 = vpop.permute.xlu0 %3416 }
 0x42d   : > { %v3481_v44 = vsel %vm886_vm6, %v3449_v55, %v3417_v43 }
 0x42e   : > { %6326 = vmatprep.mubr.msk.bf16.mxu0 %vm937_vm7, %v3481_v44  ;;  %6365 = vmatmul.mubr.msk.bf16.gmra.mxu1 %vm937_vm7, %v3481_v44 }
 0x42f   : > { %6327 = vmatmul.mubr.msk.bf16.gmra.mxu0 %vm937_vm7, %v3483_v15 }
 0x430   : > { %6374 = vmatprep.mubr.msk.bf16.mxu0 %vm937_vm7, %v8533_v26 }
 0x437   : > { %6375 = vmatmul.mubr.msk.bf16.vlgmr.msra.gmra.mxu0 %vm937_vm7, %v8550_v4 }
 0x438   : > { %6378 = vmatprep.mubr.msk.bf16.mxu0 %vm937_vm7, %v8553_v31  ;;  %6445 = vmatpush3.bf16.msra.mxu0 %v6577_v58 }
 0x439   : > { %6446 = vmatprep.subr.bf16.mxu0 %v6578_v2 }
 0x43c   : > { %6447 = vmatpush3.bf16.msra.mxu0 %v6578_v2  ;;  %v8782_v2 = vld [vmem:[%s9611_s2 + $0x1] ss:$0 sm:$0xff] }
 0x43f   : > { %6379 = vmatmul.mubr.msk.bf16.gmra.mxu0 %vm937_vm7, %v8568_v48 }
 0x440   : > { %6382 = vmatprep.mubr.msk.bf16.mxu0 %vm937_vm7, %v8571_v49 }
 0x447   : > { %6383 = vmatmul.mubr.msk.bf16.gmra.mxu0 %vm937_vm7, %v3465_v34 }
 0x448   : > { %6386 = vmatprep.mubr.msk.bf16.mxu0 %vm937_vm7, %v3467_v14 }
 0x44f   : > { %6387 = vmatmul.mubr.msk.bf16.gmra.mxu0 %vm937_vm7, %v3469_v24 }
 0x450   : > { %6390 = vmatprep.mubr.msk.bf16.mxu0 %vm937_vm7, %v3471_v12 }
 0x457   : > { %6391 = vmatmul.mubr.msk.bf16.gmra.mxu0 %vm937_vm7, %v3473_v29 }
 0x458   : > { %6394 = vmatprep.mubr.msk.bf16.mxu0 %vm937_vm7, %v3475_v0 }
 0x45f   : > { %6395 = vmatmul.mubr.msk.bf16.gmra.mxu0 %vm937_vm7, %v3477_v18 }
 0x460   : > { %6398 = vmatprep.mubr.msk.bf16.mxu0 %vm937_vm7, %v3479_v1 }
 0x467   : > { %6399 = vmatmul.mubr.msk.bf16.gmra.mxu0 %vm937_vm7, %v3481_v44 }
 0x468   : > { %6402 = vmatprep.mubr.msk.bf16.mxu0 %vm937_vm7, %v3483_v15 }
 0x46f   : > { %6403 = vmatmul.mubr.bf16.gmra.mxu0 %v9718_v52 }
 0x470   : > { %6450 = vmatprep.mubr.bf16.mxu0 %v9718_v52 }
 0x4a2   : > { %v8652_v50 = vpop.f32.mrf.mxu1 }
 0x4a3   : > { %v8654_v26 = vpop.f32.mrf.mxu0 }
 0x4a4   : > { %v8656_v4 = vpop.f32.mrf.mxu1  ;;  %v3756_v58 = vadd.f32 %v8652_v50, %v8654_v26 }
 0x4a5   : > { %v8658_v31 = vpop.f32.mrf.mxu0 }
 0x4a6   : > { %v8660_v48 = vpop.f32.mrf.mxu1  ;;  %v3748_v37 = vadd.f32 %v8656_v4, %v8658_v31 }
 0x4a7   : > { %v8662_v49 = vpop.f32.mrf.mxu0 }
 0x4a8   : > { %v8664_v34 = vpop.f32.mrf.mxu1 }
 0x4a9   : > { %v8666_v46 = vpop.f32.mrf.mxu0 }
 0x4b2   : > { %v8668_v14 = vpop.f32.mrf.mxu1 }
 0x4b3   : > { %v8670_v35 = vpop.f32.mrf.mxu0 }
 0x4b4   : > { %v8672_v61 = vpop.f32.mrf.mxu1  ;;  %v3772_v26 = vadd.f32 %v8668_v14, %v8670_v35 }
 0x4b5   : > { %v8674_v62 = vpop.f32.mrf.mxu0 }
 0x4b6   : > { %v8676_v21 = vpop.f32.mrf.mxu1  ;;  %v3764_v4 = vadd.f32 %v8672_v61, %v8674_v62 }
 0x4b7   : > { %v8678_v23 = vpop.f32.mrf.mxu0 }
 0x4b8   : > { %v8680_v24 = vpop.f32.mrf.mxu1 }
 0x4b9   : > { %v8682_v33 = vpop.f32.mrf.mxu0 }
 0x4c1   : > { %v8684_v12 = vpop.f32.mrf.mxu1 }
 0x4c2   : > { %v8686_v3 = vpop.f32.mrf.mxu0 }
 0x4c3   : > { %v8688_v63 = vpop.f32.mrf.mxu1 }
 0x4c4   : > { %v8690_v9 = vpop.f32.mrf.mxu0 }
 0x4c5   : > { %v8692_v10 = vpop.f32.mrf.mxu1 }
 0x4c6   : > { %v8694_v40 = vpop.f32.mrf.mxu0 }
 0x4c7   : > { %v8696_v29 = vpop.f32.mrf.mxu1 }
 0x4c8   : > { %v8698_v32 = vpop.f32.mrf.mxu0 }
 0x4c9   : > { %v8811_v35 = vadd.f32 %v8696_v29, %v8698_v32 }
 0x4ce   : > { %v8700_v0 = vpop.f32.mrf.mxu1 }
 0x4cf   : > { %v8702_v20 = vpop.f32.mrf.mxu0 }
 0x4d0   : > { %v8704_v7 = vpop.f32.mrf.mxu1  ;;  %v8815_v61 = vadd.f32 %v8700_v0, %v8702_v20 }
 0x4d1   : > { %v8706_v17 = vpop.f32.mrf.mxu0 }
 0x4d2   : > { %v8708_v5 = vpop.f32.mrf.mxu1  ;;  %v8819_v62 = vadd.f32 %v8704_v7, %v8706_v17 }
 0x4d3   : > { %v8710_v16 = vpop.f32.mrf.mxu0 }
 0x4d4   : > { %v8712_v18 = vpop.f32.mrf.mxu1 }
 0x4d5   : > { %v8714_v8 = vpop.f32.mrf.mxu0 }
 0x4d6   : > { %v8716_v1 = vpop.f32.mrf.mxu1 }
 0x4d7   : > { %v8718_v41 = vpop.f32.mrf.mxu0 }
 0x4d8   : > { %v8720_v38 = vpop.f32.mrf.mxu1 }
 0x4d9   : > { %v8722_v55 = vpop.f32.mrf.mxu0 }
 0x4da   : > { %v8726_v60 = vpop.f32.mrf.mxu1 }
 0x4db   : > { %v8724_v43 = vpop.f32.mrf.mxu0 }
 0x4dc   : > { %v8732_v28 = vpop.f32.mrf.mxu1 }
 0x4dd   : > { %v8728_v44 = vpop.f32.mrf.mxu0 }
 0x4de   : > { %v8741_v39 = vpop.f32.mrf.mxu1  ;;  %v8844_v7 = vadd.f32 %v8732_v28, %v8728_v44 }
 0x4df   : > { %v8730_v15 = vpop.f32.mrf.mxu0 }
 0x4e0   : > { %v8756_v13 = vpop.f32.mrf.mxu1  ;;  %v8848_v17 = vadd.f32 %v8741_v39, %v8730_v15 }
 0x4e1   : > { %v8734_v57 = vpop.f32.mrf.mxu0 }
 0x4e2   : > { %v6359_v30 = vpop.f32.mrf.mxu1 }
 0x4e3   : > { %v8739_v6 = vpop.f32.mrf.mxu0 }
 0x4e4   : > { %v3830_v54 = vpop.f32.mrf.mxu1 }
 0x4e5   : > { %v8743_v56 = vpop.f32.mrf.mxu0 }
 0x4e6   : > { %v6362_v51 = vpop.f32.mrf.mxu1 }
 0x4e7   : > { %v8745_v53 = vpop.f32.mrf.mxu0 }
 0x4e8   : > { %v3843_v52 = vpop.f32.mrf.mxu1 }
 0x4e9   : > { %v8761_v59 = vpop.f32.mrf.mxu0 }
 0x4ea   : > { %v6363_v31 = vpop.f32.mrf.mxu1  ;;  %v8864_v39 = vadd.f32 %v3843_v52, %v8761_v59 }
 0x4eb   : > { %v8763_v47 = vpop.f32.mrf.mxu0 }
 0x4ed   : > { %v8765_v11 = vpop.f32.mrf.mxu0 }
 0x4ef   : > { %v8767_v22 = vpop.f32.mrf.mxu0 }
 0x4f0   : > { %9719 = vst [vmem:[#allocation35_spill] sm:$0xff] %v8767_v22  ;;  %v3775_v22 = vadd.f32 %v8676_v21, %v8678_v23  ;;  %v8823_v21 = vadd.f32 %v8708_v5, %v8710_v16  ;;  %v3846_v23 = vpop.f32.mrf.mxu1  ;;  %v8852_v5 = vadd.f32 %v8756_v13, %v8734_v57  ;;  %v8855_v16 = vadd.f32 %v6359_v30, %v8739_v6 }
 0x4f1   : > { %v8769_v36 = vpop.f32.mrf.mxu0 }
 0x4f2   : > { %9720 = vst [vmem:[#allocation36_spill] sm:$0xff] %v8769_v36  ;;  %v6366_v28 = vpop.f32.mrf.mxu1 }
 0x4f3   : > { %v8771_v19 = vpop.f32.mrf.mxu0 }
 0x4f4   : > { %9721 = vst [vmem:[#allocation37_spill] sm:$0xff] %v8771_v19  ;;  %v3759_v19 = vadd.f32 %v8660_v48, %v8662_v49  ;;  %v8801_v48 = vadd.f32 %v8688_v63, %v8690_v9  ;;  %v8836_v63 = vadd.f32 %v8720_v38, %v8722_v55  ;;  %v8840_v9 = vadd.f32 %v8726_v60, %v8724_v43  ;;  %v3859_v44 = vpop.f32.mrf.mxu1 }
 0x4f5   : > { %v8773_v42 = vpop.f32.mrf.mxu0 }
 0x4f6   : > { %9722 = vst [vmem:[#allocation38_spill] sm:$0xff] %v8773_v42  ;;  %v3751_v42 = vadd.f32 %v8664_v34, %v8666_v46  ;;  %v8805_v34 = vadd.f32 %v8692_v10, %v8694_v40 }
 0x4f7   : > { %v6376_v45 = vpop.f32.mrf.mxu0 }
 0x4f8   : > { %v4055_v25 = vadd.f32 %v6376_v45, %v3756_v58 }
 0x4f9   : > { %v3926_v36 = vpop.f32.mrf.mxu0 }
 0x4fa   : > { %v4053_v27 = vadd.f32 %v3926_v36, %v3748_v37  ;;  %v4092_v58 = vadd.f32 %v8782_v2, %v4055_v25  ;;  %v3767_v37 = vadd.f32 %v8680_v24, %v8682_v33  ;;  %v3788_v36 = vadd.f32 %v8684_v12, %v8686_v3 }
 0x4fb   : > { %v6377_v50 = vpop.f32.mrf.mxu0  ;;  %v8832_v3 = vadd.f32 %v8716_v1, %v8718_v41  ;;  %v8861_v1 = vadd.f32 %v6362_v51, %v8745_v53  ;;  %v8872_v51 = vadd.f32 %v3846_v23, %v8765_v11 }
 0x4fc   : > { %v4056_v45 = vadd.f32 %v6377_v50, %v3759_v19  ;;  %v4090_v19 = vadd.f32 %v8782_v2, %v4053_v27  ;;  %v4124_v24 = vmax.f32 %v4092_v58, 0.0 }
 0x4fd   : > { %v3929_v49 = vpop.f32.mrf.mxu0 }
 0x4fe   : > { %v4093_v46 = vadd.f32 %v8782_v2, %v4056_v45  ;;  %v4054_v14 = vadd.f32 %v3929_v49, %v3751_v42  ;;  %v8827_v42 = vadd.f32 %v8712_v18, %v8714_v8  ;;  %v4122_v29 = vmax.f32 %v4090_v19, 0.0 }
 0x4ff   : > { %v6380_v27 = vpop.f32.mrf.mxu0  ;;  %v8858_v8 = vadd.f32 %v3830_v54, %v8743_v56  ;;  %v8869_v56 = vadd.f32 %v6363_v31, %v8763_v47 }
 0x500   : > { %v4125_v33 = vmax.f32 %v4093_v46, 0.0  ;;  %v4091_v12 = vadd.f32 %v8782_v2, %v4054_v14  ;;  %v4059_v10 = vadd.f32 %v6380_v27, %v3772_v26  ;;  %v9723_v26 = vld [vmem:[#allocation35_spill] sm:$0xff]  ;;  %v9725_v14 = vld [vmem:[#allocation36_spill] sm:$0xff] }
 0x501   : > { %v3942_v40 = vpop.f32.mrf.mxu0  ;;  %v8885_v27 = vadd.f32 %v3859_v44, %v9725_v14 }
 0x502   : > { %v4155_v32 = vpack.c.bf16 %v4125_v33, %v4124_v24  ;;  %v4123_v0 = vmax.f32 %v4091_v12, 0.0  ;;  %v4057_v20 = vadd.f32 %v3942_v40, %v3764_v4  ;;  %v4096_v55 = vadd.f32 %v8782_v2, %v4059_v10 }
 0x503   : > { %v6381_v18 = vpop.f32.mrf.mxu0  ;;  %v8877_v4 = vadd.f32 %v6366_v28, %v9723_v26  ;;  %v6367_v28 = vpop.f32.mrf.mxu1 }
 0x504   : > { %v4197_v41 = vshrl.u32 %v4155_v32, 16  ;;  %v4154_v38 = vpack.c.bf16 %v4123_v0, %v4122_v29  ;;  %v4094_v13 = vadd.f32 %v8782_v2, %v4057_v20  ;;  %v4060_v57 = vadd.f32 %v6381_v18, %v3775_v22 }
 0x505   : > { %v3945_v30 = vpop.f32.mrf.mxu0  ;;  %v4200_v43 = vshll.u32 %v4155_v32, 16  ;;  %v4128_v58 = vmax.f32 %v4096_v55, 0.0 }
 0x506   : > { %v4199_v6 = vrot.slane %v4197_v41, 7  ;;  %v4190_v60 = vshrl.u32 %v4154_v38, 16  ;;  %v4058_v54 = vadd.f32 %v3945_v30, %v3767_v37  ;;  %v4193_v53 = vshll.u32 %v4154_v38, 16 }
 0x507   : > { %v4097_v59 = vadd.f32 %v8782_v2, %v4060_v57  ;;  %v6384_v52 = vpop.f32.mrf.mxu0  ;;  %v4126_v45 = vmax.f32 %v4094_v13, 0.0  ;;  %v6579_v13 = vld [vmem:[%s9612_s3 + $0x48] sm:$0xff]  }
 0x508   : > { %v4202_v15 = vor.u32 %v4200_v43, %v4199_v6  ;;  %v4192_v25 = vrot.slane %v4190_v60, 7  ;;  %v4095_v22 = vadd.f32 %v8782_v2, %v4058_v54  ;;  %v4063_v50 = vadd.f32 %v6384_v52, %v3788_v36  ;;  %6448 = vmatprep.subr.bf16.mxu0 %v6579_v13 }
 0x509   : > { %v4129_v47 = vmax.f32 %v4097_v59, 0.0  ;;  %v3958_v31 = vpop.f32.mrf.mxu0  ;;  %v8892_v40 = vsel %vm6730_vm4, %v4199_v6, 0  ;;  %6449 = vmatpush3.bf16.msra.mxu0 %v6579_v13 }
 0x50a   : > { %v8881_v11 = vsel %vm6730_vm4, 0, %v4202_v15  ;;  %v4195_v49 = vor.u32 %v4193_v53, %v4192_v25  ;;  %v4127_v19 = vmax.f32 %v4095_v22, 0.0  ;;  %v4100_v46 = vadd.f32 %v8782_v2, %v4063_v50 }
 0x50b   : > { %v4157_v23 = vpack.c.bf16 %v4129_v47, %v4128_v58  ;;  %v4061_v36 = vadd.f32 %v3958_v31, %v8801_v48  ;;  %v6385_v24 = vpop.f32.mrf.mxu0  ;;  %v4380_v33 = vshll.u32 %v8881_v11, 16  ;;  %v4378_v29 = vshrl.u32 %v8881_v11, 16 }
 0x50c   : > { %v4156_v12 = vpack.c.bf16 %v4127_v19, %v4126_v45  ;;  %v4064_v10 = vadd.f32 %v6385_v24, %v8805_v34  ;;  %v8897_v32 = vsel %vm6730_vm4, 0, %v4195_v49  ;;  %v4132_v20 = vmax.f32 %v4100_v46, 0.0 }
 0x50d   : > { %v4211_v0 = vshrl.u32 %v4157_v23, 16  ;;  %v3961_v18 = vpop.f32.mrf.mxu0  ;;  %v4382_v48 = vrot.slane %v4380_v33, 1  ;;  %v4098_v38 = vadd.f32 %v8782_v2, %v4061_v36  ;;  %v4214_v30 = vshll.u32 %v4157_v23, 16  ;;  %v8925_v23 = vld [vmem:[%s9612_s3 + $0x88] sm:$0xff]  }
 0x50e   : > { %v4204_v41 = vshrl.u32 %v4156_v12, 16  ;;  %v4101_v34 = vadd.f32 %v8782_v2, %v4064_v10  ;;  %v4062_v55 = vadd.f32 %v3961_v18, %v8811_v35  ;;  %v4385_v60 = vshll.u32 %v8892_v40, 16  ;;  %v9726_v35 = vld [vmem:[#allocation37_spill] sm:$0xff]  ;;  %6482 = vmatprep.subr.bf16.mxu1 %v8925_v23 }
 0x50f   : > { %v8905_v57 = vrot.slane %v4211_v0, 7  ;;  %v6388_v6 = vpop.f32.mrf.mxu0  ;;  %v4383_v43 = vor.u32 %v4382_v48, %v4378_v29  ;;  %v8913_v44 = vadd.f32 %v6367_v28, %v9726_v35  ;;  %v4207_v22 = vshll.u32 %v4156_v12, 16 }
 0x510   : > { %v8908_v54 = vrot.slane %v4204_v41, 7  ;;  %v4133_v53 = vmax.f32 %v4101_v34, 0.0  ;;  %v4099_v59 = vadd.f32 %v8782_v2, %v4062_v55  ;;  %v4067_v52 = vadd.f32 %v6388_v6, %v8815_v61 }
 0x511   : > { %v4216_v15 = vor.u32 %v4214_v30, %v8905_v57  ;;  %v3974_v50 = vpop.f32.mrf.mxu0  ;;  %v4387_v26 = vrot.slane %v4385_v60, 1  ;;  %v4130_v58 = vmax.f32 %v4098_v38, 0.0  ;;  %v4349_v46 = vsel %vm6730_vm4, %v4192_v25, 0  ;;  %v3862_v60 = vpop.f32.mrf.mxu1 }
 0x512   : > { %v4159_v45 = vpack.c.bf16 %v4133_v53, %v4132_v20  ;;  %v4131_v47 = vmax.f32 %v4099_v59, 0.0  ;;  %v4104_v31 = vadd.f32 %v8782_v2, %v4067_v52  ;;  %v4065_v49 = vadd.f32 %v3974_v50, %v8819_v62 }
 0x513   : > { %v4388_v19 = vsel %vm515_vm3, %v4383_v43, %v4387_v26  ;;  %v6389_v61 = vpop.f32.mrf.mxu0  ;;  %v4368_v14 = vshll.u32 %v8897_v32, 16  ;;  %v4209_v36 = vor.u32 %v4207_v22, %v8908_v54  ;;  %v4366_v62 = vshrl.u32 %v8897_v32, 16 }
 0x514   : > { %v4225_v24 = vshrl.u32 %v4159_v45, 16  ;;  %v4158_v33 = vpack.c.bf16 %v4131_v47, %v4130_v58  ;;  %4559 = vrot.lane.b32.xlu1 %v4388_v19, %s6640_s16  ;;  %v8932_v12 = vsel %vm6730_vm4, 0, %v4216_v15  ;;  %v4228_v25 = vshll.u32 %v4159_v45, 16 }
 0x515   : > { %v4068_v10 = vadd.f32 %v6389_v61, %v8823_v21  ;;  %v4370_v29 = vrot.slane %v4368_v14, 1  ;;  %v3977_v0 = vpop.f32.mrf.mxu0  ;;  %v4136_v48 = vmax.f32 %v4104_v31, 0.0  ;;  %v4373_v28 = vshll.u32 %v4349_v46, 16 }
 0x516   : > { %v8936_v20 = vrot.slane %v4225_v24, 7  ;;  %v4218_v18 = vshrl.u32 %v4158_v33, 16  ;;  %v4102_v41 = vadd.f32 %v8782_v2, %v4065_v49  ;;  %v4066_v55 = vadd.f32 %v3977_v0, %v8827_v42 }
 0x517   : > { %v4105_v38 = vadd.f32 %v8782_v2, %v4068_v10  ;;  %v4371_v34 = vor.u32 %v4370_v29, %v4366_v62  ;;  %v6392_v13 = vpop.f32.mrf.mxu0  ;;  %v4221_v21 = vshll.u32 %v4158_v33, 16  ;;  %v4375_v6 = vrot.slane %v4373_v28, 1 }
 0x518   : > { %v8941_v30 = vrot.slane %v4218_v18, 7  ;;  %v4624_v43 = vrot.slane %v8881_v11, 1  ;;  %v4103_v59 = vadd.f32 %v8782_v2, %v4066_v55  ;;  %v4625_v52 = vrot.slane %v8892_v40, 1  ;;  %v9727_v40 = vld [vmem:[#allocation38_spill] sm:$0xff] }
 0x519   : > { %v4137_v53 = vmax.f32 %v4105_v38, 0.0  ;;  %v4071_v35 = vadd.f32 %v6392_v13, %v8832_v3  ;;  %v3990_v15 = vpop.f32.mrf.mxu0  ;;  %v4230_v22 = vor.u32 %v4228_v25, %v8936_v20  ;;  %v4376_v50 = vsel %vm515_vm3, %v4371_v34, %v4375_v6 }
 0x51a   : > { %v4223_v42 = vor.u32 %v4221_v21, %v8941_v30  ;;  %v4621_v26 = vrot.slane %v8897_v32, 1  ;;  %v4134_v58 = vmax.f32 %v4102_v41, 0.0  ;;  %4557 = vrot.lane.b32.xlu0 %v4376_v50, %s6640_s16  ;;  %v4135_v47 = vmax.f32 %v4103_v59, 0.0 }
 0x51b   : > { %v4161_v45 = vpack.c.bf16 %v4137_v53, %v4136_v48  ;;  %v4626_v31 = vsel %vm772_vm2, %v4624_v43, %v4625_v52  ;;  %v6393_v49 = vpop.f32.mrf.mxu0  ;;  %v8954_v19 = vadd.f32 %v3862_v60, %v9727_v40  ;;  %v4622_v3 = vrot.slane %v4349_v46, 1 }
 0x51c   : > { %4671 = vrot.lane.b32.xlu1 %v4626_v31, %s6639_s13  ;;  %v4069_v61 = vadd.f32 %v3990_v15, %v8836_v63  ;;  %v4352_v14 = vsel %vm6730_vm4, %v8905_v57, 0  ;;  %v8963_v24 = vsel %vm6730_vm4, 0, %v4209_v36  ;;  %v4160_v62 = vpack.c.bf16 %v4135_v47, %v4134_v58 }
 0x51d   : > { %v4239_v33 = vshrl.u32 %v4161_v45, 16  ;;  %v4108_v25 = vadd.f32 %v8782_v2, %v4071_v35  ;;  %v3993_v10 = vpop.f32.mrf.mxu0  ;;  %v8968_v29 = vsel %vm6730_vm4, 0, %v4230_v22  ;;  %v8972_v63 = vsel %vm6730_vm4, 0, %v4223_v42 }
 0x51e   : > { %v4623_v46 = vsel %vm772_vm2, %v4621_v26, %v4622_v3  ;;  %v4404_v57 = vshll.u32 %v8932_v12, 16  ;;  %v4242_v36 = vshll.u32 %v4161_v45, 16  ;;  %v4106_v18 = vadd.f32 %v8782_v2, %v4069_v61 }
 0x51f   : > { %v8976_v0 = vrot.slane %v4239_v33, 7  ;;  %4669 = vrot.lane.b32.xlu0 %v4623_v46, %s6639_s13  ;;  %v4409_v48 = vshll.u32 %v4352_v14, 16  ;;  %v6396_v28 = vpop.f32.mrf.mxu0  ;;  %v4402_v41 = vshrl.u32 %v8932_v12, 16  ;;  %v4072_v34 = vadd.f32 %v6393_v49, %v8840_v9 }
 0x520   : > { %v4406_v38 = vrot.slane %v4404_v57, 1  ;;  %v4351_v55 = vsel %vm6730_vm4, %v8908_v54, 0  ;;  %v4232_v13 = vshrl.u32 %v4160_v62, 16  ;;  %v4235_v21 = vshll.u32 %v4160_v62, 16 }
 0x521   : > { %v4140_v6 = vmax.f32 %v4108_v25, 0.0  ;;  %v4411_v43 = vrot.slane %v4409_v48, 1  ;;  %v4006_v60 = vpop.f32.mrf.mxu0  ;;  %v4109_v59 = vadd.f32 %v8782_v2, %v4072_v34  ;;  %v4392_v52 = vshll.u32 %v8963_v24, 16 }
 0x522   : > { %v4407_v53 = vor.u32 %v4406_v38, %v4402_v41  ;;  %v4397_v35 = vshll.u32 %v4351_v55, 16  ;;  %v4244_v15 = vor.u32 %v4242_v36, %v8976_v0  ;;  %v4138_v22 = vmax.f32 %v4106_v18, 0.0 }
 0x523   : > { %v4390_v9 = vshrl.u32 %v8963_v24, 16  ;;  %v4070_v42 = vadd.f32 %v3993_v10, %v8844_v7  ;;  %v6397_v50 = vpop.f32.mrf.mxu0  ;;  %v4141_v26 = vmax.f32 %v4109_v59, 0.0  ;;  %v4394_v58 = vrot.slane %v4392_v52, 1 }
 0x524   : > { %v4412_v54 = vsel %vm515_vm3, %v4407_v53, %v4411_v43  ;;  %v4630_v45 = vrot.slane %v8932_v12, 1  ;;  %v8992_v47 = vrot.slane %v4232_v13, 7  ;;  %v4399_v31 = vrot.slane %v4397_v35, 1 }
 0x525   : > { %4563 = vrot.lane.b32.xlu1 %v4412_v54, %s6640_s16  ;;  %v4107_v49 = vadd.f32 %v8782_v2, %v4070_v42  ;;  %v4075_v40 = vadd.f32 %v6396_v28, %v8848_v17  ;;  %v4009_v3 = vpop.f32.mrf.mxu0  ;;  %v4163_v61 = vpack.c.bf16 %v4141_v26, %v4140_v6  ;;  %v4395_v33 = vor.u32 %v4394_v58, %v4390_v9 }
 0x526   : > { %v4631_v7 = vrot.slane %v4352_v14, 1  ;;  %v4627_v62 = vrot.slane %v8963_v24, 1  ;;  %v9000_v25 = vsel %vm6730_vm4, 0, %v4244_v15  ;;  %v4073_v57 = vadd.f32 %v4006_v60, %v8852_v5 }
 0x527   : > { %v4139_v10 = vmax.f32 %v4107_v49, 0.0  ;;  %v4112_v46 = vadd.f32 %v8782_v2, %v4075_v40  ;;  %v6400_v36 = vpop.f32.mrf.mxu0  ;;  %v4253_v18 = vshrl.u32 %v4163_v61, 16  ;;  %v4400_v48 = vsel %vm515_vm3, %v4395_v33, %v4399_v31 }
 0x528   : > { %v4632_v17 = vsel %vm772_vm2, %v4630_v45, %v4631_v7  ;;  %v4628_v28 = vrot.slane %v4351_v55, 1  ;;  %v4237_v14 = vor.u32 %v4235_v21, %v8992_v47  ;;  %v4256_v41 = vshll.u32 %v4163_v61, 16  ;;  %4561 = vrot.lane.b32.xlu0 %v4400_v48, %s6640_s16 }
 0x529   : > { %v4162_v38 = vpack.c.bf16 %v4139_v10, %v4138_v22  ;;  %4675 = vrot.lane.b32.xlu1 %v4632_v17, %s6639_s13  ;;  %v4354_v34 = vsel %vm6730_vm4, %v8936_v20, 0  ;;  %v9012_v5 = vrot.slane %v4253_v18, 7  ;;  %v4428_v6 = vshll.u32 %v8968_v29, 16  ;;  %v4022_v55 = vpop.f32.mrf.mxu0 }
 0x52a   : > { %v4629_v13 = vsel %vm772_vm2, %v4627_v62, %v4628_v28  ;;  %v4433_v43 = vshll.u32 %v4354_v34, 16  ;;  %v4144_v21 = vmax.f32 %v4112_v46, 0.0  ;;  %v4110_v53 = vadd.f32 %v8782_v2, %v4073_v57 }
 0x52b   : > { %v4246_v60 = vshrl.u32 %v4162_v38, 16  ;;  %v4076_v59 = vadd.f32 %v6397_v50, %v8855_v16  ;;  %v4249_v52 = vshll.u32 %v4162_v38, 16  ;;  %v4426_v35 = vshrl.u32 %v8968_v29, 16  ;;  %v6401_v45 = vpop.f32.mrf.mxu0 }
 0x52c   : > { %v4430_v15 = vrot.slane %v4428_v6, 1  ;;  %v4353_v20 = vsel %vm6730_vm4, %v8941_v30, 0  ;;  %v4258_v22 = vor.u32 %v4256_v41, %v9012_v5  ;;  %4673 = vrot.lane.b32.xlu0 %v4629_v13, %s6639_s13  ;;  %v4416_v54 = vshll.u32 %v8972_v63, 16 }
 0x52d   : > { %v9023_v9 = vrot.slane %v4246_v60, 7  ;;  %v4113_v42 = vadd.f32 %v8782_v2, %v4076_v59  ;;  %v4435_v16 = vrot.slane %v4433_v43, 1  ;;  %v4421_v50 = vshll.u32 %v4353_v20, 16  ;;  %v4025_v28 = vpop.f32.mrf.mxu0 }
 0x52e   : > { %v4431_v26 = vor.u32 %v4430_v15, %v4426_v35  ;;  %v4074_v58 = vadd.f32 %v4009_v3, %v8858_v8  ;;  %v4414_v49 = vshrl.u32 %v8972_v63, 16  ;;  %v4418_v30 = vrot.slane %v4416_v54, 1 }
 0x52f   : > { %v4145_v31 = vmax.f32 %v4113_v42, 0.0  ;;  %v4636_v40 = vrot.slane %v8968_v29, 1  ;;  %v4251_v61 = vor.u32 %v4249_v52, %v9023_v9  ;;  %v4423_v7 = vrot.slane %v4421_v50, 1 }
 0x530   : > { %v4436_v33 = vsel %vm515_vm3, %v4431_v26, %v4435_v16  ;;  %v4111_v62 = vadd.f32 %v8782_v2, %v4074_v58  ;;  %v4419_v46 = vor.u32 %v4418_v30, %v4414_v49  ;;  %v4637_v57 = vrot.slane %v4354_v34, 1 }
 0x531   : > { %4567 = vrot.lane.b32.xlu1 %v4436_v33, %s6640_s16  ;;  %v4165_v10 = vpack.c.bf16 %v4145_v31, %v4144_v21  ;;  %v4079_v8 = vadd.f32 %v6400_v36, %v8861_v1  ;;  %v9038_v3 = vsel %vm6730_vm4, 0, %v4237_v14  ;;  %v4142_v18 = vmax.f32 %v4110_v53, 0.0 }
 0x532   : > { %v4143_v48 = vmax.f32 %v4111_v62, 0.0  ;;  %v4633_v17 = vrot.slane %v8972_v63, 1  ;;  %v4424_v38 = vsel %vm515_vm3, %v4419_v46, %v4423_v7  ;;  %v4638_v13 = vsel %vm772_vm2, %v4636_v40, %v4637_v57 }
 0x533   : > { %v4267_v41 = vshrl.u32 %v4165_v10, 16  ;;  %v4634_v6 = vrot.slane %v4353_v20, 1  ;;  %4565 = vrot.lane.b32.xlu0 %v4424_v38, %s6640_s16  ;;  %v4116_v1 = vadd.f32 %v8782_v2, %v4079_v8  ;;  %v4077_v36 = vadd.f32 %v4022_v55, %v8864_v39 }
 0x534   : > { %v4164_v34 = vpack.c.bf16 %v4143_v48, %v4142_v18  ;;  %v4356_v14 = vsel %vm6730_vm4, %v8976_v0, 0  ;;  %v9051_v43 = vsel %vm6730_vm4, 0, %v4258_v22  ;;  %v9055_v60 = vsel %vm6730_vm4, 0, %v4251_v61  ;;  %v6404_v0 = vpop.f32.mrf.mxu0 }
 0x535   : > { %v4270_v21 = vshll.u32 %v4165_v10, 16  ;;  %4679 = vrot.lane.b32.xlu1 %v4638_v13, %s6639_s13  ;;  %v4452_v53 = vshll.u32 %v9000_v25, 16  ;;  %v9059_v59 = vrot.slane %v4267_v41, 7  ;;  %v4635_v55 = vsel %vm772_vm2, %v4633_v17, %v4634_v6 }
 0x536   : > { %v4260_v39 = vshrl.u32 %v4164_v34, 16  ;;  %v4457_v52 = vshll.u32 %v4356_v14, 16  ;;  %v4450_v35 = vshrl.u32 %v9000_v25, 16  ;;  %v4080_v20 = vadd.f32 %v6401_v45, %v8869_v56  ;;  %v4038_v40 = vpop.f32.mrf.mxu0 }
 0x537   : > { %v4454_v15 = vrot.slane %v4452_v53, 1  ;;  %v4355_v22 = vsel %vm6730_vm4, %v8992_v47, 0  ;;  %v4263_v54 = vshll.u32 %v4164_v34, 16  ;;  %v4148_v26 = vmax.f32 %v4116_v1, 0.0  ;;  %4677 = vrot.lane.b32.xlu0 %v4635_v55, %s6639_s13 }
 0x538   : > { %v9067_v42 = vrot.slane %v4260_v39, 7  ;;  %v4114_v16 = vadd.f32 %v8782_v2, %v4077_v36  ;;  %v4459_v58 = vrot.slane %v4457_v52, 1  ;;  %v4117_v31 = vadd.f32 %v8782_v2, %v4080_v20  ;;  %v6405_v6 = vpop.f32.mrf.mxu0 }
 0x539   : > { %v4455_v50 = vor.u32 %v4454_v15, %v4450_v35  ;;  %v4440_v49 = vshll.u32 %v9038_v3, 16  ;;  %v4272_v56 = vor.u32 %v4270_v21, %v9059_v59  ;;  %v4445_v45 = vshll.u32 %v4355_v22, 16 }
 0x53a   : > { %v4078_v30 = vadd.f32 %v4025_v28, %v8872_v51  ;;  %v4642_v47 = vrot.slane %v9000_v25, 1  ;;  %v4149_v33 = vmax.f32 %v4117_v31, 0.0  ;;  %v4438_v7 = vshrl.u32 %v9038_v3, 16 }
 0x53b   : > { %v4460_v61 = vsel %vm515_vm3, %v4455_v50, %v4459_v58  ;;  %v4442_v62 = vrot.slane %v4440_v49, 1  ;;  %v4265_v10 = vor.u32 %v4263_v54, %v9067_v42  ;;  %v4643_v57 = vrot.slane %v4356_v14, 1  ;;  %v4041_v54 = vpop.f32.mrf.mxu0 }
 0x53c   : > { %4571 = vrot.lane.b32.xlu1 %v4460_v61, %s6640_s16  ;;  %v4115_v46 = vadd.f32 %v8782_v2, %v4078_v30  ;;  %v4083_v8 = vadd.f32 %v6404_v0, %v8877_v4  ;;  %v4146_v18 = vmax.f32 %v4114_v16, 0.0  ;;  %v4167_v51 = vpack.c.bf16 %v4149_v33, %v4148_v26 }
 0x53d   : > { %v4443_v48 = vor.u32 %v4442_v62, %v4438_v7  ;;  %v4447_v17 = vrot.slane %v4445_v45, 1  ;;  %v4644_v41 = vsel %vm772_vm2, %v4642_v47, %v4643_v57  ;;  %v4639_v13 = vrot.slane %v9038_v3, 1 }
 0x53e   : > { %v4147_v28 = vmax.f32 %v4115_v46, 0.0  ;;  %v4120_v38 = vadd.f32 %v8782_v2, %v4083_v8  ;;  %v4281_v34 = vshrl.u32 %v4167_v51, 16  ;;  %v4081_v36 = vadd.f32 %v4038_v40, %v8885_v27 }
 0x53f   : > { %v4448_v1 = vsel %vm515_vm3, %v4443_v48, %v4447_v17  ;;  %v4358_v4 = vsel %vm6730_vm4, %v9012_v5, 0  ;;  %v9092_v14 = vsel %vm6730_vm4, 0, %v4272_v56  ;;  %v9096_v21 = vsel %vm6730_vm4, 0, %v4265_v10 }
 0x540   : > { %4569 = vrot.lane.b32.xlu0 %v4448_v1, %s6640_s16  ;;  %v4166_v53 = vpack.c.bf16 %v4147_v28, %v4146_v18  ;;  %4683 = vrot.lane.b32.xlu1 %v4644_v41, %s6639_s13  ;;  %v4640_v39 = vrot.slane %v4355_v22, 1  ;;  %v9100_v55 = vrot.slane %v4281_v34, 7  ;;  %v4284_v27 = vshll.u32 %v4167_v51, 16 }
 0x541   : > { %v4476_v52 = vshll.u32 %v9051_v43, 16  ;;  %v4481_v5 = vshll.u32 %v4358_v4, 16  ;;  %v4152_v35 = vmax.f32 %v4120_v38, 0.0  ;;  %v4084_v20 = vadd.f32 %v6405_v6, %v8913_v44 }
 0x542   : > { %v4274_v0 = vshrl.u32 %v4166_v53, 16  ;;  %v4641_v15 = vsel %vm772_vm2, %v4639_v13, %v4640_v39  ;;  %v4118_v26 = vadd.f32 %v8782_v2, %v4081_v36  ;;  %v4474_v16 = vshrl.u32 %v9051_v43, 16 }
 0x543   : > { %v4478_v50 = vrot.slane %v4476_v52, 1  ;;  %v4357_v22 = vsel %vm6730_vm4, %v9023_v9, 0  ;;  %v4286_v58 = vor.u32 %v4284_v27, %v9100_v55  ;;  %v4483_v31 = vrot.slane %v4481_v5, 1 }
 0x544   : > { %4681 = vrot.lane.b32.xlu0 %v4641_v15, %s6639_s13  ;;  %v4121_v49 = vadd.f32 %v8782_v2, %v4084_v20  ;;  %v4464_v56 = vshll.u32 %v9055_v60, 16  ;;  %v9114_v44 = vrot.slane %v4274_v0, 7  ;;  %v4469_v30 = vshll.u32 %v4357_v22, 16 }
 0x545   : > { %v4479_v45 = vor.u32 %v4478_v50, %v4474_v16  ;;  %v4082_v47 = vadd.f32 %v4041_v54, %v8954_v19  ;;  %v4462_v61 = vshrl.u32 %v9055_v60, 16  ;;  %v4648_v9 = vrot.slane %v9051_v43, 1 }
 0x546   : > { %v4153_v40 = vmax.f32 %v4121_v49, 0.0  ;;  %v4466_v33 = vrot.slane %v4464_v56, 1  ;;  %v4277_v7 = vshll.u32 %v4166_v53, 16  ;;  %v4150_v62 = vmax.f32 %v4118_v26, 0.0 }
 0x547   : > { %v4484_v10 = vsel %vm515_vm3, %v4479_v45, %v4483_v31  ;;  %v4119_v46 = vadd.f32 %v8782_v2, %v4082_v47  ;;  %v4471_v18 = vrot.slane %v4469_v30, 1  ;;  %v4649_v51 = vrot.slane %v4358_v4, 1 }
 0x548   : > { %4575 = vrot.lane.b32.xlu1 %v4484_v10, %s6640_s16  ;;  %v4169_v57 = vpack.c.bf16 %v4153_v40, %v4152_v35  ;;  %v4467_v8 = vor.u32 %v4466_v33, %v4462_v61  ;;  %v9124_v19 = vsel %vm6730_vm4, 0, %v4286_v58  ;;  %v4645_v17 = vrot.slane %v9055_v60, 1 }
 0x549   : > { %v4151_v48 = vmax.f32 %v4119_v46, 0.0  ;;  %v4360_v28 = vsel %vm6730_vm4, %v9059_v59, 0  ;;  %v4279_v41 = vor.u32 %v4277_v7, %v9114_v44  ;;  %v4650_v13 = vsel %vm772_vm2, %v4648_v9, %v4649_v51 }
 0x54a   : > { %v4295_v2 = vshrl.u32 %v4169_v57, 16  ;;  %v4472_v38 = vsel %vm515_vm3, %v4467_v8, %v4471_v18  ;;  %v4646_v34 = vrot.slane %v4357_v22, 1  ;;  %v4500_v1 = vshll.u32 %v9092_v14, 16 }
 0x54b   : > { %4573 = vrot.lane.b32.xlu0 %v4472_v38, %s6640_s16  ;;  %v4168_v6 = vpack.c.bf16 %v4151_v48, %v4150_v62  ;;  %v4505_v36 = vshll.u32 %v4360_v28, 16  ;;  %v4298_v53 = vshll.u32 %v4169_v57, 16  ;;  %v4359_v59 = vsel %vm6730_vm4, %v9067_v42, 0 }
 0x54c   : > { %v4297_v4 = vrot.slane %v4295_v2, 7  ;;  %4687 = vrot.lane.b32.xlu1 %v4650_v13, %s6639_s13  ;;  %v4488_v39 = vshll.u32 %v9096_v21, 16  ;;  %v4647_v52 = vsel %vm772_vm2, %v4645_v17, %v4646_v34  ;;  %v4498_v5 = vshrl.u32 %v9092_v14, 16 }
 0x54d   : > { %v4288_v27 = vshrl.u32 %v4168_v6, 16  ;;  %v4502_v0 = vrot.slane %v4500_v1, 1  ;;  %v4291_v35 = vshll.u32 %v4168_v6, 16  ;;  %v4486_v15 = vshrl.u32 %v9096_v21, 16 }
 0x54e   : > { %v4490_v20 = vrot.slane %v4488_v39, 1  ;;  %v4493_v54 = vshll.u32 %v4359_v59, 16  ;;  %v4300_v26 = vor.u32 %v4298_v53, %v4297_v4  ;;  %v4507_v22 = vrot.slane %v4505_v36, 1 }
 0x54f   : > { %v4290_v16 = vrot.slane %v4288_v27, 7  ;;  %4685 = vrot.lane.b32.xlu0 %v4647_v52, %s6639_s13  ;;  %v4503_v50 = vor.u32 %v4502_v0, %v4498_v5  ;;  %v9146_v42 = vsel %vm6730_vm4, 0, %v4279_v41  ;;  %v4654_v49 = vrot.slane %v9092_v14, 1 }
 0x550   : > { %v4491_v58 = vor.u32 %v4490_v20, %v4486_v15  ;;  %v4495_v31 = vrot.slane %v4493_v54, 1  ;;  %v4651_v30 = vrot.slane %v9096_v21, 1  ;;  %v4362_v47 = vsel %vm6730_vm4, %v9100_v55, 0 }
 0x551   : > { %v4293_v56 = vor.u32 %v4291_v35, %v4290_v16  ;;  %v4508_v45 = vsel %vm515_vm3, %v4503_v50, %v4507_v22  ;;  %v4655_v61 = vrot.slane %v4360_v28, 1  ;;  %v4524_v33 = vshll.u32 %v9124_v19, 16 }
 0x552   : > { %4579 = vrot.lane.b32.xlu1 %v4508_v45, %s6640_s16  ;;  %v4496_v40 = vsel %vm515_vm3, %v4491_v58, %v4495_v31  ;;  %v9159_v9 = vsel %vm6730_vm4, 0, %v4300_v26  ;;  %v4652_v7 = vrot.slane %v4359_v59, 1  ;;  %v4529_v62 = vshll.u32 %v4362_v47, 16 }
 0x553   : > { %4577 = vrot.lane.b32.xlu0 %v4496_v40, %s6640_s16  ;;  %v4361_v10 = vsel %vm6730_vm4, %v9114_v44, 0  ;;  %v4522_v55 = vshrl.u32 %v9124_v19, 16  ;;  %v4526_v46 = vrot.slane %v4524_v33, 1  ;;  %v4512_v57 = vshll.u32 %v9146_v42, 16 }
 0x554   : > { %v4517_v8 = vshll.u32 %v4361_v10, 16  ;;  %v9169_v18 = vsel %vm6730_vm4, 0, %v4293_v56  ;;  %v4656_v51 = vsel %vm772_vm2, %v4654_v49, %v4655_v61  ;;  %v4653_v48 = vsel %vm772_vm2, %v4651_v30, %v4652_v7 }
 0x555   : > { %v4510_v17 = vshrl.u32 %v9146_v42, 16  ;;  %v4527_v28 = vor.u32 %v4526_v46, %v4522_v55  ;;  %v4531_v44 = vrot.slane %v4529_v62, 1  ;;  %v4514_v41 = vrot.slane %v4512_v57, 1  ;;  %v6581_v57 = vld [vmem:[%s9612_s3 + $0x80] sm:$0xff]  }
 0x556   : > { %4691 = vrot.lane.b32.xlu1 %v4656_v51, %s6639_s13  ;;  %v4364_v2 = vsel %vm6730_vm4, %v4297_v4, 0  ;;  %v4660_v38 = vrot.slane %v9124_v19, 1  ;;  %v4548_v13 = vshll.u32 %v9159_v9, 16  ;;  %v4519_v1 = vrot.slane %v4517_v8, 1 }
 0x557   : > { %4689 = vrot.lane.b32.xlu0 %v4653_v48, %s6639_s13  ;;  %v4532_v6 = vsel %vm515_vm3, %v4527_v28, %v4531_v44  ;;  %v4515_v34 = vor.u32 %v4514_v41, %v4510_v17  ;;  %v4363_v36 = vsel %vm6730_vm4, %v4290_v16, 0  ;;  %v4546_v53 = vshrl.u32 %v9159_v9, 16 }
 0x558   : > { %v4550_v59 = vrot.slane %v4548_v13, 1  ;;  %v4553_v39 = vshll.u32 %v4364_v2, 16  ;;  %v4536_v27 = vshll.u32 %v9169_v18, 16  ;;  %v4657_v52 = vrot.slane %v9146_v42, 1 }
 0x559   : > { %v4520_v4 = vsel %vm515_vm3, %v4515_v34, %v4519_v1  ;;  %v4541_v5 = vshll.u32 %v4363_v36, 16  ;;  %v4661_v0 = vrot.slane %v4362_v47, 1  ;;  %v4534_v37 = vshrl.u32 %v9169_v18, 16 }
 0x55a   : > { %4583 = vrot.lane.b32.xlu1 %v4532_v6, %s6640_s16  ;;  %v4551_v35 = vor.u32 %v4550_v59, %v4546_v53  ;;  %v4538_v15 = vrot.slane %v4536_v27, 1  ;;  %v4658_v20 = vrot.slane %v4361_v10, 1  ;;  %v4555_v26 = vrot.slane %v4553_v39, 1 }
 0x55b   : > { %4581 = vrot.lane.b32.xlu0 %v4520_v4, %s6640_s16  ;;  %v4662_v54 = vsel %vm772_vm2, %v4660_v38, %v4661_v0  ;;  %v4543_v22 = vrot.slane %v4541_v5, 1  ;;  %v4666_v49 = vrot.slane %v9159_v9, 1  ;;  %v4663_v56 = vrot.slane %v9169_v18, 1 }
 0x55c   : > { %v4539_v16 = vor.u32 %v4538_v15, %v4534_v37  ;;  %v4659_v50 = vsel %vm772_vm2, %v4657_v52, %v4658_v20  ;;  %v4556_v58 = vsel %vm515_vm3, %v4551_v35, %v4555_v26  ;;  %v4667_v45 = vrot.slane %v4364_v2, 1 }
 0x55d   : > { %v4664_v30 = vrot.slane %v4363_v36, 1 }
 0x55e   : > { %4695 = vrot.lane.b32.xlu1 %v4662_v54, %s6639_s13  ;;  %v4544_v31 = vsel %vm515_vm3, %v4539_v16, %v4543_v22  ;;  %v4668_v47 = vsel %vm772_vm2, %v4666_v49, %v4667_v45 }
 0x55f   : > { %4693 = vrot.lane.b32.xlu0 %v4659_v50, %s6639_s13  ;;  %v4665_v40 = vsel %vm772_vm2, %v4663_v56, %v4664_v30 }
 0x562   : > { %4587 = vrot.lane.b32.xlu1 %v4556_v58, %s6640_s16 }
 0x563   : > { %4585 = vrot.lane.b32.xlu0 %v4544_v31, %s6640_s16 }
 0x566   : > { %4699 = vrot.lane.b32.xlu1 %v4668_v47, %s6639_s13 }
 0x567   : > { %4697 = vrot.lane.b32.xlu0 %v4665_v40, %s6639_s13 }
 0x586   : > { %v4560_v61 = vpop.permute.xlu1 %4559 }
 0x587   : > { %v4704_v55 = vsel %vm853_vm5, %v8881_v11, %v4560_v61  ;;  %v6582_v11 = vld [vmem:[%s9612_s3 + $0x78] sm:$0xff]  }
 0x58c   : > { %v4558_v33 = vpop.permute.xlu0 %4557 }
 0x58d   : > { %v4702_v62 = vsel %vm853_vm5, %v8897_v32, %v4558_v33 }
 0x58e   : > { %v4672_v7 = vpop.permute.xlu1 %4671 }
 0x58f   : > { %v9213_v8 = vsel %vm886_vm6, %v4704_v55, %v4672_v7 }
 0x591   : > { %v4670_v10 = vpop.permute.xlu0 %4669 }
 0x592   : > { %v4734_v46 = vsel %vm886_vm6, %v4702_v62, %v4670_v10 }
 0x593   : > { %6412 = vmatprep.mubr.msk.bf16.mxu1 %vm937_vm7, %v4734_v46  ;;  %6451 = vmatmul.mubr.msk.bf16.vlgmr.msra.gmra.mxu0 %vm937_vm7, %v4734_v46 }
 0x594   : > { %6413 = vmatmul.mubr.msk.bf16.vlgmr.msra.gmra.mxu1 %vm937_vm7, %v9213_v8  ;;  %6454 = vmatprep.mubr.msk.bf16.mxu0 %vm937_vm7, %v9213_v8 }
 0x595   : > { %6483 = vmatpush3.bf16.msra.mxu1 %v8925_v23 }
 0x596   : > { %6484 = vmatprep.subr.bf16.mxu1 %v6581_v57 }
 0x597   : > { %v4564_v32 = vpop.permute.xlu1 %4563 }
 0x598   : > { %v4708_v44 = vsel %vm853_vm5, %v8932_v12, %v4564_v32 }
 0x599   : > { %6485 = vmatpush3.bf16.msra.mxu1 %v6581_v57 }
 0x59a   : > { %6486 = vmatprep.subr.bf16.mxu1 %v6582_v11  ;;  %v4562_v51 = vpop.permute.xlu0 %4561 }
 0x59b   : > { %v4676_v48 = vpop.permute.xlu1 %4675  ;;  %v4706_v17 = vsel %vm853_vm5, %v8963_v24, %v4562_v51 }
 0x59c   : > { %v9233_v41 = vsel %vm886_vm6, %v4708_v44, %v4676_v48 }
 0x59d   : > { %6487 = vmatpush3.bf16.msra.mxu1 %v6582_v11 }
 0x59e   : > { %v4674_v28 = vpop.permute.xlu0 %4673 }
 0x59f   : > { %v9230_v23 = vsel %vm886_vm6, %v4706_v17, %v4674_v28 }
 0x5a0   : > { %6416 = vmatprep.mubr.msk.bf16.mxu1 %vm937_vm7, %v9230_v23  ;;  %6455 = vmatmul.mubr.msk.bf16.gmra.mxu0 %vm937_vm7, %v9230_v23 }
 0x5a1   : > { %6417 = vmatmul.mubr.msk.bf16.gmra.mxu1 %vm937_vm7, %v9233_v41  ;;  %6458 = vmatprep.mubr.msk.bf16.mxu0 %vm937_vm7, %v9233_v41 }
 0x5a3   : > { %v4568_v24 = vpop.permute.xlu1 %4567 }
 0x5a4   : > { %v4712_v6 = vsel %vm853_vm5, %v8968_v29, %v4568_v24 }
 0x5a5   : > { %v4566_v12 = vpop.permute.xlu0 %4565 }
 0x5a6   : > { %v4710_v38 = vsel %vm853_vm5, %v8972_v63, %v4566_v12 }
 0x5a7   : > { %v4680_v2 = vpop.permute.xlu1 %4679 }
 0x5a8   : > { %v9251_v1 = vsel %vm886_vm6, %v4712_v6, %v4680_v2 }
 0x5a9   : > { %v4678_v13 = vpop.permute.xlu0 %4677 }
 0x5aa   : > { %v9248_v34 = vsel %vm886_vm6, %v4710_v38, %v4678_v13 }
 0x5ab   : > { %6420 = vmatprep.mubr.msk.bf16.mxu1 %vm937_vm7, %v9248_v34  ;;  %6459 = vmatmul.mubr.msk.bf16.gmra.mxu0 %vm937_vm7, %v9248_v34 }
 0x5ac   : > { %6421 = vmatmul.mubr.msk.bf16.gmra.mxu1 %vm937_vm7, %v9251_v1  ;;  %6462 = vmatprep.mubr.msk.bf16.mxu0 %vm937_vm7, %v9251_v1 }
 0x5ae   : > { %v4572_v63 = vpop.permute.xlu1 %4571 }
 0x5af   : > { %v4716_v39 = vsel %vm853_vm5, %v9000_v25, %v4572_v63 }
 0x5b2   : > { %v4570_v29 = vpop.permute.xlu0 %4569  ;;  %v4684_v36 = vpop.permute.xlu1 %4683 }
 0x5b3   : > { %v4714_v53 = vsel %vm853_vm5, %v9038_v3, %v4570_v29  ;;  %v4748_v4 = vsel %vm886_vm6, %v4716_v39, %v4684_v36 }
 0x5b6   : > { %v4682_v59 = vpop.permute.xlu0 %4681 }
 0x5b7   : > { %v4746_v27 = vsel %vm886_vm6, %v4714_v53, %v4682_v59 }
 0x5b8   : > { %6424 = vmatprep.mubr.msk.bf16.mxu1 %vm937_vm7, %v4746_v27  ;;  %6463 = vmatmul.mubr.msk.bf16.gmra.mxu0 %vm937_vm7, %v4746_v27 }
 0x5b9   : > { %6425 = vmatmul.mubr.msk.bf16.gmra.mxu1 %vm937_vm7, %v4748_v4  ;;  %6466 = vmatprep.mubr.msk.bf16.mxu0 %vm937_vm7, %v4748_v4 }
 0x5ba   : > { %v4576_v52 = vpop.permute.xlu1 %4575 }
 0x5bb   : > { %v4720_v25 = vsel %vm853_vm5, %v9051_v43, %v4576_v52 }
 0x5bd   : > { %v4574_v5 = vpop.permute.xlu0 %4573 }
 0x5be   : > { %v4688_v0 = vpop.permute.xlu1 %4687  ;;  %v4718_v3 = vsel %vm853_vm5, %v9055_v60, %v4574_v5 }
 0x5bf   : > { %v4752_v15 = vsel %vm886_vm6, %v4720_v25, %v4688_v0 }
 0x5c1   : > { %v4686_v35 = vpop.permute.xlu0 %4685 }
 0x5c2   : > { %v4750_v37 = vsel %vm886_vm6, %v4718_v3, %v4686_v35 }
 0x5c3   : > { %6428 = vmatprep.mubr.msk.bf16.mxu1 %vm937_vm7, %v4750_v37  ;;  %6467 = vmatmul.mubr.msk.bf16.gmra.mxu0 %vm937_vm7, %v4750_v37 }
 0x5c4   : > { %v4580_v20 = vpop.permute.xlu1 %4579  ;;  %6429 = vmatmul.mubr.msk.bf16.gmra.mxu1 %vm937_vm7, %v4752_v15  ;;  %6470 = vmatprep.mubr.msk.bf16.mxu0 %vm937_vm7, %v4752_v15 }
 0x5c5   : > { %v4578_v54 = vpop.permute.xlu0 %4577  ;;  %v4724_v43 = vsel %vm853_vm5, %v9092_v14, %v4580_v20 }
 0x5c6   : > { %v4722_v60 = vsel %vm853_vm5, %v9096_v21, %v4578_v54 }
 0x5c8   : > { %v4692_v26 = vpop.permute.xlu1 %4691 }
 0x5c9   : > { %v4690_v16 = vpop.permute.xlu0 %4689  ;;  %v4756_v22 = vsel %vm886_vm6, %v4724_v43, %v4692_v26 }
 0x5ca   : > { %v4754_v50 = vsel %vm886_vm6, %v4722_v60, %v4690_v16 }
 0x5cb   : > { %6432 = vmatprep.mubr.msk.bf16.mxu1 %vm937_vm7, %v4754_v50  ;;  %6471 = vmatmul.mubr.msk.bf16.gmra.mxu0 %vm937_vm7, %v4754_v50 }
 0x5cc   : > { %v4584_v58 = vpop.permute.xlu1 %4583  ;;  %6433 = vmatmul.mubr.msk.bf16.gmra.mxu1 %vm937_vm7, %v4756_v22  ;;  %6474 = vmatprep.mubr.msk.bf16.mxu0 %vm937_vm7, %v4756_v22 }
 0x5cd   : > { %v4582_v31 = vpop.permute.xlu0 %4581  ;;  %v4728_v14 = vsel %vm853_vm5, %v9124_v19, %v4584_v58 }
 0x5ce   : > { %v4726_v21 = vsel %vm853_vm5, %v9146_v42, %v4582_v31 }
 0x5d0   : > { %v4696_v49 = vpop.permute.xlu1 %4695 }
 0x5d1   : > { %v4694_v56 = vpop.permute.xlu0 %4693  ;;  %v4760_v30 = vsel %vm886_vm6, %v4728_v14, %v4696_v49 }
 0x5d2   : > { %v4758_v45 = vsel %vm886_vm6, %v4726_v21, %v4694_v56  ;;  %v9408_v56 = vld [vmem:[%s9613_s4 + $0x1] ss:$0 sm:$0xff] }
 0x5d3   : > { %6436 = vmatprep.mubr.msk.bf16.mxu1 %vm937_vm7, %v4758_v45  ;;  %6475 = vmatmul.mubr.msk.bf16.gmra.mxu0 %vm937_vm7, %v4758_v45 }
 0x5d4   : > { %v4588_v47 = vpop.permute.xlu1 %4587  ;;  %6437 = vmatmul.mubr.msk.bf16.gmra.mxu1 %vm937_vm7, %v4760_v30  ;;  %6478 = vmatprep.mubr.msk.bf16.mxu0 %vm937_vm7, %v4760_v30 }
 0x5d5   : > { %v4586_v40 = vpop.permute.xlu0 %4585  ;;  %v4732_v19 = vsel %vm853_vm5, %v9159_v9, %v4588_v47  ;;  %v9728_v9 = vmov 0  }
 0x5d6   : > { %v4730_v42 = vsel %vm853_vm5, %v9169_v18, %v4586_v40 }
 0x5d8   : > { %v4700_v61 = vpop.permute.xlu1 %4699 }
 0x5d9   : > { %v4698_v33 = vpop.permute.xlu0 %4697  ;;  %v4764_v62 = vsel %vm886_vm6, %v4732_v19, %v4700_v61 }
 0x5da   : > { %v4762_v7 = vsel %vm886_vm6, %v4730_v42, %v4698_v33 }
 0x5db   : > { %6440 = vmatprep.mubr.msk.bf16.mxu1 %vm937_vm7, %v4762_v7  ;;  %6479 = vmatmul.mubr.msk.bf16.gmra.mxu0 %vm937_vm7, %v4762_v7 }
 0x5dc   : > { %6441 = vmatmul.mubr.msk.bf16.gmra.mxu1 %vm937_vm7, %v4764_v62 }
 0x5dd   : > { %6488 = vmatprep.mubr.msk.bf16.mxu1 %vm937_vm7, %v9213_v8 }
 0x5e4   : > { %6489 = vmatmul.mubr.msk.bf16.vlgmr.msra.gmra.mxu1 %vm937_vm7, %v9230_v23 }
 0x5e5   : > { %6492 = vmatprep.mubr.msk.bf16.mxu1 %vm937_vm7, %v9233_v41 }
 0x5ec   : > { %6493 = vmatmul.mubr.msk.bf16.gmra.mxu1 %vm937_vm7, %v9248_v34 }
 0x5ed   : > { %6496 = vmatprep.mubr.msk.bf16.mxu1 %vm937_vm7, %v9251_v1 }
 0x5f4   : > { %6497 = vmatmul.mubr.msk.bf16.gmra.mxu1 %vm937_vm7, %v4746_v27 }
 0x5f5   : > { %6500 = vmatprep.mubr.msk.bf16.mxu1 %vm937_vm7, %v4748_v4 }
 0x5fc   : > { %6501 = vmatmul.mubr.msk.bf16.gmra.mxu1 %vm937_vm7, %v4750_v37 }
 0x5fd   : > { %6504 = vmatprep.mubr.msk.bf16.mxu1 %vm937_vm7, %v4752_v15 }
 0x604   : > { %6505 = vmatmul.mubr.msk.bf16.gmra.mxu1 %vm937_vm7, %v4754_v50 }
 0x605   : > { %6508 = vmatprep.mubr.msk.bf16.mxu1 %vm937_vm7, %v4756_v22 }
 0x60c   : > { %6509 = vmatmul.mubr.msk.bf16.gmra.mxu1 %vm937_vm7, %v4758_v45 }
 0x60d   : > { %6512 = vmatprep.mubr.msk.bf16.mxu1 %vm937_vm7, %v4760_v30 }
 0x614   : > { %6513 = vmatmul.mubr.msk.bf16.gmra.mxu1 %vm937_vm7, %v4762_v7  ;;  %v9729_v7 = vld [vmem:[#allocation8_spill] sm:$0xff] }
 0x615   : > { %6516 = vmatprep.mubr.msk.bf16.mxu1 %vm937_vm7, %v4764_v62 }
 0x61c   : > { %6517 = vmatmul.mubr.bf16.gmra.mxu1 %v9728_v9 }
 0x653   : > { %v6452_v57 = vpop.f32.mrf.mxu0 }
 0x654   : > { %v6414_v18 = vpop.f32.mrf.mxu1 }
 0x655   : > { %v5028_v32 = vpop.f32.mrf.mxu0  ;;  %v5037_v49 = vadd.f32 %v6452_v57, %v6414_v18 }
 0x656   : > { %v4849_v10 = vpop.f32.mrf.mxu1 }
 0x657   : > { %v6453_v17 = vpop.f32.mrf.mxu0  ;;  %v5029_v14 = vadd.f32 %v5028_v32, %v4849_v10  ;;  %v9730_v32 = vld [vmem:[#allocation10_spill] sm:$0xff] }
 0x658   : > { %v6415_v55 = vpop.f32.mrf.mxu1 }
 0x659   : > { %v5031_v44 = vpop.f32.mrf.mxu0  ;;  %v5040_v40 = vadd.f32 %v6453_v17, %v6415_v55 }
 0x65a   : > { %v4852_v46 = vpop.f32.mrf.mxu1 }
 0x65b   : > { %v5032_v19 = vadd.f32 %v5031_v44, %v4852_v46  ;;  %v9731_v44 = vld [vmem:[#allocation9_spill] sm:$0xff] }
 0x660   : > { %v6456_v24 = vpop.f32.mrf.mxu0 }
 0x661   : > { %v6418_v8 = vpop.f32.mrf.mxu1 }
 0x662   : > { %v5044_v2 = vpop.f32.mrf.mxu0  ;;  %v5053_v57 = vadd.f32 %v6456_v24, %v6418_v8 }
 0x663   : > { %v9331_v11 = vpop.f32.mrf.mxu1 }
 0x664   : > { %v6457_v13 = vpop.f32.mrf.mxu0  ;;  %v5045_v46 = vadd.f32 %v5044_v2, %v9331_v11 }
 0x665   : > { %v9333_v51 = vpop.f32.mrf.mxu1 }
 0x666   : > { %v9351_v1 = vpop.f32.mrf.mxu0  ;;  %v5056_v24 = vadd.f32 %v6457_v13, %v9333_v51 }
 0x667   : > { %v9335_v48 = vpop.f32.mrf.mxu1 }
 0x66b   : > { %v9355_v29 = vpop.f32.mrf.mxu0 }
 0x66c   : > { %v9337_v28 = vpop.f32.mrf.mxu1 }
 0x66d   : > { %v9359_v53 = vpop.f32.mrf.mxu0 }
 0x66e   : > { %v9339_v23 = vpop.f32.mrf.mxu1 }
 0x66f   : > { %v9365_v27 = vpop.f32.mrf.mxu0 }
 0x670   : > { %v9341_v41 = vpop.f32.mrf.mxu1 }
 0x671   : > { %v9371_v5 = vpop.f32.mrf.mxu0 }
 0x672   : > { %v9343_v12 = vpop.f32.mrf.mxu1 }
 0x678   : > { %v9377_v35 = vpop.f32.mrf.mxu0 }
 0x679   : > { %v9345_v38 = vpop.f32.mrf.mxu1 }
 0x67a   : > { %v9383_v15 = vpop.f32.mrf.mxu0 }
 0x67b   : > { %v9347_v6 = vpop.f32.mrf.mxu1 }
 0x67c   : > { %v9389_v26 = vpop.f32.mrf.mxu0 }
 0x67d   : > { %v9349_v34 = vpop.f32.mrf.mxu1 }
 0x67e   : > { %v9395_v43 = vpop.f32.mrf.mxu0 }
 0x67f   : > { %v9353_v63 = vpop.f32.mrf.mxu1 }
 0x683   : > { %v9401_v58 = vpop.f32.mrf.mxu0 }
 0x684   : > { %v9357_v36 = vpop.f32.mrf.mxu1 }
 0x685   : > { %v9410_v30 = vpop.f32.mrf.mxu0 }
 0x686   : > { %v9361_v59 = vpop.f32.mrf.mxu1 }
 0x687   : > { %v9422_v10 = vpop.f32.mrf.mxu0 }
 0x688   : > { %v9363_v39 = vpop.f32.mrf.mxu1 }
 0x68a   : > { %v9367_v4 = vpop.f32.mrf.mxu1 }
 0x68c   : > { %v9369_v52 = vpop.f32.mrf.mxu1 }
 0x68e   : > { %v9373_v0 = vpop.f32.mrf.mxu1 }
 0x690   : > { %v9375_v3 = vpop.f32.mrf.mxu1 }
 0x692   : > { %v9379_v25 = vpop.f32.mrf.mxu1 }
 0x694   : > { %v9381_v37 = vpop.f32.mrf.mxu1 }
 0x696   : > { %v9385_v20 = vpop.f32.mrf.mxu1 }
 0x698   : > { %v9387_v54 = vpop.f32.mrf.mxu1 }
 0x69a   : > { %v9391_v60 = vpop.f32.mrf.mxu1 }
 0x69c   : > { %v9393_v16 = vpop.f32.mrf.mxu1 }
 0x69e   : > { %v9397_v50 = vpop.f32.mrf.mxu1 }
 0x6a0   : > { %v9399_v22 = vpop.f32.mrf.mxu1 }
 0x6a2   : > { %v9403_v31 = vpop.f32.mrf.mxu1 }
 0x6a4   : > { %v6490_v21 = vpop.f32.mrf.mxu1 }
 0x6a5   : > { %v5336_v45 = vadd.f32 %v6490_v21, %v5037_v49 }
 0x6a6   : > { %v5207_v47 = vpop.f32.mrf.mxu1 }
 0x6a7   : > { %v5373_v61 = vadd.f32 %v9408_v56, %v5336_v45  ;;  %v5334_v42 = vadd.f32 %v5207_v47, %v5029_v14 }
 0x6a8   : > { %v6491_v33 = vpop.f32.mrf.mxu1 }
 0x6a9   : > { %v5405_v62 = vadd.f32 %v5373_v61, %v9729_v7  ;;  %v5371_v9 = vadd.f32 %v9408_v56, %v5334_v42  ;;  %v5337_v18 = vadd.f32 %v6491_v33, %v5040_v40  ;;  %v9433_v61 = vpop.f32.mrf.mxu0  ;;  %v9732_v42 = vld [vmem:[#allocation11_spill] sm:$0xff]  ;;  %v5048_v7 = vadd.f32 %v9351_v1, %v9335_v48 }
 0x6aa   : > { %v5210_v55 = vpop.f32.mrf.mxu1 }
 0x6ab   : > { %5437 = vst.msk [vmem:[%s9418_s11 + $0x10] sm:$0xff] %vm853_vm5, %v5405_v62  ;;  %v5403_v17 = vadd.f32 %v5371_v9, %v9730_v32  ;;  %v5374_v49 = vadd.f32 %v9408_v56, %v5337_v18  ;;  %v5335_v21 = vadd.f32 %v5210_v55, %v5032_v19  ;;  %v9733_v62 = vld [vmem:[#allocation3_spill] sm:$0xff]  ;;  %v9446_v51 = vpop.f32.mrf.mxu0  ;;  %v9734_v32 = vld [vmem:[#allocation6_spill] sm:$0xff] }
 0x6ac   : > { %v6494_v14 = vpop.f32.mrf.mxu1 }
 0x6ad   : > { %5435 = vst.msk [vmem:[%s9418_s11] sm:$0xff] %vm853_vm5, %v5403_v17  ;;  %v5406_v45 = vadd.f32 %v5374_v49, %v9731_v44  ;;  %v5372_v47 = vadd.f32 %v9408_v56, %v5335_v21  ;;  %v5340_v40 = vadd.f32 %v6494_v14, %v5053_v57  ;;  %v5069_v57 = vadd.f32 %v9355_v29, %v9337_v28  ;;  %v9735_v14 = vld [vmem:[#allocation4_spill] sm:$0xff]  ;;  %v9460_v28 = vpop.f32.mrf.mxu0 }
 0x6ae   : > { %v5223_v8 = vpop.f32.mrf.mxu1  ;;  %v5061_v21 = vadd.f32 %v9359_v53, %v9339_v23 }
 0x6af   : > { %5438 = vst.msk [vmem:[%s9418_s11 + $0x18] sm:$0xff] %vm853_vm5, %v5406_v45  ;;  %v5404_v33 = vadd.f32 %v5372_v47, %v9732_v42  ;;  %v5377_v19 = vadd.f32 %v9408_v56, %v5340_v40  ;;  %v5338_v11 = vadd.f32 %v5223_v8, %v5045_v46  ;;  %v5072_v47 = vadd.f32 %v9365_v27, %v9341_v41  ;;  %v9736_v40 = vld [vmem:[#allocation5_spill] sm:$0xff]  ;;  %v9474_v41 = vpop.f32.mrf.mxu0 }
 0x6b0   : > { %v6495_v2 = vpop.f32.mrf.mxu1  ;;  %v5064_v42 = vadd.f32 %v9371_v5, %v9343_v12 }
 0x6b1   : > { %5436 = vst.msk [vmem:[%s9418_s11 + $0x8] sm:$0xff] %vm853_vm5, %v5404_v33  ;;  %v5409_v9 = vadd.f32 %v5377_v19, %v9733_v62  ;;  %v5375_v18 = vadd.f32 %v9408_v56, %v5338_v11  ;;  %v5341_v55 = vadd.f32 %v6495_v2, %v5056_v24  ;;  %v9737_v33 = vld [vmem:[#allocation7_spill] sm:$0xff]  ;;  %v9738_v62 = vld [vmem:[#allocation14_spill] sm:$0xff] }
 0x6b2   : > { %v5226_v13 = vpop.f32.mrf.mxu1 }
 0x6b3   : > { %5441 = vst.msk [vmem:[%s9418_s11 + $0x30] sm:$0xff] %vm853_vm5, %v5409_v9  ;;  %v5407_v17 = vadd.f32 %v5375_v18, %v9734_v32  ;;  %v5378_v48 = vadd.f32 %v9408_v56, %v5341_v55  ;;  %v5339_v1 = vadd.f32 %v5226_v13, %v5048_v7  ;;  %v5085_v7 = vadd.f32 %v9377_v35, %v9345_v38  ;;  %v9739_v13 = vld [vmem:[#allocation12_spill] sm:$0xff]  ;;  %v5111_v38 = vpop.f32.mrf.mxu0 }
 0x6b4   : > { %v6498_v49 = vpop.f32.mrf.mxu1  ;;  %v5077_v55 = vadd.f32 %v9383_v15, %v9347_v6 }
 0x6b5   : > { %5439 = vst.msk [vmem:[%s9418_s11 + $0x20] sm:$0xff] %vm853_vm5, %v5407_v17  ;;  %v5410_v46 = vadd.f32 %v5378_v48, %v9735_v14  ;;  %v5376_v44 = vadd.f32 %v9408_v56, %v5339_v1  ;;  %v5344_v45 = vadd.f32 %v6498_v49, %v5069_v57  ;;  %v5088_v48 = vadd.f32 %v9389_v26, %v9349_v34  ;;  %v9740_v1 = vld [vmem:[#allocation13_spill] sm:$0xff]  ;;  %v6476_v34 = vpop.f32.mrf.mxu0 }
 0x6b6   : > { %v5239_v29 = vpop.f32.mrf.mxu1  ;;  %v5080_v14 = vadd.f32 %v9395_v43, %v9353_v63 }
 0x6b7   : > { %5442 = vst.msk [vmem:[%s9418_s11 + $0x38] sm:$0xff] %vm853_vm5, %v5410_v46  ;;  %v5408_v8 = vadd.f32 %v5376_v44, %v9736_v40  ;;  %v5381_v23 = vadd.f32 %v9408_v56, %v5344_v45  ;;  %v5342_v53 = vadd.f32 %v5239_v29, %v5061_v21  ;;  %v9741_v46 = vld [vmem:[#allocation15_spill] sm:$0xff]  ;;  %v9742_v40 = vld [vmem:[#allocation16_spill] sm:$0xff] }
 0x6b8   : > { %v6499_v24 = vpop.f32.mrf.mxu1 }
 0x6b9   : > { %5440 = vst.msk [vmem:[%s9418_s11 + $0x28] sm:$0xff] %vm853_vm5, %v5408_v8  ;;  %v5413_v19 = vadd.f32 %v5381_v23, %v9737_v33  ;;  %v5379_v11 = vadd.f32 %v9408_v56, %v5342_v53  ;;  %v5345_v2 = vadd.f32 %v6499_v24, %v5072_v47  ;;  %v5101_v47 = vadd.f32 %v9401_v58, %v9357_v36  ;;  %v9743_v24 = vld [vmem:[#allocation17_spill] sm:$0xff]  ;;  %v5124_v36 = vpop.f32.mrf.mxu0 }
 0x6ba   : > { %v5242_v27 = vpop.f32.mrf.mxu1  ;;  %v5093_v53 = vadd.f32 %v9410_v30, %v9361_v59 }
 0x6bb   : > { %5445 = vst.msk [vmem:[%s9418_s11 + $0x50] sm:$0xff] %vm853_vm5, %v5413_v19  ;;  %v5411_v9 = vadd.f32 %v5379_v11, %v9738_v62  ;;  %v5382_v12 = vadd.f32 %v9408_v56, %v5345_v2  ;;  %v5343_v5 = vadd.f32 %v5242_v27, %v5064_v42  ;;  %v5104_v11 = vadd.f32 %v9422_v10, %v9363_v39  ;;  %v9744_v2 = vld [vmem:[#allocation18_spill] sm:$0xff]  ;;  %v6477_v39 = vpop.f32.mrf.mxu0 }
 0x6bc   : > { %v6502_v18 = vpop.f32.mrf.mxu1  ;;  %v5096_v62 = vadd.f32 %v9433_v61, %v9367_v4 }
 0x6bd   : > { %5443 = vst.msk [vmem:[%s9418_s11 + $0x40] sm:$0xff] %vm853_vm5, %v5411_v9  ;;  %v5414_v57 = vadd.f32 %v5382_v12, %v9739_v13  ;;  %v5380_v32 = vadd.f32 %v9408_v56, %v5343_v5  ;;  %v5348_v17 = vadd.f32 %v6502_v18, %v5085_v7  ;;  %v9745_v9 = vld [vmem:[#allocation19_spill] sm:$0xff]  ;;  %v9746_v13 = vld [vmem:[#allocation21_spill] sm:$0xff] }
 0x6be   : > { %v5255_v35 = vpop.f32.mrf.mxu1 }
 0x6bf   : > { %5446 = vst.msk [vmem:[%s9418_s11 + $0x58] sm:$0xff] %vm853_vm5, %v5414_v57  ;;  %v5412_v49 = vadd.f32 %v5380_v32, %v9740_v1  ;;  %v5385_v21 = vadd.f32 %v9408_v56, %v5348_v17  ;;  %v5346_v6 = vadd.f32 %v5255_v35, %v5077_v55  ;;  %v5117_v55 = vadd.f32 %v9446_v51, %v9369_v52  ;;  %v9747_v35 = vld [vmem:[#allocation20_spill] sm:$0xff]  ;;  %v5127_v52 = vpop.f32.mrf.mxu0 }
 0x6c0   : > { %v6503_v15 = vpop.f32.mrf.mxu1  ;;  %v5109_v17 = vadd.f32 %v9460_v28, %v9373_v0 }
 0x6c1   : > { %5444 = vst.msk [vmem:[%s9418_s11 + $0x48] sm:$0xff] %vm853_vm5, %v5412_v49  ;;  %v5417_v44 = vadd.f32 %v5385_v21, %v9741_v46  ;;  %v5383_v45 = vadd.f32 %v9408_v56, %v5346_v6  ;;  %v5349_v29 = vadd.f32 %v6503_v15, %v5088_v48  ;;  %v5120_v21 = vadd.f32 %v9474_v41, %v9375_v3  ;;  %v9748_v6 = vld [vmem:[#allocation22_spill] sm:$0xff] }
 0x6c2   : > { %v5258_v26 = vpop.f32.mrf.mxu1  ;;  %v5112_v46 = vadd.f32 %v5111_v38, %v9379_v25  ;;  %v5133_v41 = vadd.f32 %v6476_v34, %v9381_v37  ;;  %v5125_v38 = vadd.f32 %v5124_v36, %v9385_v20  ;;  %v5136_v34 = vadd.f32 %v6477_v39, %v9387_v54 }
 0x6c3   : > { %5449 = vst.msk [vmem:[%s9418_s11 + $0x70] sm:$0xff] %vm853_vm5, %v5417_v44  ;;  %v5415_v8 = vadd.f32 %v5383_v45, %v9742_v40  ;;  %v5386_v23 = vadd.f32 %v9408_v56, %v5349_v29  ;;  %v5347_v63 = vadd.f32 %v5258_v26, %v5080_v14  ;;  %v9749_v44 = vld [vmem:[#allocation23_spill] sm:$0xff]  ;;  %v9750_v40 = vld [vmem:[#allocation24_spill] sm:$0xff]  ;;  %v5128_v36 = vadd.f32 %v5127_v52, %v9391_v60 }
 0x6c4   : > { %v6506_v43 = vpop.f32.mrf.mxu1  ;;  %v9757_v52 = vld [vmem:[#allocation31_spill] sm:$0xff] }
 0x6c5   : > { %5447 = vst.msk [vmem:[%s9418_s11 + $0x60] sm:$0xff] %vm853_vm5, %v5415_v8  ;;  %v5418_v42 = vadd.f32 %v5386_v23, %v9743_v24  ;;  %v5384_v33 = vadd.f32 %v9408_v56, %v5347_v63  ;;  %v5352_v19 = vadd.f32 %v6506_v43, %v5101_v47  ;;  %v6480_v47 = vpop.f32.mrf.mxu0  ;;  %v9751_v43 = vld [vmem:[#allocation25_spill] sm:$0xff] }
 0x6c6   : > { %v5271_v58 = vpop.f32.mrf.mxu1 }
 0x6c7   : > { %5450 = vst.msk [vmem:[%s9418_s11 + $0x78] sm:$0xff] %vm853_vm5, %v5418_v42  ;;  %v5416_v27 = vadd.f32 %v5384_v33, %v9744_v2  ;;  %v5389_v7 = vadd.f32 %v9408_v56, %v5352_v19  ;;  %v5350_v59 = vadd.f32 %v5271_v58, %v5093_v53  ;;  %v5140_v33 = vpop.f32.mrf.mxu0  ;;  %v9752_v19 = vld [vmem:[#allocation26_spill] sm:$0xff] }
 0x6c8   : > { %v6507_v30 = vpop.f32.mrf.mxu1 }
 0x6c9   : > { %5448 = vst.msk [vmem:[%s9418_s11 + $0x68] sm:$0xff] %vm853_vm5, %v5416_v27  ;;  %v5421_v12 = vadd.f32 %v5389_v7, %v9745_v9  ;;  %v5387_v5 = vadd.f32 %v9408_v56, %v5350_v59  ;;  %v5353_v18 = vadd.f32 %v6507_v30, %v5104_v11  ;;  %v9753_v27 = vld [vmem:[#allocation27_spill] sm:$0xff]  ;;  %v5149_v9 = vadd.f32 %v6480_v47, %v9393_v16 }
 0x6ca   : > { %v5274_v10 = vpop.f32.mrf.mxu1 }
 0x6cb   : > { %5453 = vst.msk [vmem:[%s9418_s11 + $0x90] sm:$0xff] %vm853_vm5, %v5421_v12  ;;  %v5419_v57 = vadd.f32 %v5387_v5, %v9746_v13  ;;  %v5390_v32 = vadd.f32 %v9408_v56, %v5353_v18  ;;  %v5351_v4 = vadd.f32 %v5274_v10, %v5096_v62  ;;  %v6481_v62 = vpop.f32.mrf.mxu0  ;;  %v9754_v12 = vld [vmem:[#allocation28_spill] sm:$0xff]  ;;  %v5141_v10 = vadd.f32 %v5140_v33, %v9397_v50 }
 0x6cc   : > { %v6510_v61 = vpop.f32.mrf.mxu1 }
 0x6cd   : > { %5451 = vst.msk [vmem:[%s9418_s11 + $0x80] sm:$0xff] %vm853_vm5, %v5419_v57  ;;  %v5422_v48 = vadd.f32 %v5390_v32, %v9747_v35  ;;  %v5388_v1 = vadd.f32 %v9408_v56, %v5351_v4  ;;  %v5356_v49 = vadd.f32 %v6510_v61, %v5117_v55  ;;  %v9755_v55 = vld [vmem:[#allocation29_spill] sm:$0xff]  ;;  %v5143_v16 = vpop.f32.mrf.mxu0  ;;  %v5152_v61 = vadd.f32 %v6481_v62, %v9399_v22 }
 0x6ce   : > { %v5287_v51 = vpop.f32.mrf.mxu1 }
 0x6cf   : > { %5454 = vst.msk [vmem:[%s9418_s11 + $0x98] sm:$0xff] %vm853_vm5, %v5422_v48  ;;  %v5420_v15 = vadd.f32 %v5388_v1, %v9748_v6  ;;  %v5393_v14 = vadd.f32 %v9408_v56, %v5356_v49  ;;  %v5354_v0 = vadd.f32 %v5287_v51, %v5109_v17  ;;  %v9756_v17 = vld [vmem:[#allocation30_spill] sm:$0xff]  ;;  %v5144_v49 = vadd.f32 %v5143_v16, %v9403_v31 }
 0x6d0   : > { %v6511_v28 = vpop.f32.mrf.mxu1 }
 0x6d1   : > { %5452 = vst.msk [vmem:[%s9418_s11 + $0x88] sm:$0xff] %vm853_vm5, %v5420_v15  ;;  %v5425_v45 = vadd.f32 %v5393_v14, %v9749_v44  ;;  %v5391_v29 = vadd.f32 %v9408_v56, %v5354_v0  ;;  %v5357_v26 = vadd.f32 %v6511_v28, %v5120_v21  ;;  %v9758_v15 = vld [vmem:[#allocation32_spill] sm:$0xff] }
 0x6d2   : > { %v5290_v3 = vpop.f32.mrf.mxu1 }
 0x6d3   : > { %5457 = vst.msk [vmem:[%s9418_s11 + $0xb0] sm:$0xff] %vm853_vm5, %v5425_v45  ;;  %v5423_v8 = vadd.f32 %v5391_v29, %v9750_v40  ;;  %v5394_v23 = vadd.f32 %v9408_v56, %v5357_v26  ;;  %v5355_v63 = vadd.f32 %v5290_v3, %v5112_v46  ;;  %v9759_v46 = vld [vmem:[#allocation33_spill] sm:$0xff]  ;;  %v9760_v45 = vld [vmem:[#allocation34_spill] sm:$0xff] }
 0x6d4   : > { %v6514_v25 = vpop.f32.mrf.mxu1 }
 0x6d5   : > { %5455 = vst.msk [vmem:[%s9418_s11 + $0xa0] sm:$0xff] %vm853_vm5, %v5423_v8  ;;  %v5426_v53 = vadd.f32 %v5394_v23, %v9751_v43  ;;  %v5392_v24 = vadd.f32 %v9408_v56, %v5355_v63  ;;  %v5360_v42 = vadd.f32 %v6514_v25, %v5133_v41 }
 0x6d6   : > { %v5303_v37 = vpop.f32.mrf.mxu1 }
 0x6d7   : > { %5458 = vst.msk [vmem:[%s9418_s11 + $0xb8] sm:$0xff] %vm853_vm5, %v5426_v53  ;;  %v5424_v58 = vadd.f32 %v5392_v24, %v9752_v19  ;;  %v5397_v11 = vadd.f32 %v9408_v56, %v5360_v42  ;;  %v5358_v2 = vadd.f32 %v5303_v37, %v5125_v38 }
 0x6d8   : > { %v6515_v20 = vpop.f32.mrf.mxu1 }
 0x6d9   : > { %5456 = vst.msk [vmem:[%s9418_s11 + $0xa8] sm:$0xff] %vm853_vm5, %v5424_v58  ;;  %v5429_v7 = vadd.f32 %v5397_v11, %v9753_v27  ;;  %v5395_v59 = vadd.f32 %v9408_v56, %v5358_v2  ;;  %v5361_v30 = vadd.f32 %v6515_v20, %v5136_v34 }
 0x6da   : > { %v5306_v54 = vpop.f32.mrf.mxu1 }
 0x6db   : > { %5461 = vst.msk [vmem:[%s9418_s11 + $0xd0] sm:$0xff] %vm853_vm5, %v5429_v7  ;;  %v5427_v5 = vadd.f32 %v5395_v59, %v9754_v12  ;;  %v5398_v18 = vadd.f32 %v9408_v56, %v5361_v30  ;;  %v5359_v39 = vadd.f32 %v5306_v54, %v5128_v36 }
 0x6dc   : > { %v6518_v60 = vpop.f32.mrf.mxu1 }
 0x6dd   : > { %5459 = vst.msk [vmem:[%s9418_s11 + $0xc0] sm:$0xff] %vm853_vm5, %v5427_v5  ;;  %v5430_v13 = vadd.f32 %v5398_v18, %v9755_v55  ;;  %v5396_v57 = vadd.f32 %v9408_v56, %v5359_v39  ;;  %v5364_v32 = vadd.f32 %v6518_v60, %v5149_v9 }
 0x6de   : > { %v5319_v4 = vpop.f32.mrf.mxu1 }
 0x6df   : > { %5462 = vst.msk [vmem:[%s9418_s11 + $0xd8] sm:$0xff] %vm853_vm5, %v5430_v13  ;;  %v5428_v35 = vadd.f32 %v5396_v57, %v9756_v17  ;;  %v5401_v48 = vadd.f32 %v9408_v56, %v5364_v32  ;;  %v5362_v50 = vadd.f32 %v5319_v4, %v5141_v10 }
 0x6e0   : > { %v6519_v1 = vpop.f32.mrf.mxu1 }
 0x6e1   : > { %5460 = vst.msk [vmem:[%s9418_s11 + $0xc8] sm:$0xff] %vm853_vm5, %v5428_v35  ;;  %v5433_v51 = vadd.f32 %v5401_v48, %v9757_v52  ;;  %v5399_v21 = vadd.f32 %v9408_v56, %v5362_v50  ;;  %v5365_v22 = vadd.f32 %v6519_v1, %v5152_v61 }
 0x6e2   : > { %v5322_v6 = vpop.f32.mrf.mxu1 }
 0x6e3   : > { %5465 = vst.msk [vmem:[%s9418_s11 + $0xf0] sm:$0xff] %vm853_vm5, %v5433_v51  ;;  %v5431_v14 = vadd.f32 %v5399_v21, %v9758_v15  ;;  %v5402_v0 = vadd.f32 %v9408_v56, %v5365_v22  ;;  %v5363_v28 = vadd.f32 %v5322_v6, %v5144_v49 }
 0x6e5   : > { %5463 = vst.msk [vmem:[%s9418_s11 + $0xe0] sm:$0xff] %vm853_vm5, %v5431_v14  ;;  %v5434_v44 = vadd.f32 %v5402_v0, %v9759_v46  ;;  %v5400_v31 = vadd.f32 %v9408_v56, %v5363_v28 }
 0x6e7   : > { %5466 = vst.msk [vmem:[%s9418_s11 + $0xf8] sm:$0xff] %vm853_vm5, %v5434_v44  ;;  %v5432_v29 = vadd.f32 %v5400_v31, %v9760_v45 }
 0x6e9   : > { %5464 = vst.msk [vmem:[%s9418_s11 + $0xe8] sm:$0xff] %vm853_vm5, %v5432_v29 }
 0x6ea PF: > { %s15_s20 = sadd.s32 1, %s6637_s20   ;;  %s9761_s18 = smov %s6633_s19 }
 0x6eb   : > { %p12_p5 = scmp.ge.s32.totalorder %s15_s20, 4   ;;  %s9762_s19 = smov %s9764_s21 }
 0x6ed   :  { %14 = sbr.rel (!%p12_p5) target bundleno = 2 (0x2), region = 72 }

</bundles_post_ra>
